<compile_context>
chip_gen: v6e
topology: v6e:2x2x1
jax: 0.10.0
libtpu: 0.0.40
codegen_flags: <defaults>
</compile_context>

<pallas_src>
import functools

import jax
import jax.numpy as jnp
from jax.experimental import pallas as pl
from jax.experimental.pallas import tpu as pltpu


# ---------------------------------------------------------------------------
# Kernel 1/2: fused 3x3 same-conv + bias + ReLU + 2x2 (stride 2) max pool.
# One image per grid step.
# ---------------------------------------------------------------------------
def _conv3x3_relu_pool_kernel(x_ref, w_ref, b_ref, o_ref, y_ref, *, H, W, Cin, Cout):
    """x_ref: (1, H+2, W+2, Cin) padded input tile
       w_ref: (9, Cin, Cout)     tap-major weights (tap = kh*3+kw)
       b_ref: (1, Cout)          bias (f32)
       o_ref: (1, H//2, (W//2)*Cout)  pooled output, lane-dense
       y_ref: (H*W, Cout) f32    VMEM scratch with the pre-pool activation
    """
    acc = jnp.zeros((H * W, Cout), jnp.float32)
    for kh in range(3):
        for kw in range(3):
            tap = kh * 3 + kw
            # in-kernel "im2col": shifted window of the padded VMEM tile
            s = x_ref[0, kh:kh + H, kw:kw + W, :].reshape(H * W, Cin)
            if Cin == 1:
                # Cin == 1: a K=1 matmul would leave the MXU >99% idle; use a
                # VPU broadcast multiply-accumulate instead (weights kept f32).
                acc = acc + s.astype(jnp.float32) * w_ref[tap].astype(jnp.float32)
            else:
                acc = acc + jnp.dot(s.astype(jnp.bfloat16), w_ref[tap],
                                    preferred_element_type=jnp.float32)
    # bias + ReLU in f32, stash pre-pool activation in VMEM scratch
    y_ref[...] = jnp.maximum(acc + b_ref[...], 0.0)

    # 2x2/2 max pool.  Rows of y_ref are (h, w) flattened, so the 4 corners of
    # pooled column-block `wo` live at rows (2*ho + dh)*W + 2*wo + dw, i.e.
    # stride-(2W) row slices.  Result is written as (Ho, Wo*Cout) -> lane dense.
    Ho, Wo = H // 2, W // 2
    for wo in range(Wo):
        c00 = y_ref[pl.ds(2 * wo,         Ho, 2 * W), :]
        c01 = y_ref[pl.ds(2 * wo + 1,     Ho, 2 * W), :]
        c10 = y_ref[pl.ds(W + 2 * wo,     Ho, 2 * W), :]
        c11 = y_ref[pl.ds(W + 2 * wo + 1, Ho, 2 * W), :]
        pooled = jnp.maximum(jnp.maximum(c00, c01), jnp.maximum(c10, c11))
        o_ref[0, :, wo * Cout:(wo + 1) * Cout] = pooled.astype(o_ref.dtype)


def conv3x3_relu_pool(x_pad, w_taps, b_row):
    """x_pad: (N, H+2, W+2, Cin); w_taps: (9, Cin, Cout); b_row: (1, Cout).
    Returns pooled activation (N, H//2, (W//2)*Cout) in bf16, (h, w, c) order."""
    N, Hp, Wp, Cin = x_pad.shape
    H, W = Hp - 2, Wp - 2
    Cout = w_taps.shape[-1]
    Ho, Wo = H // 2, W // 2
    kernel = functools.partial(_conv3x3_relu_pool_kernel, H=H, W=W, Cin=Cin, Cout=Cout)
    return pl.pallas_call(
        kernel,
        out_shape=jax.ShapeDtypeStruct((N, Ho, Wo * Cout), jnp.bfloat16),
        grid=(N,),
        in_specs=[
            pl.BlockSpec((1, Hp, Wp, Cin), lambda n: (n, 0, 0, 0)),
            pl.BlockSpec(w_taps.shape, lambda n: (0, 0, 0)),   # resident, no re-DMA
            pl.BlockSpec(b_row.shape, lambda n: (0, 0)),       # resident, no re-DMA
        ],
        out_specs=pl.BlockSpec((1, Ho, Wo * Cout), lambda n: (n, 0, 0)),
        scratch_shapes=[pltpu.VMEM((H * W, Cout), jnp.float32)],
        compiler_params=pltpu.CompilerParams(dimension_semantics=("parallel",)),
    )(x_pad, w_taps, b_row)


# ---------------------------------------------------------------------------
# Kernel 3: fused fc1 + ReLU + fc2 + ReLU + fc3 (intermediates never hit HBM).
# ---------------------------------------------------------------------------
def _mlp3_kernel(x_ref, w1_ref, b1_ref, w2_ref, b2_ref, w3_ref, b3_ref, o_ref):
    h = jnp.dot(x_ref[...].astype(jnp.bfloat16), w1_ref[...],
                preferred_element_type=jnp.float32) + b1_ref[...]
    h = jnp.maximum(h, 0.0)
    h = jnp.dot(h.astype(jnp.bfloat16), w2_ref[...],
                preferred_element_type=jnp.float32) + b2_ref[...]
    h = jnp.maximum(h, 0.0)
    y = jnp.dot(h.astype(jnp.bfloat16), w3_ref[...],
                preferred_element_type=jnp.float32) + b3_ref[...]
    o_ref[...] = y.astype(o_ref.dtype)


def mlp3(x, p):
    """x: (M, 512) in (h, w, c) feature order; weights pre-permuted/cast."""
    M, K = x.shape
    n_out = p["wfc3"].shape[1]
    bm = M if M <= 256 else 256          # row-tile so the kernel scales with batch
    return pl.pallas_call(
        _mlp3_kernel,
        out_shape=jax.ShapeDtypeStruct((M, n_out), jnp.float32),
        grid=(pl.cdiv(M, bm),),
        in_specs=[
            pl.BlockSpec((bm, K), lambda i: (i, 0)),
            pl.BlockSpec(p["wfc1"].shape, lambda i: (0, 0)),
            pl.BlockSpec(p["bfc1"].shape, lambda i: (0, 0)),
            pl.BlockSpec(p["wfc2"].shape, lambda i: (0, 0)),
            pl.BlockSpec(p["bfc2"].shape, lambda i: (0, 0)),
            pl.BlockSpec(p["wfc3"].shape, lambda i: (0, 0)),
            pl.BlockSpec(p["bfc3"].shape, lambda i: (0, 0)),
        ],
        out_specs=pl.BlockSpec((bm, n_out), lambda i: (i, 0)),
        compiler_params=pltpu.CompilerParams(dimension_semantics=("parallel",)),
    )(x, p["wfc1"], p["bfc1"], p["wfc2"], p["bfc2"], p["wfc3"], p["bfc3"])


# ---------------------------------------------------------------------------
# Parameters (PyTorch-convention shapes) + one-time kernel-layout preparation
# ---------------------------------------------------------------------------
def init_params(key, input_shape=(16, 16), num_classes=10):
    H, W = input_shape
    conv_output_size = (H // 4) * (W // 4)   # matches _calculate_conv_output_size
    ks = jax.random.split(key, 10)

    def u(k, shape, fan_in):
        bound = 1.0 / jnp.sqrt(jnp.float32(fan_in))
        return jax.random.uniform(k, shape, jnp.float32, -bound, bound)

    return {
        "w1": u(ks[0], (16, 1, 3, 3), 9),
        "b1": u(ks[1], (16,), 9),
        "w2": u(ks[2], (32, 16, 3, 3), 16 * 9),
        "b2": u(ks[3], (32,), 16 * 9),
        "wfc1": u(ks[4], (32 * conv_output_size, 128), 32 * conv_output_size),
        "bfc1": u(ks[5], (128,), 32 * conv_output_size),
        "wfc2": u(ks[6], (128, 64), 128),
        "bfc2": u(ks[7], (64,), 128),
        "wfc3": u(ks[8], (64, num_classes), 64),
        "bfc3": u(ks[9], (64,), 64)[: num_classes] * 0 + u(ks[9], (num_classes,), 64),
    }


def prepare_params(params, input_shape=(16, 16)):
    """One-time layout prep: tap-major conv weights, bf16 MXU weights,
    (1, N) biases, and fc1 rows permuted from PyTorch (c,h,w) to (h,w,c)."""
    H, W = input_shape
    ho2, wo2 = H // 4, W // 4

    def conv_prep(w, dtype):                      # (Cout, Cin, 3, 3) -> (9, Cin, Cout)
        cout, cin = w.shape[0], w.shape[1]
        return jnp.transpose(w, (2, 3, 1, 0)).reshape(9, cin, cout).astype(dtype)

    wfc1 = params["wfc1"]                         # rows in PyTorch (c, h, w) order
    n_hidden = wfc1.shape[1]
    wfc1_hwc = (wfc1.reshape(32, ho2, wo2, n_hidden)
                    .transpose(1, 2, 0, 3)
                    .reshape(32 * ho2 * wo2, n_hidden))

    return {
        "w1": conv_prep(params["w1"], jnp.float32),     # conv1 runs on the VPU -> f32
        "b1": params["b1"].reshape(1, -1).astype(jnp.float32),
        "w2": conv_prep(params["w2"], jnp.bfloat16),    # conv2 runs on the MXU -> bf16
        "b2": params["b2"].reshape(1, -1).astype(jnp.float32),
        "wfc1": wfc1_hwc.astype(jnp.bfloat16),
        "bfc1": params["bfc1"].reshape(1, -1).astype(jnp.float32),
        "wfc2": params["wfc2"].astype(jnp.bfloat16),
        "bfc2": params["bfc2"].reshape(1, -1).astype(jnp.float32),
        "wfc3": params["wfc3"].astype(jnp.bfloat16),
        "bfc3": params["bfc3"].reshape(1, -1).astype(jnp.float32),
    }


# ---------------------------------------------------------------------------
# Forward pass (3 pallas_calls; interstitial ops are only tiny pads/reshapes)
# ---------------------------------------------------------------------------
@jax.jit
def simple_cnn_forward(x_nchw, prepped):
    n, _, h, w = x_nchw.shape
    # assumes H, W divisible by 4, as in the reference configuration
    x = jnp.transpose(x_nchw, (0, 2, 3, 1)).astype(jnp.float32)      # NHWC (N,H,W,1)
    x = jnp.pad(x, ((0, 0), (1, 1), (1, 1), (0, 0)))                 # same-padding for conv1
    p1 = conv3x3_relu_pool(x, prepped["w1"], prepped["b1"])          # (N, H/2, (W/2)*16) bf16
    c1 = prepped["w1"].shape[-1]
    x2 = p1.reshape(n, h // 2, w // 2, c1)                           # contiguous reinterpret
    x2 = jnp.pad(x2, ((0, 0), (1, 1), (1, 1), (0, 0)))               # same-padding for conv2
    p2 = conv3x3_relu_pool(x2, prepped["w2"], prepped["b2"])         # (N, H/4, (W/4)*32) bf16
    feat = p2.reshape(n, -1)                                         # (h, w, c) feature order
    return mlp3(feat, prepped)                                       # (N, num_classes) f32


if __name__ == "__main__":
    key = jax.random.PRNGKey(0)
    k_params, k_x = jax.random.split(key)

    input_shape = (16, 16)
    num_classes = 10
    batch = 2

    raw_params = init_params(k_params, input_shape=input_shape, num_classes=num_classes)
    prepped = prepare_params(raw_params, input_shape=input_shape)

    x = jax.random.normal(k_x, (batch, 1, *input_shape), dtype=jnp.float32)

    out = simple_cnn_forward(x, prepped)
    out = jax.block_until_ready(out)

    assert out.shape == (batch, num_classes), out.shape
    assert bool(jnp.all(jnp.isfinite(out)))
    print("KERNEL_OK")
</pallas_src>

<mosaic_0001>
module attributes {stable_mosaic.version = 11 : i64} {
  func.func @_conv3x3_relu_pool_kernel(%arg0: i32, %arg1: memref<1x18x18x1xf32, #tpu.memory_space<vmem>>, %arg2: memref<9x1x16xf32, #tpu.memory_space<vmem>>, %arg3: memref<1x16xf32, #tpu.memory_space<vmem>>, %arg4: memref<1x8x128xbf16, #tpu.memory_space<vmem>>, %arg5: memref<256x16xf32, #tpu.memory_space<vmem>>) attributes {dimension_semantics = [#tpu.dimension_semantics<parallel>], iteration_bounds = array<i64: 2>, scalar_prefetch = 0 : i64, scratch_operands = 1 : i64, tpu.core_type = #tpu.core_type<tc>, window_params = [{transform_indices = @transform_0, window_bounds = array<i64: 1, 18, 18, 1>}, {pipeline_mode = #tpu.pipeline_mode<synchronous>, transform_indices = @transform_1, window_bounds = array<i64: 9, 1, 16>}, {pipeline_mode = #tpu.pipeline_mode<synchronous>, transform_indices = @transform_2, window_bounds = array<i64: 1, 16>}, {transform_indices = @transform_3, window_bounds = array<i64: 1, 8, 128>}]} {
    %cst = arith.constant 0.000000e+00 : f32
    %0 = vector.broadcast %cst : f32 to vector<256x16xf32>
    %c0 = arith.constant 0 : index
    %c0_0 = arith.constant 0 : index
    %c0_1 = arith.constant 0 : index
    %c0_2 = arith.constant 0 : index
    %1 = vector.load %arg1[%c0, %c0_0, %c0_1, %c0_2] : memref<1x18x18x1xf32, #tpu.memory_space<vmem>>, vector<1x16x16x1xf32>
    %2 = vector.shape_cast %1 : vector<1x16x16x1xf32> to vector<16x16x1xf32>
    %3 = vector.shape_cast %2 : vector<16x16x1xf32> to vector<256x1xf32>
    %c0_3 = arith.constant 0 : index
    %c0_4 = arith.constant 0 : index
    %c0_5 = arith.constant 0 : index
    %4 = vector.load %arg2[%c0_3, %c0_4, %c0_5] : memref<9x1x16xf32, #tpu.memory_space<vmem>>, vector<1x1x16xf32>
    %5 = vector.shape_cast %4 : vector<1x1x16xf32> to vector<1x16xf32>
    %6 = vector.broadcast %3 : vector<256x1xf32> to vector<256x16xf32>
    %7 = vector.broadcast %5 : vector<1x16xf32> to vector<256x16xf32>
    %8 = arith.mulf %6, %7 : vector<256x16xf32>
    %9 = arith.addf %0, %8 : vector<256x16xf32>
    %c0_6 = arith.constant 0 : index
    %c0_7 = arith.constant 0 : index
    %c1 = arith.constant 1 : index
    %c0_8 = arith.constant 0 : index
    %10 = vector.load %arg1[%c0_6, %c0_7, %c1, %c0_8] : memref<1x18x18x1xf32, #tpu.memory_space<vmem>>, vector<1x16x16x1xf32>
    %11 = vector.shape_cast %10 : vector<1x16x16x1xf32> to vector<16x16x1xf32>
    %12 = vector.shape_cast %11 : vector<16x16x1xf32> to vector<256x1xf32>
    %c1_9 = arith.constant 1 : index
    %c0_10 = arith.constant 0 : index
    %c0_11 = arith.constant 0 : index
    %13 = vector.load %arg2[%c1_9, %c0_10, %c0_11] : memref<9x1x16xf32, #tpu.memory_space<vmem>>, vector<1x1x16xf32>
    %14 = vector.shape_cast %13 : vector<1x1x16xf32> to vector<1x16xf32>
    %15 = vector.broadcast %12 : vector<256x1xf32> to vector<256x16xf32>
    %16 = vector.broadcast %14 : vector<1x16xf32> to vector<256x16xf32>
    %17 = arith.mulf %15, %16 : vector<256x16xf32>
    %18 = arith.addf %9, %17 : vector<256x16xf32>
    %c0_12 = arith.constant 0 : index
    %c0_13 = arith.constant 0 : index
    %c2 = arith.constant 2 : index
    %c0_14 = arith.constant 0 : index
    %19 = vector.load %arg1[%c0_12, %c0_13, %c2, %c0_14] : memref<1x18x18x1xf32, #tpu.memory_space<vmem>>, vector<1x16x16x1xf32>
    %20 = vector.shape_cast %19 : vector<1x16x16x1xf32> to vector<16x16x1xf32>
    %21 = vector.shape_cast %20 : vector<16x16x1xf32> to vector<256x1xf32>
    %c2_15 = arith.constant 2 : index
    %c0_16 = arith.constant 0 : index
    %c0_17 = arith.constant 0 : index
    %22 = vector.load %arg2[%c2_15, %c0_16, %c0_17] : memref<9x1x16xf32, #tpu.memory_space<vmem>>, vector<1x1x16xf32>
    %23 = vector.shape_cast %22 : vector<1x1x16xf32> to vector<1x16xf32>
    %24 = vector.broadcast %21 : vector<256x1xf32> to vector<256x16xf32>
    %25 = vector.broadcast %23 : vector<1x16xf32> to vector<256x16xf32>
    %26 = arith.mulf %24, %25 : vector<256x16xf32>
    %27 = arith.addf %18, %26 : vector<256x16xf32>
    %c0_18 = arith.constant 0 : index
    %c1_19 = arith.constant 1 : index
    %c0_20 = arith.constant 0 : index
    %c0_21 = arith.constant 0 : index
    %28 = vector.load %arg1[%c0_18, %c1_19, %c0_20, %c0_21] : memref<1x18x18x1xf32, #tpu.memory_space<vmem>>, vector<1x16x16x1xf32>
    %29 = vector.shape_cast %28 : vector<1x16x16x1xf32> to vector<16x16x1xf32>
    %30 = vector.shape_cast %29 : vector<16x16x1xf32> to vector<256x1xf32>
    %c3 = arith.constant 3 : index
    %c0_22 = arith.constant 0 : index
    %c0_23 = arith.constant 0 : index
    %31 = vector.load %arg2[%c3, %c0_22, %c0_23] : memref<9x1x16xf32, #tpu.memory_space<vmem>>, vector<1x1x16xf32>
    %32 = vector.shape_cast %31 : vector<1x1x16xf32> to vector<1x16xf32>
    %33 = vector.broadcast %30 : vector<256x1xf32> to vector<256x16xf32>
    %34 = vector.broadcast %32 : vector<1x16xf32> to vector<256x16xf32>
    %35 = arith.mulf %33, %34 : vector<256x16xf32>
    %36 = arith.addf %27, %35 : vector<256x16xf32>
    %c0_24 = arith.constant 0 : index
    %c1_25 = arith.constant 1 : index
    %c1_26 = arith.constant 1 : index
    %c0_27 = arith.constant 0 : index
    %37 = vector.load %arg1[%c0_24, %c1_25, %c1_26, %c0_27] : memref<1x18x18x1xf32, #tpu.memory_space<vmem>>, vector<1x16x16x1xf32>
    %38 = vector.shape_cast %37 : vector<1x16x16x1xf32> to vector<16x16x1xf32>
    %39 = vector.shape_cast %38 : vector<16x16x1xf32> to vector<256x1xf32>
    %c4 = arith.constant 4 : index
    %c0_28 = arith.constant 0 : index
    %c0_29 = arith.constant 0 : index
    %40 = vector.load %arg2[%c4, %c0_28, %c0_29] : memref<9x1x16xf32, #tpu.memory_space<vmem>>, vector<1x1x16xf32>
    %41 = vector.shape_cast %40 : vector<1x1x16xf32> to vector<1x16xf32>
    %42 = vector.broadcast %39 : vector<256x1xf32> to vector<256x16xf32>
    %43 = vector.broadcast %41 : vector<1x16xf32> to vector<256x16xf32>
    %44 = arith.mulf %42, %43 : vector<256x16xf32>
    %45 = arith.addf %36, %44 : vector<256x16xf32>
    %c0_30 = arith.constant 0 : index
    %c1_31 = arith.constant 1 : index
    %c2_32 = arith.constant 2 : index
    %c0_33 = arith.constant 0 : index
    %46 = vector.load %arg1[%c0_30, %c1_31, %c2_32, %c0_33] : memref<1x18x18x1xf32, #tpu.memory_space<vmem>>, vector<1x16x16x1xf32>
    %47 = vector.shape_cast %46 : vector<1x16x16x1xf32> to vector<16x16x1xf32>
    %48 = vector.shape_cast %47 : vector<16x16x1xf32> to vector<256x1xf32>
    %c5 = arith.constant 5 : index
    %c0_34 = arith.constant 0 : index
    %c0_35 = arith.constant 0 : index
    %49 = vector.load %arg2[%c5, %c0_34, %c0_35] : memref<9x1x16xf32, #tpu.memory_space<vmem>>, vector<1x1x16xf32>
    %50 = vector.shape_cast %49 : vector<1x1x16xf32> to vector<1x16xf32>
    %51 = vector.broadcast %48 : vector<256x1xf32> to vector<256x16xf32>
    %52 = vector.broadcast %50 : vector<1x16xf32> to vector<256x16xf32>
    %53 = arith.mulf %51, %52 : vector<256x16xf32>
    %54 = arith.addf %45, %53 : vector<256x16xf32>
    %c0_36 = arith.constant 0 : index
    %c2_37 = arith.constant 2 : index
    %c0_38 = arith.constant 0 : index
    %c0_39 = arith.constant 0 : index
    %55 = vector.load %arg1[%c0_36, %c2_37, %c0_38, %c0_39] : memref<1x18x18x1xf32, #tpu.memory_space<vmem>>, vector<1x16x16x1xf32>
    %56 = vector.shape_cast %55 : vector<1x16x16x1xf32> to vector<16x16x1xf32>
    %57 = vector.shape_cast %56 : vector<16x16x1xf32> to vector<256x1xf32>
    %c6 = arith.constant 6 : index
    %c0_40 = arith.constant 0 : index
    %c0_41 = arith.constant 0 : index
    %58 = vector.load %arg2[%c6, %c0_40, %c0_41] : memref<9x1x16xf32, #tpu.memory_space<vmem>>, vector<1x1x16xf32>
    %59 = vector.shape_cast %58 : vector<1x1x16xf32> to vector<1x16xf32>
    %60 = vector.broadcast %57 : vector<256x1xf32> to vector<256x16xf32>
    %61 = vector.broadcast %59 : vector<1x16xf32> to vector<256x16xf32>
    %62 = arith.mulf %60, %61 : vector<256x16xf32>
    %63 = arith.addf %54, %62 : vector<256x16xf32>
    %c0_42 = arith.constant 0 : index
    %c2_43 = arith.constant 2 : index
    %c1_44 = arith.constant 1 : index
    %c0_45 = arith.constant 0 : index
    %64 = vector.load %arg1[%c0_42, %c2_43, %c1_44, %c0_45] : memref<1x18x18x1xf32, #tpu.memory_space<vmem>>, vector<1x16x16x1xf32>
    %65 = vector.shape_cast %64 : vector<1x16x16x1xf32> to vector<16x16x1xf32>
    %66 = vector.shape_cast %65 : vector<16x16x1xf32> to vector<256x1xf32>
    %c7 = arith.constant 7 : index
    %c0_46 = arith.constant 0 : index
    %c0_47 = arith.constant 0 : index
    %67 = vector.load %arg2[%c7, %c0_46, %c0_47] : memref<9x1x16xf32, #tpu.memory_space<vmem>>, vector<1x1x16xf32>
    %68 = vector.shape_cast %67 : vector<1x1x16xf32> to vector<1x16xf32>
    %69 = vector.broadcast %66 : vector<256x1xf32> to vector<256x16xf32>
    %70 = vector.broadcast %68 : vector<1x16xf32> to vector<256x16xf32>
    %71 = arith.mulf %69, %70 : vector<256x16xf32>
    %72 = arith.addf %63, %71 : vector<256x16xf32>
    %c0_48 = arith.constant 0 : index
    %c2_49 = arith.constant 2 : index
    %c2_50 = arith.constant 2 : index
    %c0_51 = arith.constant 0 : index
    %73 = vector.load %arg1[%c0_48, %c2_49, %c2_50, %c0_51] : memref<1x18x18x1xf32, #tpu.memory_space<vmem>>, vector<1x16x16x1xf32>
    %74 = vector.shape_cast %73 : vector<1x16x16x1xf32> to vector<16x16x1xf32>
    %75 = vector.shape_cast %74 : vector<16x16x1xf32> to vector<256x1xf32>
    %c8 = arith.constant 8 : index
    %c0_52 = arith.constant 0 : index
    %c0_53 = arith.constant 0 : index
    %76 = vector.load %arg2[%c8, %c0_52, %c0_53] : memref<9x1x16xf32, #tpu.memory_space<vmem>>, vector<1x1x16xf32>
    %77 = vector.shape_cast %76 : vector<1x1x16xf32> to vector<1x16xf32>
    %78 = vector.broadcast %75 : vector<256x1xf32> to vector<256x16xf32>
    %79 = vector.broadcast %77 : vector<1x16xf32> to vector<256x16xf32>
    %80 = arith.mulf %78, %79 : vector<256x16xf32>
    %81 = arith.addf %72, %80 : vector<256x16xf32>
    %c0_54 = arith.constant 0 : index
    %c0_55 = arith.constant 0 : index
    %82 = vector.load %arg3[%c0_54, %c0_55] : memref<1x16xf32, #tpu.memory_space<vmem>>, vector<1x16xf32>
    %83 = vector.broadcast %82 : vector<1x16xf32> to vector<256x16xf32>
    %84 = arith.addf %81, %83 : vector<256x16xf32>
    %cst_56 = arith.constant 0.000000e+00 : f32
    %85 = vector.broadcast %cst_56 : f32 to vector<256x16xf32>
    %86 = arith.maximumf %84, %85 : vector<256x16xf32>
    %c0_57 = arith.constant 0 : index
    %c0_58 = arith.constant 0 : index
    %87 = vector.load %arg5[%c0_57, %c0_58] : memref<256x16xf32, #tpu.memory_space<vmem>>, vector<256x16xf32>
    tpu.vector_store %arg5[%c0_57, %c0_58], %86 {strides = array<i32>} : memref<256x16xf32, #tpu.memory_space<vmem>>, vector<256x16xf32>,
    %c0_59 = arith.constant 0 : index
    %c0_60 = arith.constant 0 : index
    %88 = tpu.strided_load %arg5[%c0_59, %c0_60] {strides = array<i32: 32, 1>} : memref<256x16xf32, #tpu.memory_space<vmem>>, vector<8x16xf32>
    %c1_61 = arith.constant 1 : index
    %c0_62 = arith.constant 0 : index
    %89 = tpu.strided_load %arg5[%c1_61, %c0_62] {strides = array<i32: 32, 1>} : memref<256x16xf32, #tpu.memory_space<vmem>>, vector<8x16xf32>
    %c16 = arith.constant 16 : index
    %c0_63 = arith.constant 0 : index
    %90 = tpu.strided_load %arg5[%c16, %c0_63] {strides = array<i32: 32, 1>} : memref<256x16xf32, #tpu.memory_space<vmem>>, vector<8x16xf32>
    %c17 = arith.constant 17 : index
    %c0_64 = arith.constant 0 : index
    %91 = tpu.strided_load %arg5[%c17, %c0_64] {strides = array<i32: 32, 1>} : memref<256x16xf32, #tpu.memory_space<vmem>>, vector<8x16xf32>
    %92 = arith.maximumf %88, %89 : vector<8x16xf32>
    %93 = arith.maximumf %90, %91 : vector<8x16xf32>
    %94 = arith.maximumf %92, %93 : vector<8x16xf32>
    %95 = arith.truncf %94 : vector<8x16xf32> to vector<8x16xbf16>
    %c0_65 = arith.constant 0 : index
    %c0_66 = arith.constant 0 : index
    %c0_67 = arith.constant 0 : index
    %96 = vector.load %arg4[%c0_65, %c0_66, %c0_67] : memref<1x8x128xbf16, #tpu.memory_space<vmem>>, vector<1x8x16xbf16>
    %97 = vector.shape_cast %96 : vector<1x8x16xbf16> to vector<8x16xbf16>
    %98 = vector.shape_cast %95 : vector<8x16xbf16> to vector<1x8x16xbf16>
    tpu.vector_store %arg4[%c0_65, %c0_66, %c0_67], %98 {strides = array<i32>} : memref<1x8x128xbf16, #tpu.memory_space<vmem>>, vector<1x8x16xbf16>,
    %c2_68 = arith.constant 2 : index
    %c0_69 = arith.constant 0 : index
    %99 = tpu.strided_load %arg5[%c2_68, %c0_69] {strides = array<i32: 32, 1>} : memref<256x16xf32, #tpu.memory_space<vmem>>, vector<8x16xf32>
    %c3_70 = arith.constant 3 : index
    %c0_71 = arith.constant 0 : index
    %100 = tpu.strided_load %arg5[%c3_70, %c0_71] {strides = array<i32: 32, 1>} : memref<256x16xf32, #tpu.memory_space<vmem>>, vector<8x16xf32>
    %c18 = arith.constant 18 : index
    %c0_72 = arith.constant 0 : index
    %101 = tpu.strided_load %arg5[%c18, %c0_72] {strides = array<i32: 32, 1>} : memref<256x16xf32, #tpu.memory_space<vmem>>, vector<8x16xf32>
    %c19 = arith.constant 19 : index
    %c0_73 = arith.constant 0 : index
    %102 = tpu.strided_load %arg5[%c19, %c0_73] {strides = array<i32: 32, 1>} : memref<256x16xf32, #tpu.memory_space<vmem>>, vector<8x16xf32>
    %103 = arith.maximumf %99, %100 : vector<8x16xf32>
    %104 = arith.maximumf %101, %102 : vector<8x16xf32>
    %105 = arith.maximumf %103, %104 : vector<8x16xf32>
    %106 = arith.truncf %105 : vector<8x16xf32> to vector<8x16xbf16>
    %c0_74 = arith.constant 0 : index
    %c0_75 = arith.constant 0 : index
    %c16_76 = arith.constant 16 : index
    %107 = vector.load %arg4[%c0_74, %c0_75, %c16_76] : memref<1x8x128xbf16, #tpu.memory_space<vmem>>, vector<1x8x16xbf16>
    %108 = vector.shape_cast %107 : vector<1x8x16xbf16> to vector<8x16xbf16>
    %109 = vector.shape_cast %106 : vector<8x16xbf16> to vector<1x8x16xbf16>
    tpu.vector_store %arg4[%c0_74, %c0_75, %c16_76], %109 {strides = array<i32>} : memref<1x8x128xbf16, #tpu.memory_space<vmem>>, vector<1x8x16xbf16>,
    %c4_77 = arith.constant 4 : index
    %c0_78 = arith.constant 0 : index
    %110 = tpu.strided_load %arg5[%c4_77, %c0_78] {strides = array<i32: 32, 1>} : memref<256x16xf32, #tpu.memory_space<vmem>>, vector<8x16xf32>
    %c5_79 = arith.constant 5 : index
    %c0_80 = arith.constant 0 : index
    %111 = tpu.strided_load %arg5[%c5_79, %c0_80] {strides = array<i32: 32, 1>} : memref<256x16xf32, #tpu.memory_space<vmem>>, vector<8x16xf32>
    %c20 = arith.constant 20 : index
    %c0_81 = arith.constant 0 : index
    %112 = tpu.strided_load %arg5[%c20, %c0_81] {strides = array<i32: 32, 1>} : memref<256x16xf32, #tpu.memory_space<vmem>>, vector<8x16xf32>
    %c21 = arith.constant 21 : index
    %c0_82 = arith.constant 0 : index
    %113 = tpu.strided_load %arg5[%c21, %c0_82] {strides = array<i32: 32, 1>} : memref<256x16xf32, #tpu.memory_space<vmem>>, vector<8x16xf32>
    %114 = arith.maximumf %110, %111 : vector<8x16xf32>
    %115 = arith.maximumf %112, %113 : vector<8x16xf32>
    %116 = arith.maximumf %114, %115 : vector<8x16xf32>
    %117 = arith.truncf %116 : vector<8x16xf32> to vector<8x16xbf16>
    %c0_83 = arith.constant 0 : index
    %c0_84 = arith.constant 0 : index
    %c32 = arith.constant 32 : index
    %118 = vector.load %arg4[%c0_83, %c0_84, %c32] : memref<1x8x128xbf16, #tpu.memory_space<vmem>>, vector<1x8x16xbf16>
    %119 = vector.shape_cast %118 : vector<1x8x16xbf16> to vector<8x16xbf16>
    %120 = vector.shape_cast %117 : vector<8x16xbf16> to vector<1x8x16xbf16>
    tpu.vector_store %arg4[%c0_83, %c0_84, %c32], %120 {strides = array<i32>} : memref<1x8x128xbf16, #tpu.memory_space<vmem>>, vector<1x8x16xbf16>,
    %c6_85 = arith.constant 6 : index
    %c0_86 = arith.constant 0 : index
    %121 = tpu.strided_load %arg5[%c6_85, %c0_86] {strides = array<i32: 32, 1>} : memref<256x16xf32, #tpu.memory_space<vmem>>, vector<8x16xf32>
    %c7_87 = arith.constant 7 : index
    %c0_88 = arith.constant 0 : index
    %122 = tpu.strided_load %arg5[%c7_87, %c0_88] {strides = array<i32: 32, 1>} : memref<256x16xf32, #tpu.memory_space<vmem>>, vector<8x16xf32>
    %c22 = arith.constant 22 : index
    %c0_89 = arith.constant 0 : index
    %123 = tpu.strided_load %arg5[%c22, %c0_89] {strides = array<i32: 32, 1>} : memref<256x16xf32, #tpu.memory_space<vmem>>, vector<8x16xf32>
    %c23 = arith.constant 23 : index
    %c0_90 = arith.constant 0 : index
    %124 = tpu.strided_load %arg5[%c23, %c0_90] {strides = array<i32: 32, 1>} : memref<256x16xf32, #tpu.memory_space<vmem>>, vector<8x16xf32>
    %125 = arith.maximumf %121, %122 : vector<8x16xf32>
    %126 = arith.maximumf %123, %124 : vector<8x16xf32>
    %127 = arith.maximumf %125, %126 : vector<8x16xf32>
    %128 = arith.truncf %127 : vector<8x16xf32> to vector<8x16xbf16>
    %c0_91 = arith.constant 0 : index
    %c0_92 = arith.constant 0 : index
    %c48 = arith.constant 48 : index
    %129 = vector.load %arg4[%c0_91, %c0_92, %c48] : memref<1x8x128xbf16, #tpu.memory_space<vmem>>, vector<1x8x16xbf16>
    %130 = vector.shape_cast %129 : vector<1x8x16xbf16> to vector<8x16xbf16>
    %131 = vector.shape_cast %128 : vector<8x16xbf16> to vector<1x8x16xbf16>
    tpu.vector_store %arg4[%c0_91, %c0_92, %c48], %131 {strides = array<i32>} : memref<1x8x128xbf16, #tpu.memory_space<vmem>>, vector<1x8x16xbf16>,
    %c8_93 = arith.constant 8 : index
    %c0_94 = arith.constant 0 : index
    %132 = tpu.strided_load %arg5[%c8_93, %c0_94] {strides = array<i32: 32, 1>} : memref<256x16xf32, #tpu.memory_space<vmem>>, vector<8x16xf32>
    %c9 = arith.constant 9 : index
    %c0_95 = arith.constant 0 : index
    %133 = tpu.strided_load %arg5[%c9, %c0_95] {strides = array<i32: 32, 1>} : memref<256x16xf32, #tpu.memory_space<vmem>>, vector<8x16xf32>
    %c24 = arith.constant 24 : index
    %c0_96 = arith.constant 0 : index
    %134 = tpu.strided_load %arg5[%c24, %c0_96] {strides = array<i32: 32, 1>} : memref<256x16xf32, #tpu.memory_space<vmem>>, vector<8x16xf32>
    %c25 = arith.constant 25 : index
    %c0_97 = arith.constant 0 : index
    %135 = tpu.strided_load %arg5[%c25, %c0_97] {strides = array<i32: 32, 1>} : memref<256x16xf32, #tpu.memory_space<vmem>>, vector<8x16xf32>
    %136 = arith.maximumf %132, %133 : vector<8x16xf32>
    %137 = arith.maximumf %134, %135 : vector<8x16xf32>
    %138 = arith.maximumf %136, %137 : vector<8x16xf32>
    %139 = arith.truncf %138 : vector<8x16xf32> to vector<8x16xbf16>
    %c0_98 = arith.constant 0 : index
    %c0_99 = arith.constant 0 : index
    %c64 = arith.constant 64 : index
    %140 = vector.load %arg4[%c0_98, %c0_99, %c64] : memref<1x8x128xbf16, #tpu.memory_space<vmem>>, vector<1x8x16xbf16>
    %141 = vector.shape_cast %140 : vector<1x8x16xbf16> to vector<8x16xbf16>
    %142 = vector.shape_cast %139 : vector<8x16xbf16> to vector<1x8x16xbf16>
    tpu.vector_store %arg4[%c0_98, %c0_99, %c64], %142 {strides = array<i32>} : memref<1x8x128xbf16, #tpu.memory_space<vmem>>, vector<1x8x16xbf16>,
    %c10 = arith.constant 10 : index
    %c0_100 = arith.constant 0 : index
    %143 = tpu.strided_load %arg5[%c10, %c0_100] {strides = array<i32: 32, 1>} : memref<256x16xf32, #tpu.memory_space<vmem>>, vector<8x16xf32>
    %c11 = arith.constant 11 : index
    %c0_101 = arith.constant 0 : index
    %144 = tpu.strided_load %arg5[%c11, %c0_101] {strides = array<i32: 32, 1>} : memref<256x16xf32, #tpu.memory_space<vmem>>, vector<8x16xf32>
    %c26 = arith.constant 26 : index
    %c0_102 = arith.constant 0 : index
    %145 = tpu.strided_load %arg5[%c26, %c0_102] {strides = array<i32: 32, 1>} : memref<256x16xf32, #tpu.memory_space<vmem>>, vector<8x16xf32>
    %c27 = arith.constant 27 : index
    %c0_103 = arith.constant 0 : index
    %146 = tpu.strided_load %arg5[%c27, %c0_103] {strides = array<i32: 32, 1>} : memref<256x16xf32, #tpu.memory_space<vmem>>, vector<8x16xf32>
    %147 = arith.maximumf %143, %144 : vector<8x16xf32>
    %148 = arith.maximumf %145, %146 : vector<8x16xf32>
    %149 = arith.maximumf %147, %148 : vector<8x16xf32>
    %150 = arith.truncf %149 : vector<8x16xf32> to vector<8x16xbf16>
    %c0_104 = arith.constant 0 : index
    %c0_105 = arith.constant 0 : index
    %c80 = arith.constant 80 : index
    %151 = vector.load %arg4[%c0_104, %c0_105, %c80] : memref<1x8x128xbf16, #tpu.memory_space<vmem>>, vector<1x8x16xbf16>
    %152 = vector.shape_cast %151 : vector<1x8x16xbf16> to vector<8x16xbf16>
    %153 = vector.shape_cast %150 : vector<8x16xbf16> to vector<1x8x16xbf16>
    tpu.vector_store %arg4[%c0_104, %c0_105, %c80], %153 {strides = array<i32>} : memref<1x8x128xbf16, #tpu.memory_space<vmem>>, vector<1x8x16xbf16>,
    %c12 = arith.constant 12 : index
    %c0_106 = arith.constant 0 : index
    %154 = tpu.strided_load %arg5[%c12, %c0_106] {strides = array<i32: 32, 1>} : memref<256x16xf32, #tpu.memory_space<vmem>>, vector<8x16xf32>
    %c13 = arith.constant 13 : index
    %c0_107 = arith.constant 0 : index
    %155 = tpu.strided_load %arg5[%c13, %c0_107] {strides = array<i32: 32, 1>} : memref<256x16xf32, #tpu.memory_space<vmem>>, vector<8x16xf32>
    %c28 = arith.constant 28 : index
    %c0_108 = arith.constant 0 : index
    %156 = tpu.strided_load %arg5[%c28, %c0_108] {strides = array<i32: 32, 1>} : memref<256x16xf32, #tpu.memory_space<vmem>>, vector<8x16xf32>
    %c29 = arith.constant 29 : index
    %c0_109 = arith.constant 0 : index
    %157 = tpu.strided_load %arg5[%c29, %c0_109] {strides = array<i32: 32, 1>} : memref<256x16xf32, #tpu.memory_space<vmem>>, vector<8x16xf32>
    %158 = arith.maximumf %154, %155 : vector<8x16xf32>
    %159 = arith.maximumf %156, %157 : vector<8x16xf32>
    %160 = arith.maximumf %158, %159 : vector<8x16xf32>
    %161 = arith.truncf %160 : vector<8x16xf32> to vector<8x16xbf16>
    %c0_110 = arith.constant 0 : index
    %c0_111 = arith.constant 0 : index
    %c96 = arith.constant 96 : index
    %162 = vector.load %arg4[%c0_110, %c0_111, %c96] : memref<1x8x128xbf16, #tpu.memory_space<vmem>>, vector<1x8x16xbf16>
    %163 = vector.shape_cast %162 : vector<1x8x16xbf16> to vector<8x16xbf16>
    %164 = vector.shape_cast %161 : vector<8x16xbf16> to vector<1x8x16xbf16>
    tpu.vector_store %arg4[%c0_110, %c0_111, %c96], %164 {strides = array<i32>} : memref<1x8x128xbf16, #tpu.memory_space<vmem>>, vector<1x8x16xbf16>,
    %c14 = arith.constant 14 : index
    %c0_112 = arith.constant 0 : index
    %165 = tpu.strided_load %arg5[%c14, %c0_112] {strides = array<i32: 32, 1>} : memref<256x16xf32, #tpu.memory_space<vmem>>, vector<8x16xf32>
    %c15 = arith.constant 15 : index
    %c0_113 = arith.constant 0 : index
    %166 = tpu.strided_load %arg5[%c15, %c0_113] {strides = array<i32: 32, 1>} : memref<256x16xf32, #tpu.memory_space<vmem>>, vector<8x16xf32>
    %c30 = arith.constant 30 : index
    %c0_114 = arith.constant 0 : index
    %167 = tpu.strided_load %arg5[%c30, %c0_114] {strides = array<i32: 32, 1>} : memref<256x16xf32, #tpu.memory_space<vmem>>, vector<8x16xf32>
    %c31 = arith.constant 31 : index
    %c0_115 = arith.constant 0 : index
    %168 = tpu.strided_load %arg5[%c31, %c0_115] {strides = array<i32: 32, 1>} : memref<256x16xf32, #tpu.memory_space<vmem>>, vector<8x16xf32>
    %169 = arith.maximumf %165, %166 : vector<8x16xf32>
    %170 = arith.maximumf %167, %168 : vector<8x16xf32>
    %171 = arith.maximumf %169, %170 : vector<8x16xf32>
    %172 = arith.truncf %171 : vector<8x16xf32> to vector<8x16xbf16>
    %c0_116 = arith.constant 0 : index
    %c0_117 = arith.constant 0 : index
    %c112 = arith.constant 112 : index
    %173 = vector.load %arg4[%c0_116, %c0_117, %c112] : memref<1x8x128xbf16, #tpu.memory_space<vmem>>, vector<1x8x16xbf16>
    %174 = vector.shape_cast %173 : vector<1x8x16xbf16> to vector<8x16xbf16>
    %175 = vector.shape_cast %172 : vector<8x16xbf16> to vector<1x8x16xbf16>
    tpu.vector_store %arg4[%c0_116, %c0_117, %c112], %175 {strides = array<i32>} : memref<1x8x128xbf16, #tpu.memory_space<vmem>>, vector<1x8x16xbf16>,
    return
  }
  func.func @transform_0(%arg0: i32) -> (i32, i32, i32, i32) {
    %c0_i32 = arith.constant 0 : i32
    %c0_i32_0 = arith.constant 0 : i32
    %c0_i32_1 = arith.constant 0 : i32
    %c0_i32_2 = arith.constant 0 : i32
    return %arg0, %c0_i32, %c0_i32_0, %c0_i32_1 : i32, i32, i32, i32
  }
  func.func @transform_1(%arg0: i32) -> (i32, i32, i32) {
    %c0_i32 = arith.constant 0 : i32
    %c0_i32_0 = arith.constant 0 : i32
    %c0_i32_1 = arith.constant 0 : i32
    %c0_i32_2 = arith.constant 0 : i32
    return %c0_i32, %c0_i32_0, %c0_i32_1 : i32, i32, i32
  }
  func.func @transform_2(%arg0: i32) -> (i32, i32) {
    %c0_i32 = arith.constant 0 : i32
    %c0_i32_0 = arith.constant 0 : i32
    %c0_i32_1 = arith.constant 0 : i32
    return %c0_i32, %c0_i32_0 : i32, i32
  }
  func.func @transform_3(%arg0: i32) -> (i32, i32, i32) {
    %c0_i32 = arith.constant 0 : i32
    %c0_i32_0 = arith.constant 0 : i32
    %c0_i32_1 = arith.constant 0 : i32
    return %arg0, %c0_i32, %c0_i32_0 : i32, i32, i32
  }
}

module attributes {stable_mosaic.version = 11 : i64} {
  func.func @_conv3x3_relu_pool_kernel(%arg0: i32, %arg1: memref<1x10x10x16xbf16, #tpu.memory_space<vmem>>, %arg2: memref<9x16x32xbf16, #tpu.memory_space<vmem>>, %arg3: memref<1x32xf32, #tpu.memory_space<vmem>>, %arg4: memref<1x4x128xbf16, #tpu.memory_space<vmem>>, %arg5: memref<64x32xf32, #tpu.memory_space<vmem>>) attributes {dimension_semantics = [#tpu.dimension_semantics<parallel>], iteration_bounds = array<i64: 2>, scalar_prefetch = 0 : i64, scratch_operands = 1 : i64, tpu.core_type = #tpu.core_type<tc>, window_params = [{transform_indices = @transform_0, window_bounds = array<i64: 1, 10, 10, 16>}, {pipeline_mode = #tpu.pipeline_mode<synchronous>, transform_indices = @transform_1, window_bounds = array<i64: 9, 16, 32>}, {pipeline_mode = #tpu.pipeline_mode<synchronous>, transform_indices = @transform_2, window_bounds = array<i64: 1, 32>}, {transform_indices = @transform_3, window_bounds = array<i64: 1, 4, 128>}]} {
    %cst = arith.constant 0.000000e+00 : f32
    %0 = vector.broadcast %cst : f32 to vector<64x32xf32>
    %c0 = arith.constant 0 : index
    %c0_0 = arith.constant 0 : index
    %c0_1 = arith.constant 0 : index
    %c0_2 = arith.constant 0 : index
    %1 = vector.load %arg1[%c0, %c0_0, %c0_1, %c0_2] : memref<1x10x10x16xbf16, #tpu.memory_space<vmem>>, vector<1x8x8x16xbf16>
    %2 = vector.shape_cast %1 : vector<1x8x8x16xbf16> to vector<8x8x16xbf16>
    %3 = vector.shape_cast %2 : vector<8x8x16xbf16> to vector<64x16xbf16>
    %c0_3 = arith.constant 0 : index
    %c0_4 = arith.constant 0 : index
    %c0_5 = arith.constant 0 : index
    %4 = vector.load %arg2[%c0_3, %c0_4, %c0_5] : memref<9x16x32xbf16, #tpu.memory_space<vmem>>, vector<1x16x32xbf16>
    %5 = vector.shape_cast %4 : vector<1x16x32xbf16> to vector<16x32xbf16>
    %cst_6 = arith.constant dense<0.000000e+00> : vector<64x32xf32>
    %6 = tpu.matmul %3, %5, %cst_6 {dimension_numbers = #tpu.dot_dimension_numbers<[1], [0], [0], [1], [0, 0, 1, 1], [], []>} : vector<64x16xbf16>, vector<16x32xbf16>, vector<64x32xf32> -> vector<64x32xf32>
    %7 = arith.addf %0, %6 : vector<64x32xf32>
    %c0_7 = arith.constant 0 : index
    %c0_8 = arith.constant 0 : index
    %c1 = arith.constant 1 : index
    %c0_9 = arith.constant 0 : index
    %8 = vector.load %arg1[%c0_7, %c0_8, %c1, %c0_9] : memref<1x10x10x16xbf16, #tpu.memory_space<vmem>>, vector<1x8x8x16xbf16>
    %9 = vector.shape_cast %8 : vector<1x8x8x16xbf16> to vector<8x8x16xbf16>
    %10 = vector.shape_cast %9 : vector<8x8x16xbf16> to vector<64x16xbf16>
    %c1_10 = arith.constant 1 : index
    %c0_11 = arith.constant 0 : index
    %c0_12 = arith.constant 0 : index
    %11 = vector.load %arg2[%c1_10, %c0_11, %c0_12] : memref<9x16x32xbf16, #tpu.memory_space<vmem>>, vector<1x16x32xbf16>
    %12 = vector.shape_cast %11 : vector<1x16x32xbf16> to vector<16x32xbf16>
    %cst_13 = arith.constant dense<0.000000e+00> : vector<64x32xf32>
    %13 = tpu.matmul %10, %12, %cst_13 {dimension_numbers = #tpu.dot_dimension_numbers<[1], [0], [0], [1], [0, 0, 1, 1], [], []>} : vector<64x16xbf16>, vector<16x32xbf16>, vector<64x32xf32> -> vector<64x32xf32>
    %14 = arith.addf %7, %13 : vector<64x32xf32>
    %c0_14 = arith.constant 0 : index
    %c0_15 = arith.constant 0 : index
    %c2 = arith.constant 2 : index
    %c0_16 = arith.constant 0 : index
    %15 = vector.load %arg1[%c0_14, %c0_15, %c2, %c0_16] : memref<1x10x10x16xbf16, #tpu.memory_space<vmem>>, vector<1x8x8x16xbf16>
    %16 = vector.shape_cast %15 : vector<1x8x8x16xbf16> to vector<8x8x16xbf16>
    %17 = vector.shape_cast %16 : vector<8x8x16xbf16> to vector<64x16xbf16>
    %c2_17 = arith.constant 2 : index
    %c0_18 = arith.constant 0 : index
    %c0_19 = arith.constant 0 : index
    %18 = vector.load %arg2[%c2_17, %c0_18, %c0_19] : memref<9x16x32xbf16, #tpu.memory_space<vmem>>, vector<1x16x32xbf16>
    %19 = vector.shape_cast %18 : vector<1x16x32xbf16> to vector<16x32xbf16>
    %cst_20 = arith.constant dense<0.000000e+00> : vector<64x32xf32>
    %20 = tpu.matmul %17, %19, %cst_20 {dimension_numbers = #tpu.dot_dimension_numbers<[1], [0], [0], [1], [0, 0, 1, 1], [], []>} : vector<64x16xbf16>, vector<16x32xbf16>, vector<64x32xf32> -> vector<64x32xf32>
    %21 = arith.addf %14, %20 : vector<64x32xf32>
    %c0_21 = arith.constant 0 : index
    %c1_22 = arith.constant 1 : index
    %c0_23 = arith.constant 0 : index
    %c0_24 = arith.constant 0 : index
    %22 = vector.load %arg1[%c0_21, %c1_22, %c0_23, %c0_24] : memref<1x10x10x16xbf16, #tpu.memory_space<vmem>>, vector<1x8x8x16xbf16>
    %23 = vector.shape_cast %22 : vector<1x8x8x16xbf16> to vector<8x8x16xbf16>
    %24 = vector.shape_cast %23 : vector<8x8x16xbf16> to vector<64x16xbf16>
    %c3 = arith.constant 3 : index
    %c0_25 = arith.constant 0 : index
    %c0_26 = arith.constant 0 : index
    %25 = vector.load %arg2[%c3, %c0_25, %c0_26] : memref<9x16x32xbf16, #tpu.memory_space<vmem>>, vector<1x16x32xbf16>
    %26 = vector.shape_cast %25 : vector<1x16x32xbf16> to vector<16x32xbf16>
    %cst_27 = arith.constant dense<0.000000e+00> : vector<64x32xf32>
    %27 = tpu.matmul %24, %26, %cst_27 {dimension_numbers = #tpu.dot_dimension_numbers<[1], [0], [0], [1], [0, 0, 1, 1], [], []>} : vector<64x16xbf16>, vector<16x32xbf16>, vector<64x32xf32> -> vector<64x32xf32>
    %28 = arith.addf %21, %27 : vector<64x32xf32>
    %c0_28 = arith.constant 0 : index
    %c1_29 = arith.constant 1 : index
    %c1_30 = arith.constant 1 : index
    %c0_31 = arith.constant 0 : index
    %29 = vector.load %arg1[%c0_28, %c1_29, %c1_30, %c0_31] : memref<1x10x10x16xbf16, #tpu.memory_space<vmem>>, vector<1x8x8x16xbf16>
    %30 = vector.shape_cast %29 : vector<1x8x8x16xbf16> to vector<8x8x16xbf16>
    %31 = vector.shape_cast %30 : vector<8x8x16xbf16> to vector<64x16xbf16>
    %c4 = arith.constant 4 : index
    %c0_32 = arith.constant 0 : index
    %c0_33 = arith.constant 0 : index
    %32 = vector.load %arg2[%c4, %c0_32, %c0_33] : memref<9x16x32xbf16, #tpu.memory_space<vmem>>, vector<1x16x32xbf16>
    %33 = vector.shape_cast %32 : vector<1x16x32xbf16> to vector<16x32xbf16>
    %cst_34 = arith.constant dense<0.000000e+00> : vector<64x32xf32>
    %34 = tpu.matmul %31, %33, %cst_34 {dimension_numbers = #tpu.dot_dimension_numbers<[1], [0], [0], [1], [0, 0, 1, 1], [], []>} : vector<64x16xbf16>, vector<16x32xbf16>, vector<64x32xf32> -> vector<64x32xf32>
    %35 = arith.addf %28, %34 : vector<64x32xf32>
    %c0_35 = arith.constant 0 : index
    %c1_36 = arith.constant 1 : index
    %c2_37 = arith.constant 2 : index
    %c0_38 = arith.constant 0 : index
    %36 = vector.load %arg1[%c0_35, %c1_36, %c2_37, %c0_38] : memref<1x10x10x16xbf16, #tpu.memory_space<vmem>>, vector<1x8x8x16xbf16>
    %37 = vector.shape_cast %36 : vector<1x8x8x16xbf16> to vector<8x8x16xbf16>
    %38 = vector.shape_cast %37 : vector<8x8x16xbf16> to vector<64x16xbf16>
    %c5 = arith.constant 5 : index
    %c0_39 = arith.constant 0 : index
    %c0_40 = arith.constant 0 : index
    %39 = vector.load %arg2[%c5, %c0_39, %c0_40] : memref<9x16x32xbf16, #tpu.memory_space<vmem>>, vector<1x16x32xbf16>
    %40 = vector.shape_cast %39 : vector<1x16x32xbf16> to vector<16x32xbf16>
    %cst_41 = arith.constant dense<0.000000e+00> : vector<64x32xf32>
    %41 = tpu.matmul %38, %40, %cst_41 {dimension_numbers = #tpu.dot_dimension_numbers<[1], [0], [0], [1], [0, 0, 1, 1], [], []>} : vector<64x16xbf16>, vector<16x32xbf16>, vector<64x32xf32> -> vector<64x32xf32>
    %42 = arith.addf %35, %41 : vector<64x32xf32>
    %c0_42 = arith.constant 0 : index
    %c2_43 = arith.constant 2 : index
    %c0_44 = arith.constant 0 : index
    %c0_45 = arith.constant 0 : index
    %43 = vector.load %arg1[%c0_42, %c2_43, %c0_44, %c0_45] : memref<1x10x10x16xbf16, #tpu.memory_space<vmem>>, vector<1x8x8x16xbf16>
    %44 = vector.shape_cast %43 : vector<1x8x8x16xbf16> to vector<8x8x16xbf16>
    %45 = vector.shape_cast %44 : vector<8x8x16xbf16> to vector<64x16xbf16>
    %c6 = arith.constant 6 : index
    %c0_46 = arith.constant 0 : index
    %c0_47 = arith.constant 0 : index
    %46 = vector.load %arg2[%c6, %c0_46, %c0_47] : memref<9x16x32xbf16, #tpu.memory_space<vmem>>, vector<1x16x32xbf16>
    %47 = vector.shape_cast %46 : vector<1x16x32xbf16> to vector<16x32xbf16>
    %cst_48 = arith.constant dense<0.000000e+00> : vector<64x32xf32>
    %48 = tpu.matmul %45, %47, %cst_48 {dimension_numbers = #tpu.dot_dimension_numbers<[1], [0], [0], [1], [0, 0, 1, 1], [], []>} : vector<64x16xbf16>, vector<16x32xbf16>, vector<64x32xf32> -> vector<64x32xf32>
    %49 = arith.addf %42, %48 : vector<64x32xf32>
    %c0_49 = arith.constant 0 : index
    %c2_50 = arith.constant 2 : index
    %c1_51 = arith.constant 1 : index
    %c0_52 = arith.constant 0 : index
    %50 = vector.load %arg1[%c0_49, %c2_50, %c1_51, %c0_52] : memref<1x10x10x16xbf16, #tpu.memory_space<vmem>>, vector<1x8x8x16xbf16>
    %51 = vector.shape_cast %50 : vector<1x8x8x16xbf16> to vector<8x8x16xbf16>
    %52 = vector.shape_cast %51 : vector<8x8x16xbf16> to vector<64x16xbf16>
    %c7 = arith.constant 7 : index
    %c0_53 = arith.constant 0 : index
    %c0_54 = arith.constant 0 : index
    %53 = vector.load %arg2[%c7, %c0_53, %c0_54] : memref<9x16x32xbf16, #tpu.memory_space<vmem>>, vector<1x16x32xbf16>
    %54 = vector.shape_cast %53 : vector<1x16x32xbf16> to vector<16x32xbf16>
    %cst_55 = arith.constant dense<0.000000e+00> : vector<64x32xf32>
    %55 = tpu.matmul %52, %54, %cst_55 {dimension_numbers = #tpu.dot_dimension_numbers<[1], [0], [0], [1], [0, 0, 1, 1], [], []>} : vector<64x16xbf16>, vector<16x32xbf16>, vector<64x32xf32> -> vector<64x32xf32>
    %56 = arith.addf %49, %55 : vector<64x32xf32>
    %c0_56 = arith.constant 0 : index
    %c2_57 = arith.constant 2 : index
    %c2_58 = arith.constant 2 : index
    %c0_59 = arith.constant 0 : index
    %57 = vector.load %arg1[%c0_56, %c2_57, %c2_58, %c0_59] : memref<1x10x10x16xbf16, #tpu.memory_space<vmem>>, vector<1x8x8x16xbf16>
    %58 = vector.shape_cast %57 : vector<1x8x8x16xbf16> to vector<8x8x16xbf16>
    %59 = vector.shape_cast %58 : vector<8x8x16xbf16> to vector<64x16xbf16>
    %c8 = arith.constant 8 : index
    %c0_60 = arith.constant 0 : index
    %c0_61 = arith.constant 0 : index
    %60 = vector.load %arg2[%c8, %c0_60, %c0_61] : memref<9x16x32xbf16, #tpu.memory_space<vmem>>, vector<1x16x32xbf16>
    %61 = vector.shape_cast %60 : vector<1x16x32xbf16> to vector<16x32xbf16>
    %cst_62 = arith.constant dense<0.000000e+00> : vector<64x32xf32>
    %62 = tpu.matmul %59, %61, %cst_62 {dimension_numbers = #tpu.dot_dimension_numbers<[1], [0], [0], [1], [0, 0, 1, 1], [], []>} : vector<64x16xbf16>, vector<16x32xbf16>, vector<64x32xf32> -> vector<64x32xf32>
    %63 = arith.addf %56, %62 : vector<64x32xf32>
    %c0_63 = arith.constant 0 : index
    %c0_64 = arith.constant 0 : index
    %64 = vector.load %arg3[%c0_63, %c0_64] : memref<1x32xf32, #tpu.memory_space<vmem>>, vector<1x32xf32>
    %65 = vector.broadcast %64 : vector<1x32xf32> to vector<64x32xf32>
    %66 = arith.addf %63, %65 : vector<64x32xf32>
    %cst_65 = arith.constant 0.000000e+00 : f32
    %67 = vector.broadcast %cst_65 : f32 to vector<64x32xf32>
    %68 = arith.maximumf %66, %67 : vector<64x32xf32>
    %c0_66 = arith.constant 0 : index
    %c0_67 = arith.constant 0 : index
    %69 = vector.load %arg5[%c0_66, %c0_67] : memref<64x32xf32, #tpu.memory_space<vmem>>, vector<64x32xf32>
    tpu.vector_store %arg5[%c0_66, %c0_67], %68 {strides = array<i32>} : memref<64x32xf32, #tpu.memory_space<vmem>>, vector<64x32xf32>,
    %c0_68 = arith.constant 0 : index
    %c0_69 = arith.constant 0 : index
    %70 = tpu.strided_load %arg5[%c0_68, %c0_69] {strides = array<i32: 16, 1>} : memref<64x32xf32, #tpu.memory_space<vmem>>, vector<4x32xf32>
    %c1_70 = arith.constant 1 : index
    %c0_71 = arith.constant 0 : index
    %71 = tpu.strided_load %arg5[%c1_70, %c0_71] {strides = array<i32: 16, 1>} : memref<64x32xf32, #tpu.memory_space<vmem>>, vector<4x32xf32>
    %c8_72 = arith.constant 8 : index
    %c0_73 = arith.constant 0 : index
    %72 = tpu.strided_load %arg5[%c8_72, %c0_73] {strides = array<i32: 16, 1>} : memref<64x32xf32, #tpu.memory_space<vmem>>, vector<4x32xf32>
    %c9 = arith.constant 9 : index
    %c0_74 = arith.constant 0 : index
    %73 = tpu.strided_load %arg5[%c9, %c0_74] {strides = array<i32: 16, 1>} : memref<64x32xf32, #tpu.memory_space<vmem>>, vector<4x32xf32>
    %74 = arith.maximumf %70, %71 : vector<4x32xf32>
    %75 = arith.maximumf %72, %73 : vector<4x32xf32>
    %76 = arith.maximumf %74, %75 : vector<4x32xf32>
    %77 = arith.truncf %76 : vector<4x32xf32> to vector<4x32xbf16>
    %c0_75 = arith.constant 0 : index
    %c0_76 = arith.constant 0 : index
    %c0_77 = arith.constant 0 : index
    %78 = vector.load %arg4[%c0_75, %c0_76, %c0_77] : memref<1x4x128xbf16, #tpu.memory_space<vmem>>, vector<1x4x32xbf16>
    %79 = vector.shape_cast %78 : vector<1x4x32xbf16> to vector<4x32xbf16>
    %80 = vector.shape_cast %77 : vector<4x32xbf16> to vector<1x4x32xbf16>
    tpu.vector_store %arg4[%c0_75, %c0_76, %c0_77], %80 {strides = array<i32>} : memref<1x4x128xbf16, #tpu.memory_space<vmem>>, vector<1x4x32xbf16>,
    %c2_78 = arith.constant 2 : index
    %c0_79 = arith.constant 0 : index
    %81 = tpu.strided_load %arg5[%c2_78, %c0_79] {strides = array<i32: 16, 1>} : memref<64x32xf32, #tpu.memory_space<vmem>>, vector<4x32xf32>
    %c3_80 = arith.constant 3 : index
    %c0_81 = arith.constant 0 : index
    %82 = tpu.strided_load %arg5[%c3_80, %c0_81] {strides = array<i32: 16, 1>} : memref<64x32xf32, #tpu.memory_space<vmem>>, vector<4x32xf32>
    %c10 = arith.constant 10 : index
    %c0_82 = arith.constant 0 : index
    %83 = tpu.strided_load %arg5[%c10, %c0_82] {strides = array<i32: 16, 1>} : memref<64x32xf32, #tpu.memory_space<vmem>>, vector<4x32xf32>
    %c11 = arith.constant 11 : index
    %c0_83 = arith.constant 0 : index
    %84 = tpu.strided_load %arg5[%c11, %c0_83] {strides = array<i32: 16, 1>} : memref<64x32xf32, #tpu.memory_space<vmem>>, vector<4x32xf32>
    %85 = arith.maximumf %81, %82 : vector<4x32xf32>
    %86 = arith.maximumf %83, %84 : vector<4x32xf32>
    %87 = arith.maximumf %85, %86 : vector<4x32xf32>
    %88 = arith.truncf %87 : vector<4x32xf32> to vector<4x32xbf16>
    %c0_84 = arith.constant 0 : index
    %c0_85 = arith.constant 0 : index
    %c32 = arith.constant 32 : index
    %89 = vector.load %arg4[%c0_84, %c0_85, %c32] : memref<1x4x128xbf16, #tpu.memory_space<vmem>>, vector<1x4x32xbf16>
    %90 = vector.shape_cast %89 : vector<1x4x32xbf16> to vector<4x32xbf16>
    %91 = vector.shape_cast %88 : vector<4x32xbf16> to vector<1x4x32xbf16>
    tpu.vector_store %arg4[%c0_84, %c0_85, %c32], %91 {strides = array<i32>} : memref<1x4x128xbf16, #tpu.memory_space<vmem>>, vector<1x4x32xbf16>,
    %c4_86 = arith.constant 4 : index
    %c0_87 = arith.constant 0 : index
    %92 = tpu.strided_load %arg5[%c4_86, %c0_87] {strides = array<i32: 16, 1>} : memref<64x32xf32, #tpu.memory_space<vmem>>, vector<4x32xf32>
    %c5_88 = arith.constant 5 : index
    %c0_89 = arith.constant 0 : index
    %93 = tpu.strided_load %arg5[%c5_88, %c0_89] {strides = array<i32: 16, 1>} : memref<64x32xf32, #tpu.memory_space<vmem>>, vector<4x32xf32>
    %c12 = arith.constant 12 : index
    %c0_90 = arith.constant 0 : index
    %94 = tpu.strided_load %arg5[%c12, %c0_90] {strides = array<i32: 16, 1>} : memref<64x32xf32, #tpu.memory_space<vmem>>, vector<4x32xf32>
    %c13 = arith.constant 13 : index
    %c0_91 = arith.constant 0 : index
    %95 = tpu.strided_load %arg5[%c13, %c0_91] {strides = array<i32: 16, 1>} : memref<64x32xf32, #tpu.memory_space<vmem>>, vector<4x32xf32>
    %96 = arith.maximumf %92, %93 : vector<4x32xf32>
    %97 = arith.maximumf %94, %95 : vector<4x32xf32>
    %98 = arith.maximumf %96, %97 : vector<4x32xf32>
    %99 = arith.truncf %98 : vector<4x32xf32> to vector<4x32xbf16>
    %c0_92 = arith.constant 0 : index
    %c0_93 = arith.constant 0 : index
    %c64 = arith.constant 64 : index
    %100 = vector.load %arg4[%c0_92, %c0_93, %c64] : memref<1x4x128xbf16, #tpu.memory_space<vmem>>, vector<1x4x32xbf16>
    %101 = vector.shape_cast %100 : vector<1x4x32xbf16> to vector<4x32xbf16>
    %102 = vector.shape_cast %99 : vector<4x32xbf16> to vector<1x4x32xbf16>
    tpu.vector_store %arg4[%c0_92, %c0_93, %c64], %102 {strides = array<i32>} : memref<1x4x128xbf16, #tpu.memory_space<vmem>>, vector<1x4x32xbf16>,
    %c6_94 = arith.constant 6 : index
    %c0_95 = arith.constant 0 : index
    %103 = tpu.strided_load %arg5[%c6_94, %c0_95] {strides = array<i32: 16, 1>} : memref<64x32xf32, #tpu.memory_space<vmem>>, vector<4x32xf32>
    %c7_96 = arith.constant 7 : index
    %c0_97 = arith.constant 0 : index
    %104 = tpu.strided_load %arg5[%c7_96, %c0_97] {strides = array<i32: 16, 1>} : memref<64x32xf32, #tpu.memory_space<vmem>>, vector<4x32xf32>
    %c14 = arith.constant 14 : index
    %c0_98 = arith.constant 0 : index
    %105 = tpu.strided_load %arg5[%c14, %c0_98] {strides = array<i32: 16, 1>} : memref<64x32xf32, #tpu.memory_space<vmem>>, vector<4x32xf32>
    %c15 = arith.constant 15 : index
    %c0_99 = arith.constant 0 : index
    %106 = tpu.strided_load %arg5[%c15, %c0_99] {strides = array<i32: 16, 1>} : memref<64x32xf32, #tpu.memory_space<vmem>>, vector<4x32xf32>
    %107 = arith.maximumf %103, %104 : vector<4x32xf32>
    %108 = arith.maximumf %105, %106 : vector<4x32xf32>
    %109 = arith.maximumf %107, %108 : vector<4x32xf32>
    %110 = arith.truncf %109 : vector<4x32xf32> to vector<4x32xbf16>
    %c0_100 = arith.constant 0 : index
    %c0_101 = arith.constant 0 : index
    %c96 = arith.constant 96 : index
    %111 = vector.load %arg4[%c0_100, %c0_101, %c96] : memref<1x4x128xbf16, #tpu.memory_space<vmem>>, vector<1x4x32xbf16>
    %112 = vector.shape_cast %111 : vector<1x4x32xbf16> to vector<4x32xbf16>
    %113 = vector.shape_cast %110 : vector<4x32xbf16> to vector<1x4x32xbf16>
    tpu.vector_store %arg4[%c0_100, %c0_101, %c96], %113 {strides = array<i32>} : memref<1x4x128xbf16, #tpu.memory_space<vmem>>, vector<1x4x32xbf16>,
    return
  }
  func.func @transform_0(%arg0: i32) -> (i32, i32, i32, i32) {
    %c0_i32 = arith.constant 0 : i32
    %c0_i32_0 = arith.constant 0 : i32
    %c0_i32_1 = arith.constant 0 : i32
    %c0_i32_2 = arith.constant 0 : i32
    return %arg0, %c0_i32, %c0_i32_0, %c0_i32_1 : i32, i32, i32, i32
  }
  func.func @transform_1(%arg0: i32) -> (i32, i32, i32) {
    %c0_i32 = arith.constant 0 : i32
    %c0_i32_0 = arith.constant 0 : i32
    %c0_i32_1 = arith.constant 0 : i32
    %c0_i32_2 = arith.constant 0 : i32
    return %c0_i32, %c0_i32_0, %c0_i32_1 : i32, i32, i32
  }
  func.func @transform_2(%arg0: i32) -> (i32, i32) {
    %c0_i32 = arith.constant 0 : i32
    %c0_i32_0 = arith.constant 0 : i32
    %c0_i32_1 = arith.constant 0 : i32
    return %c0_i32, %c0_i32_0 : i32, i32
  }
  func.func @transform_3(%arg0: i32) -> (i32, i32, i32) {
    %c0_i32 = arith.constant 0 : i32
    %c0_i32_0 = arith.constant 0 : i32
    %c0_i32_1 = arith.constant 0 : i32
    return %arg0, %c0_i32, %c0_i32_0 : i32, i32, i32
  }
}

module attributes {stable_mosaic.version = 11 : i64} {
  func.func @_mlp3_kernel(%arg0: i32, %arg1: memref<2x512xbf16, #tpu.memory_space<vmem>>, %arg2: memref<512x128xbf16, #tpu.memory_space<vmem>>, %arg3: memref<1x128xf32, #tpu.memory_space<vmem>>, %arg4: memref<128x64xbf16, #tpu.memory_space<vmem>>, %arg5: memref<1x64xf32, #tpu.memory_space<vmem>>, %arg6: memref<64x10xbf16, #tpu.memory_space<vmem>>, %arg7: memref<1x10xf32, #tpu.memory_space<vmem>>, %arg8: memref<2x10xf32, #tpu.memory_space<vmem>>) attributes {dimension_semantics = [#tpu.dimension_semantics<parallel>], iteration_bounds = array<i64: 1>, scalar_prefetch = 0 : i64, scratch_operands = 0 : i64, tpu.core_type = #tpu.core_type<tc>, window_params = [{transform_indices = @transform_0, window_bounds = array<i64: 2, 512>}, {pipeline_mode = #tpu.pipeline_mode<synchronous>, transform_indices = @transform_1, window_bounds = array<i64: 512, 128>}, {pipeline_mode = #tpu.pipeline_mode<synchronous>, transform_indices = @transform_2, window_bounds = array<i64: 1, 128>}, {pipeline_mode = #tpu.pipeline_mode<synchronous>, transform_indices = @transform_3, window_bounds = array<i64: 128, 64>}, {pipeline_mode = #tpu.pipeline_mode<synchronous>, transform_indices = @transform_4, window_bounds = array<i64: 1, 64>}, {pipeline_mode = #tpu.pipeline_mode<synchronous>, transform_indices = @transform_5, window_bounds = array<i64: 64, 10>}, {pipeline_mode = #tpu.pipeline_mode<synchronous>, transform_indices = @transform_6, window_bounds = array<i64: 1, 10>}, {transform_indices = @transform_7, window_bounds = array<i64: 2, 10>}]} {
    %c0 = arith.constant 0 : index
    %c0_0 = arith.constant 0 : index
    %0 = vector.load %arg1[%c0, %c0_0] : memref<2x512xbf16, #tpu.memory_space<vmem>>, vector<2x512xbf16>
    %c0_1 = arith.constant 0 : index
    %c0_2 = arith.constant 0 : index
    %1 = vector.load %arg2[%c0_1, %c0_2] : memref<512x128xbf16, #tpu.memory_space<vmem>>, vector<512x128xbf16>
    %cst = arith.constant dense<0.000000e+00> : vector<2x128xf32>
    %2 = tpu.matmul %0, %1, %cst {dimension_numbers = #tpu.dot_dimension_numbers<[1], [0], [0], [1], [0, 0, 1, 1], [], []>} : vector<2x512xbf16>, vector<512x128xbf16>, vector<2x128xf32> -> vector<2x128xf32>
    %c0_3 = arith.constant 0 : index
    %c0_4 = arith.constant 0 : index
    %3 = vector.load %arg3[%c0_3, %c0_4] : memref<1x128xf32, #tpu.memory_space<vmem>>, vector<1x128xf32>
    %4 = vector.broadcast %3 : vector<1x128xf32> to vector<2x128xf32>
    %5 = arith.addf %2, %4 : vector<2x128xf32>
    %cst_5 = arith.constant 0.000000e+00 : f32
    %6 = vector.broadcast %cst_5 : f32 to vector<2x128xf32>
    %7 = arith.maximumf %5, %6 : vector<2x128xf32>
    %8 = arith.truncf %7 : vector<2x128xf32> to vector<2x128xbf16>
    %c0_6 = arith.constant 0 : index
    %c0_7 = arith.constant 0 : index
    %9 = vector.load %arg4[%c0_6, %c0_7] : memref<128x64xbf16, #tpu.memory_space<vmem>>, vector<128x64xbf16>
    %cst_8 = arith.constant dense<0.000000e+00> : vector<2x64xf32>
    %10 = tpu.matmul %8, %9, %cst_8 {dimension_numbers = #tpu.dot_dimension_numbers<[1], [0], [0], [1], [0, 0, 1, 1], [], []>} : vector<2x128xbf16>, vector<128x64xbf16>, vector<2x64xf32> -> vector<2x64xf32>
    %c0_9 = arith.constant 0 : index
    %c0_10 = arith.constant 0 : index
    %11 = vector.load %arg5[%c0_9, %c0_10] : memref<1x64xf32, #tpu.memory_space<vmem>>, vector<1x64xf32>
    %12 = vector.broadcast %11 : vector<1x64xf32> to vector<2x64xf32>
    %13 = arith.addf %10, %12 : vector<2x64xf32>
    %cst_11 = arith.constant 0.000000e+00 : f32
    %14 = vector.broadcast %cst_11 : f32 to vector<2x64xf32>
    %15 = arith.maximumf %13, %14 : vector<2x64xf32>
    %16 = arith.truncf %15 : vector<2x64xf32> to vector<2x64xbf16>
    %c0_12 = arith.constant 0 : index
    %c0_13 = arith.constant 0 : index
    %17 = vector.load %arg6[%c0_12, %c0_13] : memref<64x10xbf16, #tpu.memory_space<vmem>>, vector<64x10xbf16>
    %cst_14 = arith.constant dense<0.000000e+00> : vector<2x10xf32>
    %18 = tpu.matmul %16, %17, %cst_14 {dimension_numbers = #tpu.dot_dimension_numbers<[1], [0], [0], [1], [0, 0, 1, 1], [], []>} : vector<2x64xbf16>, vector<64x10xbf16>, vector<2x10xf32> -> vector<2x10xf32>
    %c0_15 = arith.constant 0 : index
    %c0_16 = arith.constant 0 : index
    %19 = vector.load %arg7[%c0_15, %c0_16] : memref<1x10xf32, #tpu.memory_space<vmem>>, vector<1x10xf32>
    %20 = vector.broadcast %19 : vector<1x10xf32> to vector<2x10xf32>
    %21 = arith.addf %18, %20 : vector<2x10xf32>
    %c0_17 = arith.constant 0 : index
    %c0_18 = arith.constant 0 : index
    %22 = vector.load %arg8[%c0_17, %c0_18] : memref<2x10xf32, #tpu.memory_space<vmem>>, vector<2x10xf32>
    tpu.vector_store %arg8[%c0_17, %c0_18], %21 {strides = array<i32>} : memref<2x10xf32, #tpu.memory_space<vmem>>, vector<2x10xf32>,
    return
  }
  func.func @transform_0(%arg0: i32) -> (i32, i32) {
    %c0_i32 = arith.constant 0 : i32
    %c0_i32_0 = arith.constant 0 : i32
    return %arg0, %c0_i32 : i32, i32
  }
  func.func @transform_1(%arg0: i32) -> (i32, i32) {
    %c0_i32 = arith.constant 0 : i32
    %c0_i32_0 = arith.constant 0 : i32
    %c0_i32_1 = arith.constant 0 : i32
    return %c0_i32, %c0_i32_0 : i32, i32
  }
  func.func @transform_2(%arg0: i32) -> (i32, i32) {
    %c0_i32 = arith.constant 0 : i32
    %c0_i32_0 = arith.constant 0 : i32
    %c0_i32_1 = arith.constant 0 : i32
    return %c0_i32, %c0_i32_0 : i32, i32
  }
  func.func @transform_3(%arg0: i32) -> (i32, i32) {
    %c0_i32 = arith.constant 0 : i32
    %c0_i32_0 = arith.constant 0 : i32
    %c0_i32_1 = arith.constant 0 : i32
    return %c0_i32, %c0_i32_0 : i32, i32
  }
  func.func @transform_4(%arg0: i32) -> (i32, i32) {
    %c0_i32 = arith.constant 0 : i32
    %c0_i32_0 = arith.constant 0 : i32
    %c0_i32_1 = arith.constant 0 : i32
    return %c0_i32, %c0_i32_0 : i32, i32
  }
  func.func @transform_5(%arg0: i32) -> (i32, i32) {
    %c0_i32 = arith.constant 0 : i32
    %c0_i32_0 = arith.constant 0 : i32
    %c0_i32_1 = arith.constant 0 : i32
    return %c0_i32, %c0_i32_0 : i32, i32
  }
  func.func @transform_6(%arg0: i32) -> (i32, i32) {
    %c0_i32 = arith.constant 0 : i32
    %c0_i32_0 = arith.constant 0 : i32
    %c0_i32_1 = arith.constant 0 : i32
    return %c0_i32, %c0_i32_0 : i32, i32
  }
  func.func @transform_7(%arg0: i32) -> (i32, i32) {
    %c0_i32 = arith.constant 0 : i32
    %c0_i32_0 = arith.constant 0 : i32
    return %arg0, %c0_i32 : i32, i32
  }
}

</mosaic_0001>

<bundles_post_ra>
// kernel: simple_cnn_forward.5
= control target key start
LH: loop header
LB: loop body
LE: loop exit
PB: predicated region body
PF: predicated region fallthrough
CT: control target
= control target key end

     0   :  { %v112_v30 = vlaneseq  ;;  %v824_v34 = vmov 1966171168   ;;  %v825_v37 = vmov 0.0   ;;  %s1029_s0 = inlined_call_operand.vmem [shape: bf16[2,512], index: 0, kind: input, shape index: {}]   ;;  %s1030_s1 = inlined_call_operand.vmem [shape: bf16[512,128], index: 1, kind: input, shape index: {}]   ;;  %s1031_s2 = inlined_call_operand.vmem [shape: f32[1,128], index: 2, kind: input, shape index: {}]   ;;  %s1032_s3 = inlined_call_operand.vmem [shape: bf16[128,64], index: 3, kind: input, shape index: {}]   ;;  %s1033_s4 = inlined_call_operand.vmem [shape: f32[1,64], index: 4, kind: input, shape index: {}]   ;;  %s1034_s5 = inlined_call_operand.vmem [shape: bf16[64,10], index: 5, kind: input, shape index: {}]   ;;  %s1035_s6 = inlined_call_operand.vmem [shape: f32[1,10], index: 6, kind: input, shape index: {}]   ;;  %s1036_s7 = inlined_call_operand.hbm [shape: f32[2,10], index: 7, kind: output, shape index: {}]  }
   0x1   :  { %v758_v0 = vld [vmem:[%s1030_s1 + $0x78] sm:$0xff]   ;;  %v762_v4 = vld [vmem:[%s1030_s1 + $0x70] sm:$0xff]   ;;  %v766_v8 = vld [vmem:[%s1030_s1 + $0x68] sm:$0xff]   ;;  %v110_v35 = vunpack.c.l.s4 %v824_v34 }
   0x2   :  { %v759_v1 = vld [vmem:[%s1030_s1 + $0xf8] sm:$0xff]   ;;  %664 = vmatprep.subr.bf16.mxu0 %v758_v0  ;;  %v763_v5 = vld [vmem:[%s1030_s1 + $0xf0] sm:$0xff]   ;;  %v767_v9 = vld [vmem:[%s1030_s1 + $0xe8] sm:$0xff]   ;;  %v113_v36 = vshrl.u32 %v112_v30, 7 }
   0x3   :  { %v760_v2 = vld [vmem:[%s1030_s1 + $0x38] sm:$0xff]   ;;  %686 = vmatprep.subr.bf16.mxu1 %v759_v1  ;;  %v764_v6 = vld [vmem:[%s1030_s1 + $0x30] sm:$0xff]   ;;  %v768_v10 = vld [vmem:[%s1030_s1 + $0x28] sm:$0xff]   ;;  %v111_v39 = vunpack.c.0.s8 %v110_v35 }
   0x4   :  { %v761_v3 = vld [vmem:[%s1030_s1 + $0xb8] sm:$0xff]   ;;  %665 = vmatpush3.bf16.msra.mxu0 %v760_v2  ;;  %v765_v7 = vld [vmem:[%s1030_s1 + $0xb0] sm:$0xff]   ;;  %v769_v11 = vld [vmem:[%s1030_s1 + $0xa8] sm:$0xff]  }
   0x5   :  { %687 = vmatpush3.bf16.msra.mxu1 %v761_v3  ;;  %666 = vmatprep.subr.bf16.mxu0 %v762_v4  ;;  %v770_v12 = vld [vmem:[%s1030_s1 + $0x60] sm:$0xff]   ;;  %v774_v16 = vld [vmem:[%s1030_s1 + $0x58] sm:$0xff]   ;;  %v778_v20 = vld [vmem:[%s1030_s1 + $0x50] sm:$0xff]   ;;  %v114_v40 = vsub.s32 %v111_v39, %v113_v36 }
   0x6   :  { %688 = vmatprep.subr.bf16.mxu1 %v763_v5  ;;  %v771_v13 = vld [vmem:[%s1030_s1 + $0xe0] sm:$0xff]   ;;  %v775_v17 = vld [vmem:[%s1030_s1 + $0xd8] sm:$0xff]   ;;  %v779_v21 = vld [vmem:[%s1030_s1 + $0xd0] sm:$0xff]  }
   0x7   :  { %v772_v14 = vld [vmem:[%s1030_s1 + $0x20] sm:$0xff]   ;;  %v776_v18 = vld [vmem:[%s1030_s1 + $0x18] sm:$0xff]   ;;  %v780_v22 = vld [vmem:[%s1030_s1 + $0x10] sm:$0xff]  }
   0x8   :  { %667 = vmatpush3.bf16.msra.mxu0 %v764_v6  ;;  %v773_v15 = vld [vmem:[%s1030_s1 + $0xa0] sm:$0xff]   ;;  %v777_v19 = vld [vmem:[%s1030_s1 + $0x98] sm:$0xff]   ;;  %v781_v23 = vld [vmem:[%s1030_s1 + $0x90] sm:$0xff]  }
   0x9   :  { %689 = vmatpush3.bf16.msra.mxu1 %v765_v7  ;;  %668 = vmatprep.subr.bf16.mxu0 %v766_v8  ;;  %v782_v24 = vld [vmem:[%s1030_s1 + $0x48] sm:$0xff]   ;;  %v786_v28 = vld [vmem:[%s1030_s1 + $0x40] sm:$0xff]   ;;  %v790_v41 = vld [vmem:[%s1032_s3 + $0x38] sm:$0xff]  }
   0xa   :  { %690 = vmatprep.subr.bf16.mxu1 %v767_v9  ;;  %v783_v25 = vld [vmem:[%s1030_s1 + $0xc8] sm:$0xff]   ;;  %v787_v29 = vld [vmem:[%s1030_s1 + $0xc0] sm:$0xff]  }
   0xb   :  { %v784_v26 = vld [vmem:[%s1030_s1 + $0x8] sm:$0xff]   ;;  %v788_v31 = vld [vmem:[%s1030_s1] sm:$0xff]  }
   0xc   :  { %669 = vmatpush3.bf16.msra.mxu0 %v768_v10  ;;  %v785_v27 = vld [vmem:[%s1030_s1 + $0x88] sm:$0xff]   ;;  %v789_v32 = vld [vmem:[%s1030_s1 + $0x80] sm:$0xff]  }
   0xd   :  { %691 = vmatpush3.bf16.msra.mxu1 %v769_v11  ;;  %670 = vmatprep.subr.bf16.mxu0 %v770_v12  ;;  %v616_v33 = vld.sshfl [vmem:[%s1029_s0] sm:$0x33 pattern:$0x75316420] }
   0xe   :  { %692 = vmatprep.subr.bf16.mxu1 %v771_v13  ;;  %v108_v38 = vcombine.high %v616_v33, %v616_v33  ;;  %v115_v43 = vrot.slane %v616_v33, %v114_v40 }
  0x10   :  { %671 = vmatpush3.bf16.msra.mxu0 %v772_v14  ;;  %v122_v42 = vrot.slane %v108_v38, %v114_v40  ;;  %v123_v45 = vcombine.high %v115_v43, %v115_v43 }
  0x11   :  { %693 = vmatpush3.bf16.msra.mxu1 %v773_v15  ;;  %672 = vmatprep.subr.bf16.mxu0 %v774_v16 }
  0x12   :  { %694 = vmatprep.subr.bf16.mxu1 %v775_v17  ;;  %353 = vmatprep.mubr.bf16.mxu0 %v122_v42  ;;  %v124_v44 = vcombine.high %v122_v42, %v122_v42 }
  0x14   :  { %673 = vmatpush3.bf16.msra.mxu0 %v776_v18 }
  0x15   :  { %695 = vmatpush3.bf16.msra.mxu1 %v777_v19  ;;  %674 = vmatprep.subr.bf16.mxu0 %v778_v20 }
  0x16   :  { %696 = vmatprep.subr.bf16.mxu1 %v779_v21 }
  0x18   :  { %675 = vmatpush3.bf16.msra.mxu0 %v780_v22 }
  0x19   :  { %697 = vmatpush3.bf16.msra.mxu1 %v781_v23  ;;  %676 = vmatprep.subr.bf16.mxu0 %v782_v24 }
  0x1a   :  { %698 = vmatprep.subr.bf16.mxu1 %v783_v25 }
  0x1c   :  { %677 = vmatpush3.bf16.msra.mxu0 %v784_v26 }
  0x1d   :  { %699 = vmatpush3.bf16.msra.mxu1 %v785_v27  ;;  %678 = vmatprep.subr.bf16.mxu0 %v786_v28 }
  0x1e   :  { %700 = vmatprep.subr.bf16.mxu1 %v787_v29 }
  0x20   :  { %679 = vmatpush3.bf16.msra.mxu0 %v788_v31 }
  0x21   :  { %701 = vmatpush3.bf16.msra.mxu1 %v789_v32  ;;  %722 = vmatprep.subr.bf16.mxu0 %v825_v37 }
  0x22   :  { %742 = vmatprep.subr.bf16.mxu1 %v825_v37 }
  0x23   :  { %354 = vmatmul.mubr.bf16.vlgmr.msra.gmra.mxu0 %v115_v43 }
  0x24   :  { %12 = vsyncpa [#allocation3], 0  ;;  %393 = vmatprep.mubr.bf16.mxu1 %v124_v44  ;;  %723 = vmatpush3.bf16.msra.mxu0 %v790_v41  ;;  %v791_v46 = vld [vmem:[%s1032_s3 + $0x30] sm:$0xff]   ;;  %v792_v47 = vld [vmem:[%s1032_s3 + $0x28] sm:$0xff]   ;;  %vm826_vm0 = vmmov 0   ;;  %vm555_vm1 = vcmask 523264  }
  0x25   :  { %394 = vmatmul.mubr.bf16.vlgmr.msra.gmra.mxu1 %v123_v45  ;;  %724 = vmatprep.subr.bf16.mxu0 %v825_v37  ;;  %v793_v48 = vld [vmem:[%s1032_s3 + $0x20] sm:$0xff]   ;;  %v794_v49 = vld [vmem:[%s1032_s3 + $0x18] sm:$0xff]   ;;  %v795_v50 = vld [vmem:[%s1032_s3 + $0x10] sm:$0xff]   ;;  %s827_s1 = smov [#allocation2]   ;;  %vm599_vm2 = vcmask 74752  }
  0x26   :  { %v796_v51 = vld [vmem:[%s1032_s3 + $0x8] sm:$0xff]   ;;  %v797_v52 = vld [vmem:[%s1032_s3] sm:$0xff]   ;;  %738 = vmatprep.mubr.msk.bf16.mxu0 %vm826_vm0, %v825_v37  ;;  %v798_v53 = vld [vmem:[%s1034_s5 + $0x18] sm:$0xff]   ;;  %750 = vmatprep.mubr.msk.bf16.mxu1 %vm826_vm0, %v825_v37 }
  0x27   :  { %743 = vmatpush3.bf16.msra.mxu1 %v798_v53  ;;  %v799_v54 = vld [vmem:[%s1034_s5 + $0x10] sm:$0xff]   ;;  %v615_v57 = vld [vmem:[%s1031_s2] ss:$0 sm:$0xff]  ;;  %v800_v6 = vld [vmem:[%s1034_s5 + $0x8] sm:$0xff]  }
  0x28   :  { %725 = vmatpush3.bf16.msra.mxu0 %v791_v46  ;;  %744 = vmatprep.subr.bf16.mxu1 %v825_v37  ;;  %v801_v7 = vld [vmem:[%s1034_s5] sm:$0xff]   ;;  %s607_s5 = sshll.u32 %s827_s1, 4  ;;  %s608_s5 = int_to_ptr.vmem [resolvable:$true] %s607_s5 }
  0x29   :  { %726 = vmatprep.subr.bf16.mxu0 %v825_v37  ;;  %v649_v8 = vld [vmem:[%s1033_s4] ss:$0 sm:$0xff]  ;;  %s802_s4 = scalar_lea.vmem %s608_s5, 32  ;;  %p807_p1 = scmp.lt.s32.totalorder %s608_s5, %s608_s5 }
  0x2a   :  { %v658_v16 = vld [vmem:[%s1035_s6] ss:$0 sm:$0xff]  ;;  %p803_p0 = scmp.ne.s32.totalorder %s608_s5, %s802_s4  ;;  %p808_p2 = scmp.lt.s32.totalorder %s802_s4, %s802_s4 }
  0x2b   :  { %745 = vmatpush3.bf16.msra.mxu1 %v799_v54 }
  0x2c   :  { %727 = vmatpush3.bf16.msra.mxu0 %v792_v47  ;;  %746 = vmatprep.subr.bf16.mxu1 %v825_v37  ;;  %p809_p3 = por %p808_p2, %p807_p1 }
  0x2d   :  { %728 = vmatprep.subr.bf16.mxu0 %v825_v37 }
  0x2e   :  { %p810_p4 = pnand %p809_p3, %p803_p0 }
  0x2f   :  { %747 = vmatpush3.bf16.msra.mxu1 %v800_v6 }
  0x30   :  { %729 = vmatpush3.bf16.msra.mxu0 %v793_v48  ;;  %748 = vmatprep.subr.bf16.mxu1 %v825_v37 }
  0x31   :  { %730 = vmatprep.subr.bf16.mxu0 %v825_v37 }
  0x33   :  { %749 = vmatpush3.bf16.msra.mxu1 %v801_v7 }
  0x34   :  { %731 = vmatpush3.bf16.msra.mxu0 %v794_v49 }
  0x35   :  { %732 = vmatprep.subr.bf16.mxu0 %v825_v37 }
  0x38   :  { %733 = vmatpush3.bf16.msra.mxu0 %v795_v50 }
  0x39   :  { %734 = vmatprep.subr.bf16.mxu0 %v825_v37 }
  0x3c   :  { %735 = vmatpush3.bf16.msra.mxu0 %v796_v51 }
  0x3d   :  { %736 = vmatprep.subr.bf16.mxu0 %v825_v37 }
  0x40   :  { %737 = vmatpush3.bf16.msra.mxu0 %v797_v52 }
  0xe3   :  { %v680_v55 = vpop.f32.mrf.mxu0 }
  0xe5   :  { %v702_v56 = vpop.f32.mrf.mxu1  ;;  %v681_v58 = vpop.f32.mrf.mxu0 }
  0xe6   :  { %v682_v59 = vadd.f32 %v681_v58, %v680_v55 }
  0xe7   :  { %v703_v60 = vpop.f32.mrf.mxu1  ;;  %v683_v61 = vpop.f32.mrf.mxu0 }
  0xe8   :  { %v356_v62 = vadd.f32 %v682_v59, %v615_v57  ;;  %v704_v63 = vadd.f32 %v703_v60, %v702_v56 }
  0xe9   :  { %v705_v0 = vpop.f32.mrf.mxu1  ;;  %v684_v1 = vpop.f32.mrf.mxu0 }
  0xea   :  { %v396_v2 = vadd.f32 %v704_v63, %v356_v62 }
  0xeb   :  { %v706_v3 = vpop.f32.mrf.mxu1 }
  0xec   :  { %v401_v4 = vmax.f32 %v396_v2, 0.0 }
  0xee   :  { %v402_v5 = vpack.c.bf16 %v401_v4, %v401_v4 }
  0xf0   :  { %739 = vmatmul.mubr.bf16.vlgmr.msra.gmra.mxu0 %v402_v5 }
 0x1b0   :  { %v508_v9 = vpop.f32.mrf.mxu0 }
 0x1b1   :  { %v509_v10 = vadd.f32 %v649_v8, %v508_v9 }
 0x1b2   :  { %v740_v11 = vpop.f32.mrf.mxu0 }
 0x1b3   :  { %v514_v12 = vmax.f32 %v509_v10, 0.0 }
 0x1b4   :  { %v511_v13 = vpop.f32.mrf.mxu0 }
 0x1b5   :  { %v515_v14 = vpack.c.bf16 %v514_v12, %v514_v12 }
 0x1b6   :  { %v741_v15 = vpop.f32.mrf.mxu0 }
 0x1b7   :  { %751 = vmatmul.mubr.msk.bf16.vlgmr.msra.gmra.mxu1 %vm555_vm1, %v515_v14 }
 0x277   :  { %v593_v17 = vpop.f32.mrf.mxu1 }
 0x278   :  { %v594_v18 = vadd.f32 %v658_v16, %v593_v17 }
 0x279   :  { %v752_v19 = vpop.f32.mrf.mxu1 }
 0x27a   :  { %600 = vst.msk [vmem:[#allocation2] sm:$0x3] %vm599_vm2, %v594_v18 }
 0x27b   :  { %v596_v20 = vpop.f32.mrf.mxu1 }
 0x27c   :  { %813 = shalt.err (!%p810_p4)
}
 0x27d   :  { %610 = dma.vmem_to_hbm [thread:$0]  %s608_s5, 32, %s1036_s7, [#allocation3]   ;;  %v753_v21 = vpop.f32.mrf.mxu1 }
 0x27e   :  { %822 = dma.done.wait [#allocation3], 32  }
 0x27f   :  { %823 = vsyncadd [#allocation3], 4294967264 }
 0x280   :  { %614 = vsyncpa [#allocation3], 1 }

// kernel: simple_cnn_forward.4
= control target key start
LH: loop header
LB: loop body
LE: loop exit
PB: predicated region body
PF: predicated region fallthrough
CT: control target
= control target key end

     0   :  { %s2311_s12 = smov 0   ;;  %s2817_s0 = inlined_call_operand.vmem [shape: bf16[2,10,10,16], index: 0, kind: input, shape index: {}]   ;;  %s2818_s1 = inlined_call_operand.vmem [shape: bf16[9,16,32], index: 1, kind: input, shape index: {}]   ;;  %s2819_s2 = inlined_call_operand.vmem [shape: f32[1,32], index: 2, kind: input, shape index: {}]   ;;  %s2820_s3 = inlined_call_operand.vmem [shape: bf16[2,4,128], index: 3, kind: output, shape index: {}]  }
   0x1 LB: > { %s1913_s13 = sadd.s32 4294967295, %s2285_s12   ;;  %p1917_p0 = scmp.ge.s32.totalorder %s2285_s12, 1  ;;  %s2285_s12 = sphi %s2311_s12, %s13_s12  }
   0x2   : > { %p137_p1 = scmp.lt.s32.totalorder %s2285_s12, 3 }
   0x4   : > { %p138_p2 = pnand %p1917_p0, %p137_p1 }
   0x5   : > { %p160_p3 = scmp.lt.s32.totalorder (!%p138_p2), %s1913_s13, 1  ;;  %s2288_s14 = smov (!%p138_p2), 96  }
   0x6   : > { %141 = sbr.rel (%p138_p2) target bundleno = 454 (0x1c6), region = 32  ;;  %s2289_s18 = smov (!%p138_p2), 32  }
   0x7   : > { %s2290_s19 = smov (!%p138_p2), 64  }
   0xb   : > { %v2258_v0 = vld [vmem:[%s2818_s1 + $0x8] sm:$0xff]   ;;  %v2325_v1 = vld [vmem:[%s2818_s1] sm:$0xff]   ;;  %s2826_s13 = smov (!%p160_p3, %s1913_s13), 1  ;;  %v2332_v2 = vld [vmem:[%s2818_s1 + $0x10] sm:$0xff]   ;;  %vm188_vm0 = vsmask.f32 3328 }
   0xc   : > { %2243 = vmatprep.subr.bf16.mxu1 %v2258_v0  ;;  %2153 = vmatprep.subr.bf16.mxu0 %v2258_v0  ;;  %s2245_s20 = smul.u32 80, %s2826_s13  ;;  %vm189_vm1 = vsmask.f32 7440  ;;  %vm324_vm2 = vcmask 130048   ;;  %vm529_vm4 = vcmask 1042432   ;;  %vm530_vm5 = vcmask 1046532  }
   0xd   : > { %2244 = vmatpush3.bf16.msra.mxu1 %v2258_v0  ;;  %2154 = vmatpush3.bf16.msra.mxu0 %v2258_v0  ;;  %vm2383_vm3 = vmor %vm188_vm0, %vm189_vm1  ;;  %vm1731_vm7 = vcmask 261120   ;;  %s1919_s11 = sshll.u32 %s2826_s13, 1  ;;  %vm1759_vm8 = vcmask 254976   ;;  %vm1792_vm9 = vcmask 517376   ;;  %vm1825_vm10 = vcmask 779776  }
   0xe   : > { %2163 = vmatprep.subr.bf16.mxu1 %v2325_v1  ;;  %2173 = vmatprep.subr.bf16.mxu0 %v2332_v2  ;;  %s2340_s23 = scalar_lea.vmem %s2817_s0, %s2245_s20  ;;  %vm2449_vm6 = vmor %vm529_vm4, %vm530_vm5  ;;  %s168_s17 = scalar_lea.vmem %s2820_s3, %s1919_s11  ;;  %vm1858_vm11 = vcmask 1042176  }
   0xf   : > { %v2343_v3 = vld [vmem:[%s2340_s23] sm:$0xf]  ;;  %v2346_v4 = vld [vmem:[%s2340_s23 + $0x8] sm:$0xf]  ;;  %v2349_v5 = vld [vmem:[%s2340_s23 + $0x4] sm:$0x1] }
  0x10   : > { %v2352_v6 = vld [vmem:[%s2340_s23 + $0xc] sm:$0x1]  ;;  %v192_v7 = vshrl.u32 %v2343_v3, 16  ;;  %v195_v8 = vshll.u32 %v2343_v3, 16  ;;  %v201_v9 = vshll.u32 %v2349_v5, 16  ;;  %v206_v10 = vshrl.u32 %v2346_v4, 16 }
  0x11   : > { %v209_v11 = vshll.u32 %v2346_v4, 16  ;;  %v215_v12 = vshll.u32 %v2352_v6, 16  ;;  %v534_v13 = vrot.slane %v2349_v5, 5  ;;  %v538_v14 = vrot.slane %v2352_v6, 5  ;;  %v2363_v15 = vld [vmem:[%s2340_s23 + $0x20] sm:$0xf] }
  0x12   : > { %v194_v16 = vrot.slane %v192_v7, 4  ;;  %v197_v17 = vrot.slane %v195_v8, 5  ;;  %v203_v18 = vrot.slane %v201_v9, 5  ;;  %v208_v19 = vrot.slane %v206_v10, 4  ;;  %v2366_v20 = vld [vmem:[%s2340_s23 + $0x28] sm:$0xf] }
  0x13   : > { %v211_v21 = vrot.slane %v209_v11, 5  ;;  %v217_v22 = vrot.slane %v215_v12, 5  ;;  %v2369_v23 = vld [vmem:[%s2340_s23 + $0x24] sm:$0x1]  ;;  %v2372_v24 = vld [vmem:[%s2340_s23 + $0x2c] sm:$0x1]  ;;  %v1931_v25 = vcombine.low %v2343_v3, %v2346_v4  ;;  %v1933_v26 = vcombine.low %v2363_v15, %v2366_v20 }
  0x14   : > { %v198_v27 = vor.u32 %v197_v17, %v194_v16  ;;  %v248_v28 = vshrl.u32 %v2363_v15, 16  ;;  %v251_v29 = vshll.u32 %v2363_v15, 16  ;;  %v257_v30 = vshll.u32 %v2369_v23, 16  ;;  %v2391_v36 = vld [vmem:[%s2340_s23 + $0x10] sm:$0xf] }
  0x15   : > { %v212_v32 = vor.u32 %v211_v21, %v208_v19  ;;  %v262_v33 = vshrl.u32 %v2366_v20, 16  ;;  %v265_v34 = vshll.u32 %v2366_v20, 16  ;;  %v271_v35 = vshll.u32 %v2372_v24, 16  ;;  %v2394_v41 = vld [vmem:[%s2340_s23 + $0x18] sm:$0xf] }
  0x16   : > { %v199_v37 = vrot.slane %v198_v27, 4  ;;  %v250_v38 = vrot.slane %v248_v28, 4  ;;  %v253_v39 = vrot.slane %v251_v29, 5  ;;  %v259_v40 = vrot.slane %v257_v30, 5  ;;  %v2397_v46 = vld [vmem:[%s2340_s23 + $0x14] sm:$0x1] }
  0x17   : > { %v213_v42 = vrot.slane %v212_v32, 4  ;;  %v264_v43 = vrot.slane %v262_v33, 4  ;;  %v267_v44 = vrot.slane %v265_v34, 5  ;;  %v273_v45 = vrot.slane %v271_v35, 5  ;;  %v2406_v53 = vld [vmem:[%s2340_s23 + $0x1c] sm:$0x1] }
  0x18   : > { %v204_v47 = vsel %vm2383_vm3, %v199_v37, %v203_v18  ;;  %v254_v48 = vor.u32 %v253_v39, %v250_v38  ;;  %v550_v49 = vrot.slane %v2369_v23, 5  ;;  %v554_v50 = vrot.slane %v2372_v24, 5  ;;  %v2413_v60 = vld [vmem:[%s2340_s23 + $0x30] sm:$0xf]  ;;  %v2417_v7 = vld [vmem:[%s2340_s23 + $0x38] sm:$0xf] }
  0x19   : > { %v218_v51 = vsel %vm2383_vm3, %v213_v42, %v217_v22  ;;  %v268_v52 = vor.u32 %v267_v44, %v264_v43  ;;  %v220_v54 = vshrl.u32 %v2391_v36, 16  ;;  %v223_v55 = vshll.u32 %v2391_v36, 16  ;;  %v2424_v12 = vld [vmem:[%s2340_s23 + $0x34] sm:$0x1]  ;;  %v2430_v21 = vld [vmem:[%s2340_s23 + $0x3c] sm:$0x1] }
  0x1a   : > { %v1922_v56 = vcombine.low %v204_v47, %v218_v51  ;;  %v255_v57 = vrot.slane %v254_v48, 4  ;;  %v229_v58 = vshll.u32 %v2397_v46, 16  ;;  %v234_v59 = vshrl.u32 %v2394_v41, 16  ;;  %v505_v22 = vld [vmem:[%s2340_s23] sm:$0xe] }
  0x1b   : > { %v269_v61 = vrot.slane %v268_v52, 4  ;;  %v222_v62 = vrot.slane %v220_v54, 4  ;;  %v225_v63 = vrot.slane %v223_v55, 5  ;;  %v237_v0 = vshll.u32 %v2394_v41, 16  ;;  %v506_v32 = vld [vmem:[%s2340_s23 + $0x8] sm:$0xe] }
  0x1c   : > { %2155 = vmatprep.mubr.msk.bf16.mxu0 %vm324_vm2, %v1922_v56  ;;  %v260_v8 = vsel %vm2383_vm3, %v255_v57, %v259_v40  ;;  %v231_v9 = vrot.slane %v229_v58, 5  ;;  %v236_v10 = vrot.slane %v234_v59, 4  ;;  %v243_v11 = vshll.u32 %v2406_v53, 16  ;;  %v507_v38 = vld [vmem:[%s2340_s23 + $0x10] sm:$0xe] }
  0x1d   : > { %v274_v16 = vsel %vm2383_vm3, %v269_v61, %v273_v45  ;;  %v226_v17 = vor.u32 %v225_v63, %v222_v62  ;;  %v239_v18 = vrot.slane %v237_v0, 5  ;;  %v542_v19 = vrot.slane %v2397_v46, 5  ;;  %v508_v44 = vld [vmem:[%s2340_s23 + $0x18] sm:$0xe]  ;;  %v509_v45 = vld [vmem:[%s2340_s23 + $0x20] sm:$0xe] }
  0x1e   : > { %v1924_v27 = vcombine.low %v260_v8, %v274_v16  ;;  %v245_v28 = vrot.slane %v243_v11, 5  ;;  %v546_v29 = vrot.slane %v2406_v53, 5  ;;  %v276_v30 = vshrl.u32 %v2413_v60, 16  ;;  %v510_v62 = vld [vmem:[%s2340_s23 + $0x28] sm:$0xe] }
  0x1f   : > { %v227_v33 = vrot.slane %v226_v17, 4  ;;  %v240_v34 = vor.u32 %v239_v18, %v236_v10  ;;  %v279_v35 = vshll.u32 %v2413_v60, 16  ;;  %v285_v37 = vshll.u32 %v2424_v12, 16  ;;  %v2264_v10 = vld [vmem:[%s2818_s1 + $0x20] sm:$0xff]   ;;  %v511_v11 = vld [vmem:[%s2340_s23 + $0x30] sm:$0xe] }
  0x20   : > { %2159 = vmatprep.mubr.msk.bf16.mxu1 %vm324_vm2, %v1924_v27  ;;  %v278_v39 = vrot.slane %v276_v30, 4  ;;  %v290_v40 = vshrl.u32 %v2417_v7, 16  ;;  %v293_v42 = vshll.u32 %v2417_v7, 16  ;;  %v299_v43 = vshll.u32 %v2430_v21, 16  ;;  %v512_v5 = vld [vmem:[%s2340_s23 + $0x38] sm:$0xe] }
  0x21   : > { %v232_v46 = vsel %vm2383_vm3, %v227_v33, %v231_v9  ;;  %v241_v47 = vrot.slane %v240_v34, 4  ;;  %v281_v48 = vrot.slane %v279_v35, 5  ;;  %v287_v51 = vrot.slane %v285_v37, 5  ;;  %v2487_v34 = vld [vmem:[%s2340_s23 + $0xc] sm:$0x1] }
  0x22   : > { %v292_v53 = vrot.slane %v290_v40, 4  ;;  %v295_v54 = vrot.slane %v293_v42, 5  ;;  %v301_v55 = vrot.slane %v299_v43, 5  ;;  %v1940_v56 = vrot.slane %v505_v22, 9  ;;  %v1980_v37 = vld [vmem:[%s2340_s23 + $0x10] sm:$0xf] }
  0x23   : > { %v246_v57 = vsel %vm2383_vm3, %v241_v47, %v245_v28  ;;  %v282_v58 = vor.u32 %v281_v48, %v278_v39  ;;  %v1941_v59 = vrot.slane %v506_v32, 9  ;;  %v1932_v61 = vcombine.low %v2391_v36, %v2394_v41  ;;  %v2267_v15 = vld [vmem:[%s2340_s23 + $0x8] ss:$8 sps:$4 sm:$0xff]  }
  0x24   : > { %v1923_v63 = vcombine.low %v232_v46, %v246_v57  ;;  %v296_v0 = vor.u32 %v295_v54, %v292_v53  ;;  %v535_v8 = vsel %vm2449_vm6, %v1940_v56, %v534_v13  ;;  %v1942_v9 = vrot.slane %v507_v38, 9  ;;  %v2503_v38 = vld [vmem:[%s2340_s23 + $0x14] sm:$0x1] }
  0x25   : > { %v283_v16 = vrot.slane %v282_v58, 4  ;;  %v539_v17 = vsel %vm2449_vm6, %v1941_v59, %v538_v14  ;;  %v1943_v18 = vrot.slane %v508_v44, 9  ;;  %v1944_v22 = vrot.slane %v509_v45, 9  ;;  %v1982_v44 = vld [vmem:[%s2340_s23 + $0x18] sm:$0xf]  ;;  %v2532_v59 = vld [vmem:[%s2818_s1 + $0x30] sm:$0xff]  }
  0x26   : > { %2156 = vmatmul.mubr.msk.bf16.vlgmr.msra.gmra.mxu0 %vm324_vm2, %v1923_v63  ;;  %v297_v13 = vrot.slane %v296_v0, 4  ;;  %v1950_v27 = vcombine.low %v535_v8, %v539_v17  ;;  %v543_v28 = vsel %vm2449_vm6, %v1942_v9, %v542_v19  ;;  %v1945_v30 = vrot.slane %v510_v62, 9  ;;  %v1978_v19 = vld [vmem:[%s2340_s23 + $0x8] sm:$0xf]  ;;  %v2508_v45 = vld [vmem:[%s2340_s23 + $0x1c] sm:$0x1] }
  0x27   : > { %v288_v6 = vsel %vm2383_vm3, %v283_v16, %v287_v51  ;;  %2174 = vmatpush3.bf16.msra.mxu0 %v2332_v2  ;;  %v547_v14 = vsel %vm2449_vm6, %v1943_v18, %v546_v29  ;;  %v551_v32 = vsel %vm2449_vm6, %v1944_v22, %v550_v49  ;;  %v1934_v33 = vcombine.low %v2413_v60, %v2417_v7  ;;  %v2495_v2 = vld [vmem:[%s2818_s1 + $0x18] sm:$0xff]   ;;  %v2527_v58 = vld [vmem:[%s2340_s23 + $0x24] sm:$0x1]  ;;  %v1986_v9 = vld [vmem:[%s2340_s23 + $0x28] sm:$0xf] }
  0x28   : > { %v302_v35 = vsel %vm2383_vm3, %v297_v13, %v301_v55  ;;  %2175 = vmatprep.mubr.msk.bf16.mxu0 %vm324_vm2, %v1950_v27  ;;  %v1951_v23 = vcombine.low %v543_v28, %v547_v14  ;;  %2193 = vmatprep.subr.bf16.mxu0 %v2264_v10  ;;  %v555_v49 = vsel %vm2449_vm6, %v1945_v30, %v554_v50  ;;  %v1946_v29 = vrot.slane %v511_v11, 9  ;;  %v1984_v50 = vld [vmem:[%s2340_s23 + $0x20] sm:$0xf]  ;;  %v2543_v16 = vld [vmem:[%s2818_s1 + $0x28] sm:$0xff]   ;;  %v2007_v7 = vld [vmem:[%s2340_s23 + $0x18] sm:$0xe] }
  0x29   : > { %v1925_v39 = vcombine.low %v288_v6, %v302_v35  ;;  %v1952_v40 = vcombine.low %v551_v32, %v555_v49  ;;  %v558_v42 = vrot.slane %v2424_v12, 5  ;;  %v1947_v43 = vrot.slane %v512_v5, 9  ;;  %v2547_v5 = vld [vmem:[%s2340_s23 + $0x2c] sm:$0x1] }
  0x2a   : > { %v562_v46 = vrot.slane %v2430_v21, 5  ;;  %v810_v47 = vshrl.u32 %v1978_v19, 16  ;;  %v813_v24 = vshll.u32 %v1978_v19, 16  ;;  %v819_v48 = vshll.u32 %v2487_v34, 16 }
  0x2b   : > { %2160 = vmatmul.mubr.msk.bf16.vlgmr.msra.gmra.mxu1 %vm324_vm2, %v1925_v39  ;;  %v2516_v51 = vsel %vm2449_vm6, %v1946_v29, %v558_v42  ;;  %v824_v53 = vshrl.u32 %v1980_v37, 16  ;;  %v827_v12 = vshll.u32 %v1980_v37, 16  ;;  %v833_v54 = vshll.u32 %v2503_v38, 16 }
  0x2c   : > { %2164 = vmatpush3.bf16.msra.mxu1 %v2325_v1  ;;  %2165 = vmatprep.mubr.msk.bf16.mxu1 %vm324_vm2, %v1931_v25  ;;  %v563_v21 = vsel %vm2449_vm6, %v1947_v43, %v562_v46  ;;  %v812_v55 = vrot.slane %v810_v47, 4  ;;  %v815_v56 = vrot.slane %v813_v24, 5  ;;  %v821_v57 = vrot.slane %v819_v48, 5  ;;  %v2570_v47 = vld [vmem:[%s2340_s23 + $0x3c] sm:$0x1] }
  0x2d   : > { %2183 = vmatprep.subr.bf16.mxu1 %v2495_v2  ;;  %v1953_v1 = vcombine.low %v2516_v51, %v563_v21  ;;  %v826_v3 = vrot.slane %v824_v53, 4  ;;  %v829_v4 = vrot.slane %v827_v12, 5  ;;  %v835_v25 = vrot.slane %v833_v54, 5  ;;  %v1992_v53 = vld [vmem:[%s2340_s23 + $0x40] sm:$0xf] }
  0x2e   : > { %2176 = vmatmul.mubr.msk.bf16.vlgmr.msra.gmra.mxu0 %vm324_vm2, %v1951_v23  ;;  %v816_v62 = vor.u32 %v815_v56, %v812_v55  ;;  %v838_v63 = vshrl.u32 %v1982_v44, 16  ;;  %v841_v0 = vshll.u32 %v1982_v44, 16  ;;  %v847_v8 = vshll.u32 %v2508_v45, 16  ;;  %v1990_v44 = vld [vmem:[%s2340_s23 + $0x38] sm:$0xf] }
  0x2f   : > { %2194 = vmatpush3.bf16.msra.mxu0 %v2264_v10  ;;  %2179 = vmatprep.mubr.msk.bf16.mxu0 %vm324_vm2, %v1952_v40  ;;  %v830_v11 = vor.u32 %v829_v4, %v826_v3  ;;  %v852_v17 = vshrl.u32 %v1984_v50, 16  ;;  %v855_v18 = vshll.u32 %v1984_v50, 16  ;;  %v861_v22 = vshll.u32 %v2527_v58, 16  ;;  %v1988_v10 = vld [vmem:[%s2340_s23 + $0x30] sm:$0xf] }
  0x30   : > { %v817_v13 = vrot.slane %v816_v62, 4  ;;  %v840_v27 = vrot.slane %v838_v63, 4  ;;  %v843_v28 = vrot.slane %v841_v0, 5  ;;  %v849_v30 = vrot.slane %v847_v8, 5  ;;  %2213 = vmatprep.subr.bf16.mxu0 %v2532_v59  ;;  %v2560_v40 = vld [vmem:[%s2340_s23 + $0x34] sm:$0x1] }
  0x31   : > { %v831_v6 = vrot.slane %v830_v11, 4  ;;  %v854_v14 = vrot.slane %v852_v17, 4  ;;  %v857_v32 = vrot.slane %v855_v18, 5  ;;  %v863_v19 = vrot.slane %v861_v22, 5  ;;  %v2580_v12 = vld [vmem:[%s2340_s23 + $0x44] sm:$0x1] }
  0x32   : > { %v822_v35 = vsel %vm2383_vm3, %v817_v13, %v821_v57  ;;  %v844_v23 = vor.u32 %v843_v28, %v840_v27  ;;  %v866_v49 = vshrl.u32 %v1986_v9, 16  ;;  %v869_v29 = vshll.u32 %v1986_v9, 16  ;;  %v2006_v9 = vld [vmem:[%s2340_s23 + $0x10] sm:$0xe] }
  0x33   : > { %2166 = vmatmul.mubr.msk.bf16.vlgmr.msra.gmra.mxu1 %vm324_vm2, %v1932_v61  ;;  %v836_v37 = vsel %vm2383_vm3, %v831_v6, %v835_v25  ;;  %v858_v39 = vor.u32 %v857_v32, %v854_v14  ;;  %v875_v42 = vshll.u32 %v2547_v5, 16  ;;  %v880_v43 = vshrl.u32 %v1988_v10, 16  ;;  %v2005_v25 = vld [vmem:[%s2340_s23 + $0x8] sm:$0xe] }
  0x34   : > { %2184 = vmatpush3.bf16.msra.mxu1 %v2495_v2  ;;  %2169 = vmatprep.mubr.msk.bf16.mxu1 %vm324_vm2, %v1933_v26  ;;  %v1996_v36 = vcombine.low %v822_v35, %v836_v37  ;;  %v845_v41 = vrot.slane %v844_v23, 4  ;;  %v868_v61 = vrot.slane %v866_v49, 4  ;;  %v871_v46 = vrot.slane %v869_v29, 5  ;;  %v2008_v23 = vld [vmem:[%s2340_s23 + $0x20] sm:$0xe] }
  0x35   : > { %2203 = vmatprep.subr.bf16.mxu1 %v2543_v16  ;;  %v859_v24 = vrot.slane %v858_v39, 4  ;;  %v877_v48 = vrot.slane %v875_v42, 5  ;;  %v882_v50 = vrot.slane %v880_v43, 4  ;;  %v883_v51 = vshll.u32 %v1988_v10, 16  ;;  %v2598_v10 = vld [vmem:[%s2818_s1 + $0x40] sm:$0xff]  }
  0x36   : > { %2180 = vmatmul.mubr.msk.bf16.gmra.mxu0 %vm324_vm2, %v1953_v1  ;;  %v850_v20 = vsel %vm2383_vm3, %v845_v41, %v849_v30  ;;  %v872_v26 = vor.u32 %v871_v46, %v868_v61  ;;  %v889_v2 = vshll.u32 %v2560_v40, 16  ;;  %v894_v54 = vshrl.u32 %v1990_v44, 16  ;;  %v2271_v29 = vld [vmem:[%s2340_s23 + $0x28] ss:$8 sps:$4 sm:$0xff]  }
  0x37   : > { %2195 = vmatprep.mubr.msk.bf16.mxu0 %vm324_vm2, %v1996_v36  ;;  %v864_v21 = vsel %vm2383_vm3, %v859_v24, %v863_v19  ;;  %v885_v55 = vrot.slane %v883_v51, 5  ;;  %v897_v56 = vshll.u32 %v1990_v44, 16  ;;  %v903_v57 = vshll.u32 %v2570_v47, 16  ;;  %v2273_v46 = vld [vmem:[%s2340_s23 + $0x10] ss:$8 sps:$4 sm:$0xff]  }
  0x38   : > { %v1997_v1 = vcombine.low %v850_v20, %v864_v21  ;;  %v873_v3 = vrot.slane %v872_v26, 4  ;;  %v896_v4 = vrot.slane %v894_v54, 4  ;;  %v891_v63 = vrot.slane %v889_v2, 5  ;;  %v2011_v2 = vld [vmem:[%s2340_s23 + $0x38] sm:$0xe] }
  0x39   : > { %v886_v62 = vor.u32 %v885_v55, %v882_v50  ;;  %v899_v0 = vrot.slane %v897_v56, 5  ;;  %v908_v8 = vshrl.u32 %v1992_v53, 16  ;;  %v905_v17 = vrot.slane %v903_v57, 5  ;;  %v2012_v54 = vld [vmem:[%s2340_s23 + $0x40] sm:$0xe] }
  0x3a   : > { %v878_v11 = vsel %vm2383_vm3, %v873_v3, %v877_v48  ;;  %v911_v18 = vshll.u32 %v1992_v53, 16  ;;  %v917_v22 = vshll.u32 %v2580_v12, 16  ;;  %v2013_v30 = vrot.slane %v2005_v25, 9  ;;  %v2051_v3 = vld [vmem:[%s2340_s23 + $0x10] sm:$0xf] }
  0x3b   : > { %2170 = vmatmul.mubr.msk.bf16.gmra.mxu1 %vm324_vm2, %v1934_v33  ;;  %v887_v13 = vrot.slane %v886_v62, 4  ;;  %v900_v27 = vor.u32 %v899_v0, %v896_v4  ;;  %v910_v28 = vrot.slane %v908_v8, 4  ;;  %v1053_v14 = vrot.slane %v2487_v34, 5  ;;  %v2269_v33 = vld [vmem:[%s2340_s23 + $0x18] ss:$8 sps:$4 sm:$0xff]  }
  0x3c   : > { %2185 = vmatprep.mubr.msk.bf16.mxu1 %vm324_vm2, %v2267_v15  ;;  %v913_v6 = vrot.slane %v911_v18, 5  ;;  %v2014_v32 = vrot.slane %v2006_v9, 9  ;;  %v1057_v60 = vrot.slane %v2503_v38, 5  ;;  %v2015_v49 = vrot.slane %v2007_v7, 9  ;;  %v2053_v25 = vld [vmem:[%s2340_s23 + $0x18] sm:$0xf] }
  0x3d   : > { %v892_v19 = vsel %vm2383_vm3, %v887_v13, %v891_v63  ;;  %v901_v35 = vrot.slane %v900_v27, 4  ;;  %v919_v34 = vrot.slane %v917_v22, 5  ;;  %v1061_v42 = vrot.slane %v2508_v45, 5  ;;  %v2623_v45 = vld [vmem:[%s2818_s1 + $0x38] sm:$0xff]   ;;  %v2078_v18 = vld [vmem:[%s2340_s23 + $0x10] sm:$0xe] }
  0x3e   : > { %2196 = vmatmul.mubr.msk.bf16.vlgmr.msra.gmra.mxu0 %vm324_vm2, %v1997_v1  ;;  %v1998_v37 = vcombine.low %v878_v11, %v892_v19  ;;  %v914_v39 = vor.u32 %v913_v6, %v910_v28  ;;  %v2016_v38 = vrot.slane %v2008_v23, 9  ;;  %v1065_v43 = vrot.slane %v2527_v58, 5  ;;  %v2009_v58 = vld [vmem:[%s2340_s23 + $0x28] sm:$0xe]  ;;  %v2054_v62 = vld [vmem:[%s2340_s23 + $0x1c] sm:$0x1] }
  0x3f   : > { %2214 = vmatpush3.bf16.msra.mxu0 %v2532_v59  ;;  %v906_v44 = vsel %vm2383_vm3, %v901_v35, %v905_v17  ;;  %v2618_v41 = vsel %vm2449_vm6, %v2013_v30, %v1053_v14  ;;  %v2010_v59 = vld [vmem:[%s2340_s23 + $0x30] sm:$0xe]  ;;  %v2630_v61 = vsel %vm2449_vm6, %v2014_v32, %v1057_v60  ;;  %v2635_v24 = vsel %vm2449_vm6, %v2015_v49, %v1061_v42  ;;  %v2275_v22 = vld [vmem:[%s2340_s23 + $0x20] ss:$8 sps:$4 sm:$0xff]   ;;  %v2079_v30 = vld [vmem:[%s2340_s23 + $0x18] sm:$0xe] }
  0x40   : > { %2199 = vmatprep.mubr.msk.bf16.mxu0 %vm324_vm2, %v1998_v37  ;;  %v915_v36 = vrot.slane %v914_v39, 4  ;;  %2233 = vmatprep.subr.bf16.mxu0 %v2598_v10  ;;  %v2017_v48 = vrot.slane %v2009_v58, 9  ;;  %v1069_v50 = vrot.slane %v2547_v5, 5  ;;  %v2642_v15 = vsel %vm2449_vm6, %v2016_v38, %v1065_v43  ;;  %v2277_v14 = vld [vmem:[%s2340_s23 + $0x30] ss:$8 sps:$4 sm:$0xff]  }
  0x41   : > { %v2018_v20 = vrot.slane %v2010_v59, 9  ;;  %v1073_v26 = vrot.slane %v2560_v40, 5  ;;  %v2019_v21 = vrot.slane %v2011_v2, 9  ;;  %v1077_v5 = vrot.slane %v2570_v47, 5  ;;  %v2272_v40 = vld [vmem:[%s2340_s23 + $0x38] ss:$8 sps:$4 sm:$0xff]  }
  0x42   : > { %v920_v51 = vsel %vm2383_vm3, %v915_v36, %v919_v34  ;;  %v2020_v55 = vrot.slane %v2012_v54, 9  ;;  %v1081_v56 = vrot.slane %v2580_v12, 5  ;;  %v2023_v57 = vcombine.low %v2618_v41, %v2630_v61  ;;  %v2052_v47 = vld [vmem:[%s2340_s23 + $0x14] sm:$0x1]  ;;  %v2055_v19 = vld [vmem:[%s2340_s23 + $0x20] sm:$0xf] }
  0x43   : > { %2186 = vmatmul.mubr.msk.bf16.vlgmr.msra.gmra.mxu1 %vm324_vm2, %v2269_v33  ;;  %v1999_v53 = vcombine.low %v906_v44, %v920_v51  ;;  %v2024_v1 = vcombine.low %v2635_v24, %v2642_v15  ;;  %v2667_v12 = vsel %vm2449_vm6, %v2018_v20, %v1073_v26  ;;  %v2671_v4 = vsel %vm2449_vm6, %v2019_v21, %v1077_v5  ;;  %v2056_v37 = vld [vmem:[%s2340_s23 + $0x24] sm:$0x1]  ;;  %v2057_v42 = vld [vmem:[%s2340_s23 + $0x28] sm:$0xf]  ;;  %v2058_v38 = vld [vmem:[%s2340_s23 + $0x2c] sm:$0x1] }
  0x44   : > { %2204 = vmatpush3.bf16.msra.mxu1 %v2543_v16  ;;  %2189 = vmatprep.mubr.msk.bf16.mxu1 %vm324_vm2, %v2271_v29  ;;  %v2660_v16 = vsel %vm2449_vm6, %v2017_v48, %v1069_v50  ;;  %v1329_v63 = vshrl.u32 %v2051_v3, 16  ;;  %v1332_v0 = vshll.u32 %v2051_v3, 16  ;;  %v2678_v8 = vsel %vm2449_vm6, %v2020_v55, %v1081_v56  ;;  %v2080_v61 = vld [vmem:[%s2340_s23 + $0x20] sm:$0xe]  ;;  %v2081_v20 = vld [vmem:[%s2340_s23 + $0x28] sm:$0xe] }
  0x45   : > { %2223 = vmatprep.subr.bf16.mxu1 %v2623_v45  ;;  %v1338_v9 = vshll.u32 %v2052_v47, 16  ;;  %v1343_v11 = vshrl.u32 %v2053_v25, 16  ;;  %v1346_v17 = vshll.u32 %v2053_v25, 16  ;;  %v1352_v28 = vshll.u32 %v2054_v62, 16  ;;  %v2059_v21 = vld [vmem:[%s2340_s23 + $0x30] sm:$0xf] }
  0x46   : > { %2200 = vmatmul.mubr.msk.bf16.gmra.mxu0 %vm324_vm2, %v1999_v53  ;;  %v1331_v13 = vrot.slane %v1329_v63, 4  ;;  %v1334_v27 = vrot.slane %v1332_v0, 5  ;;  %v2086_v6 = vrot.slane %v2078_v18, 9  ;;  %v1572_v33 = vrot.slane %v2052_v47, 5  ;;  %v2061_v25 = vld [vmem:[%s2340_s23 + $0x38] sm:$0xf] }
  0x47   : > { %2215 = vmatprep.mubr.msk.bf16.mxu0 %vm324_vm2, %v2273_v46  ;;  %v1340_v32 = vrot.slane %v1338_v9, 5  ;;  %v1345_v60 = vrot.slane %v1343_v11, 4  ;;  %v1348_v7 = vrot.slane %v1346_v17, 5  ;;  %v1354_v23 = vrot.slane %v1352_v28, 5  ;;  %v2062_v18 = vld [vmem:[%s2340_s23 + $0x3c] sm:$0x1] }
  0x48   : > { %v1335_v35 = vor.u32 %v1334_v27, %v1331_v13  ;;  %v2087_v49 = vrot.slane %v2079_v30, 9  ;;  %v1576_v29 = vrot.slane %v2054_v62, 5  ;;  %v2025_v39 = vcombine.low %v2660_v16, %v2667_v12  ;;  %v2278_v62 = vld [vmem:[%s2340_s23 + $0x40] ss:$8 sps:$4 sm:$0xff]   ;;  %v2082_v27 = vld [vmem:[%s2340_s23 + $0x30] sm:$0xe] }
  0x49   : > { %v1349_v34 = vor.u32 %v1348_v7, %v1345_v60  ;;  %v1357_v43 = vshrl.u32 %v2055_v19, 16  ;;  %v1360_v44 = vshll.u32 %v2055_v19, 16  ;;  %v2026_v36 = vcombine.low %v2671_v4, %v2678_v8 }
  0x4a   : > { %v1336_v41 = vrot.slane %v1335_v35, 4  ;;  %v1366_v58 = vshll.u32 %v2056_v37, 16  ;;  %v1371_v59 = vshrl.u32 %v2057_v42, 16  ;;  %v1573_v48 = vsel %vm2449_vm6, %v2086_v6, %v1572_v33 }
  0x4b   : > { %2190 = vmatmul.mubr.msk.bf16.gmra.mxu1 %vm324_vm2, %v2272_v40  ;;  %v1350_v46 = vrot.slane %v1349_v34, 4  ;;  %v1359_v50 = vrot.slane %v1357_v43, 4  ;;  %v1362_v51 = vrot.slane %v1360_v44, 5  ;;  %v1577_v2 = vsel %vm2449_vm6, %v2087_v49, %v1576_v29  ;;  %v2064_v44 = vld [vmem:[%s2340_s23 + $0x44] sm:$0x1] }
  0x4c   : > { %2205 = vmatprep.mubr.msk.bf16.mxu1 %vm324_vm2, %v2023_v57  ;;  %v1341_v26 = vsel %vm2383_vm3, %v1336_v41, %v1340_v32  ;;  %v1373_v53 = vrot.slane %v1371_v59, 4  ;;  %v1374_v54 = vshll.u32 %v2057_v42, 16  ;;  %v1380_v56 = vshll.u32 %v2058_v38, 16  ;;  %v2060_v57 = vld [vmem:[%s2340_s23 + $0x34] sm:$0x1] }
  0x4d   : > { %v1355_v5 = vsel %vm2383_vm3, %v1350_v46, %v1354_v23  ;;  %v1363_v55 = vor.u32 %v1362_v51, %v1359_v50  ;;  %v2088_v40 = vrot.slane %v2080_v61, 9  ;;  %v2709_v16 = vrot.slane %v1366_v58, 5  ;;  %v2083_v32 = vld [vmem:[%s2340_s23 + $0x38] sm:$0xe]  ;;  %v2063_v23 = vld [vmem:[%s2340_s23 + $0x40] sm:$0xf] }
  0x4e   : > { %2216 = vmatmul.mubr.msk.bf16.vlgmr.msra.gmra.mxu0 %vm324_vm2, %v2275_v22  ;;  %v1376_v3 = vrot.slane %v1374_v54, 5  ;;  %v1580_v47 = vrot.slane %v2056_v37, 5  ;;  %v2089_v12 = vrot.slane %v2081_v20, 9  ;;  %v1584_v0 = vrot.slane %v2058_v38, 5  ;;  %v2066_v51 = vld [vmem:[%s2340_s23 + $0x4c] sm:$0x1] }
  0x4f   : > { %2234 = vmatpush3.bf16.msra.mxu0 %v2598_v10  ;;  %2219 = vmatprep.mubr.msk.bf16.mxu0 %vm324_vm2, %v2277_v14  ;;  %v2096_v10 = vcombine.low %v1573_v48, %v1577_v2  ;;  %v2713_v63 = vrot.slane %v1363_v55, 4  ;;  %v1385_v9 = vshrl.u32 %v2059_v21, 16  ;;  %v2069_v11 = vcombine.low %v1341_v26, %v1355_v5  ;;  %v2084_v26 = vld [vmem:[%s2340_s23 + $0x40] sm:$0xe]  ;;  %v2085_v5 = vld [vmem:[%s2340_s23 + $0x48] sm:$0xe] }
  0x50   : > { %v1377_v17 = vor.u32 %v1376_v3, %v1373_v53  ;;  %v1388_v22 = vshll.u32 %v2059_v21, 16  ;;  %v1394_v13 = vshll.u32 %v2060_v57, 16  ;;  %v1382_v28 = vrot.slane %v1380_v56, 5 }
  0x51   : > { %v1581_v30 = vsel %vm2449_vm6, %v2088_v40, %v1580_v47  ;;  %v1387_v6 = vrot.slane %v1385_v9, 4  ;;  %v1399_v14 = vshrl.u32 %v2061_v25, 16  ;;  %v1369_v24 = vsel %vm2383_vm3, %v2713_v63, %v2709_v16 }
  0x52   : > { %v1378_v15 = vrot.slane %v1377_v17, 4  ;;  %v1390_v60 = vrot.slane %v1388_v22, 5  ;;  %v1402_v33 = vshll.u32 %v2061_v25, 16  ;;  %v1408_v19 = vshll.u32 %v2062_v18, 16 }
  0x53   : > { %2206 = vmatmul.mubr.msk.bf16.vlgmr.msra.gmra.mxu1 %vm324_vm2, %v2024_v1  ;;  %v1585_v1 = vsel %vm2449_vm6, %v2089_v12, %v1584_v0  ;;  %v1401_v7 = vrot.slane %v1399_v14, 4  ;;  %v2090_v35 = vrot.slane %v2082_v27, 9  ;;  %v1396_v49 = vrot.slane %v1394_v13, 5 }
  0x54   : > { %2224 = vmatpush3.bf16.msra.mxu1 %v2623_v45  ;;  %2209 = vmatprep.mubr.msk.bf16.mxu1 %vm324_vm2, %v2025_v39  ;;  %v1391_v45 = vor.u32 %v1390_v60, %v1387_v6  ;;  %v1588_v29 = vrot.slane %v2060_v57, 5  ;;  %v2091_v37 = vrot.slane %v2083_v32, 9  ;;  %v2065_v39 = vld [vmem:[%s2340_s23 + $0x48] sm:$0xf]  ;;  %v1383_v34 = vsel %vm2383_vm3, %v1378_v15, %v1382_v28 }
  0x55   : > { %v2097_v42 = vcombine.low %v1581_v30, %v1585_v1  ;;  %v1404_v38 = vrot.slane %v1402_v33, 5  ;;  %v1592_v43 = vrot.slane %v2062_v18, 5  ;;  %v1413_v59 = vshrl.u32 %v2063_v23, 16 }
  0x56   : > { %2220 = vmatmul.mubr.msk.bf16.gmra.mxu0 %vm324_vm2, %v2278_v62  ;;  %v1392_v41 = vrot.slane %v1391_v45, 4  ;;  %v1589_v58 = vsel %vm2449_vm6, %v2090_v35, %v1588_v29  ;;  %v1416_v61 = vshll.u32 %v2063_v23, 16  ;;  %v1410_v48 = vrot.slane %v1408_v19, 5 }
  0x57   : > { %2235 = vmatprep.mubr.msk.bf16.mxu0 %vm324_vm2, %v2096_v10  ;;  %v1405_v46 = vor.u32 %v1404_v38, %v1401_v7  ;;  %v1593_v50 = vsel %vm2449_vm6, %v2091_v37, %v1592_v43  ;;  %v1427_v20 = vshrl.u32 %v2065_v39, 16  ;;  %v1415_v53 = vrot.slane %v1413_v59, 4 }
  0x58   : > { %v1397_v2 = vsel %vm2383_vm3, %v1392_v41, %v1396_v49  ;;  %v1418_v54 = vrot.slane %v1416_v61, 5  ;;  %v1422_v21 = vshll.u32 %v2064_v44, 16  ;;  %v2098_v56 = vcombine.low %v1589_v58, %v1593_v50 }
  0x59   : > { %v1406_v55 = vrot.slane %v1405_v46, 4  ;;  %v1429_v40 = vrot.slane %v1427_v20, 4  ;;  %v1430_v57 = vshll.u32 %v2065_v39, 16  ;;  %v1436_v3 = vshll.u32 %v2066_v51, 16 }
  0x5a   : > { %v1419_v16 = vor.u32 %v1418_v54, %v1415_v53  ;;  %v2092_v47 = vrot.slane %v2084_v26, 9  ;;  %v1596_v12 = vrot.slane %v2064_v44, 5  ;;  %v2093_v10 = vrot.slane %v2085_v5, 9 }
  0x5b   : > { %2210 = vmatmul.mubr.msk.bf16.gmra.mxu1 %vm324_vm2, %v2026_v36  ;;  %v1411_v25 = vsel %vm2383_vm3, %v1406_v55, %v1410_v48  ;;  %v1432_v62 = vrot.slane %v1430_v57, 5  ;;  %v1600_v63 = vrot.slane %v2066_v51, 5  ;;  %v2070_v4 = vcombine.low %v1369_v24, %v1383_v34 }
  0x5c   : > { %2225 = vmatprep.mubr.msk.bf16.mxu1 %vm324_vm2, %v2069_v11  ;;  %v1597_v36 = vsel %vm2449_vm6, %v2092_v47, %v1596_v12  ;;  %v2071_v9 = vcombine.low %v1397_v2, %v1411_v25  ;;  %v1420_v11 = vrot.slane %v1419_v16, 4  ;;  %v1424_v17 = vrot.slane %v1422_v21, 5 }
  0x5d   : > { %v1433_v8 = vor.u32 %v1432_v62, %v1429_v40  ;;  %v1601_v0 = vsel %vm2449_vm6, %v2093_v10, %v1600_v63  ;;  %v1438_v18 = vrot.slane %v1436_v3, 5 }
  0x5e   : > { %2236 = vmatmul.mubr.msk.bf16.vlgmr.msra.gmra.mxu0 %vm324_vm2, %v2097_v42  ;;  %v2099_v13 = vcombine.low %v1597_v36, %v1601_v0  ;;  %v1425_v27 = vsel %vm2383_vm3, %v1420_v11, %v1424_v17 }
  0x5f   : > { %2239 = vmatprep.mubr.msk.bf16.mxu0 %vm324_vm2, %v2098_v56  ;;  %v1434_v22 = vrot.slane %v1433_v8, 4 }
  0x61   : > { %v1439_v28 = vsel %vm2383_vm3, %v1434_v22, %v1438_v18 }
  0x62   : > { %v2072_v52 = vcombine.low %v1425_v27, %v1439_v28 }
  0x63   : > { %2226 = vmatmul.mubr.msk.bf16.vlgmr.msra.gmra.mxu1 %vm324_vm2, %v2070_v4 }
  0x64   : > { %2229 = vmatprep.mubr.msk.bf16.mxu1 %vm324_vm2, %v2071_v9 }
  0x66   : > { %2240 = vmatmul.mubr.msk.bf16.gmra.mxu0 %vm324_vm2, %v2099_v13 }
  0x6b   : > { %2230 = vmatmul.mubr.msk.bf16.gmra.mxu1 %vm324_vm2, %v2072_v52 }
  0xe6   : > { %v2157_v30 = vpop.f32.mrf.mxu0 }
  0xe8   : > { %v371_v6 = vpop.f32.mrf.mxu0 }
  0xea   : > { %v2158_v14 = vpop.f32.mrf.mxu0 }
  0xeb   : > { %v2161_v32 = vpop.f32.mrf.mxu1 }
  0xec   : > { %v374_v24 = vpop.f32.mrf.mxu0 }
  0xed   : > { %v387_v15 = vpop.f32.mrf.mxu1 }
  0xee   : > { %v2177_v1 = vpop.f32.mrf.mxu0 }
  0xef   : > { %v2162_v60 = vpop.f32.mrf.mxu1 }
  0xf0   : > { %v631_v7 = vpop.f32.mrf.mxu0 }
  0xf1   : > { %v2769_v33 = vpop.f32.mrf.mxu1 }
  0xf2   : > { %v2178_v19 = vpop.f32.mrf.mxu0 }
  0xf3   : > { %v2167_v35 = vpop.f32.mrf.mxu1 }
  0xf4   : > { %v634_v31 = vpop.f32.mrf.mxu0  ;;  %v483_v57 = vadd.f32 %v2167_v35, %v2157_v30 }
  0xf5   : > { %v474_v23 = vpop.f32.mrf.mxu1 }
  0xf6   : > { %v2181_v45 = vpop.f32.mrf.mxu0  ;;  %v475_v47 = vadd.f32 %v474_v23, %v371_v6  ;;  %v664_v62 = vadd.f32 %v2177_v1, %v483_v57 }
  0xf7   : > { %v2168_v49 = vpop.f32.mrf.mxu1 }
  0xf8   : > { %v647_v29 = vpop.f32.mrf.mxu0  ;;  %v486_v10 = vadd.f32 %v2168_v49, %v2158_v14  ;;  %v662_v8 = vadd.f32 %v631_v7, %v475_v47 }
  0xf9   : > { %v477_v37 = vpop.f32.mrf.mxu1 }
  0xfa   : > { %v2771_v39 = vpop.f32.mrf.mxu0  ;;  %v478_v36 = vadd.f32 %v477_v37, %v374_v24  ;;  %v665_v18 = vadd.f32 %v2178_v19, %v486_v10 }
  0xfb   : > { %v2171_v34 = vpop.f32.mrf.mxu1 }
  0xfc   : > { %v2773_v42 = vpop.f32.mrf.mxu0  ;;  %v499_v11 = vadd.f32 %v2171_v34, %v2161_v32  ;;  %v663_v52 = vadd.f32 %v634_v31, %v478_v36 }
  0xfd   : > { %v490_v38 = vpop.f32.mrf.mxu1 }
  0xfe   : > { %v2197_v43 = vpop.f32.mrf.mxu0  ;;  %v491_v27 = vadd.f32 %v490_v38, %v387_v15  ;;  %v668_v1 = vadd.f32 %v2181_v45, %v499_v11 }
  0xff   : > { %v2172_v44 = vpop.f32.mrf.mxu1 }
 0x100   : > { %v988_v41 = vpop.f32.mrf.mxu0  ;;  %v502_v35 = vadd.f32 %v2172_v44, %v2162_v60  ;;  %v666_v32 = vadd.f32 %v647_v29, %v491_v27 }
 0x101   : > { %v493_v58 = vpop.f32.mrf.mxu1 }
 0x102   : > { %v2198_v59 = vpop.f32.mrf.mxu0  ;;  %v494_v19 = vadd.f32 %v493_v58, %v2769_v33  ;;  %v669_v31 = vadd.f32 %v2771_v39, %v502_v35  ;;  %v2105_v39 = vld [vmem:[%s2819_s2] ss:$0 sm:$0xff] }
 0x103   : > { %v2187_v61 = vpop.f32.mrf.mxu1 }
 0x104   : > { %v991_v46 = vpop.f32.mrf.mxu0  ;;  %v787_v0 = vadd.f32 %v2187_v61, %v664_v62 }
 0x105   : > { %v754_v48 = vpop.f32.mrf.mxu1 }
 0x106   : > { %v2201_v50 = vpop.f32.mrf.mxu0  ;;  %v785_v22 = vadd.f32 %v754_v48, %v662_v8  ;;  %v1021_v30 = vadd.f32 %v2197_v43, %v787_v0 }
 0x107   : > { %v2188_v51 = vpop.f32.mrf.mxu1 }
 0x108   : > { %v2775_v20 = vpop.f32.mrf.mxu0  ;;  %v788_v6 = vadd.f32 %v2188_v51, %v665_v18  ;;  %v1019_v24 = vadd.f32 %v988_v41, %v785_v22  ;;  %v667_v41 = vadd.f32 %v2773_v42, %v494_v19 }
 0x109   : > { %v757_v26 = vpop.f32.mrf.mxu1 }
 0x10a   : > { %v2777_v2 = vpop.f32.mrf.mxu0  ;;  %v786_v23 = vadd.f32 %v757_v26, %v663_v52  ;;  %v1022_v48 = vadd.f32 %v2198_v59, %v788_v6 }
 0x10b   : > { %v2191_v53 = vpop.f32.mrf.mxu1 }
 0x10c   : > { %v2779_v54 = vpop.f32.mrf.mxu0  ;;  %v791_v34 = vadd.f32 %v2191_v53, %v668_v1  ;;  %v1020_v57 = vadd.f32 %v991_v46, %v786_v23 }
 0x10d   : > { %v770_v21 = vpop.f32.mrf.mxu1 }
 0x10e   : > { %v2217_v5 = vpop.f32.mrf.mxu0  ;;  %v789_v43 = vadd.f32 %v770_v21, %v666_v32  ;;  %v1025_v26 = vadd.f32 %v2201_v50, %v791_v34 }
 0x10f   : > { %v2192_v55 = vpop.f32.mrf.mxu1 }
 0x110   : > { %v1273_v56 = vpop.f32.mrf.mxu0  ;;  %v1023_v59 = vadd.f32 %v2775_v20, %v789_v43 }
 0x111   : > { %v773_v40 = vpop.f32.mrf.mxu1 }
 0x112   : > { %v2218_v16 = vpop.f32.mrf.mxu0 }
 0x113   : > { %v2207_v3 = vpop.f32.mrf.mxu1 }
 0x114   : > { %v1276_v12 = vpop.f32.mrf.mxu0  ;;  %v1183_v49 = vadd.f32 %v2207_v3, %v1021_v30  ;;  %v792_v3 = vadd.f32 %v2192_v55, %v669_v31 }
 0x115   : > { %v1150_v25 = vpop.f32.mrf.mxu1 }
 0x116   : > { %v2781_v63 = vpop.f32.mrf.mxu0  ;;  %v1181_v15 = vadd.f32 %v1150_v25, %v1019_v24  ;;  %v1306_v45 = vadd.f32 %v2217_v5, %v1183_v49  ;;  %v790_v25 = vadd.f32 %v773_v40, %v667_v41  ;;  %v1026_v42 = vadd.f32 %v2777_v2, %v792_v3 }
 0x117   : > { %v2208_v4 = vpop.f32.mrf.mxu1  ;;  %v2287_v3 = vmov 1983009808  }
 0x118   : > { %v2783_v9 = vpop.f32.mrf.mxu0  ;;  %v1184_v60 = vadd.f32 %v2208_v4, %v1022_v48  ;;  %v1304_v47 = vadd.f32 %v1273_v56, %v1181_v15  ;;  %v1024_v20 = vadd.f32 %v2779_v54, %v790_v25 }
 0x119   : > { %v1153_v17 = vpop.f32.mrf.mxu1 }
 0x11a   : > { %v2785_v13 = vpop.f32.mrf.mxu0  ;;  %v1182_v33 = vadd.f32 %v1153_v17, %v1020_v57  ;;  %v1307_v21 = vadd.f32 %v2218_v16, %v1184_v60 }
 0x11b   : > { %v2211_v28 = vpop.f32.mrf.mxu1 }
 0x11c   : > { %v2787_v14 = vpop.f32.mrf.mxu0  ;;  %v1187_v62 = vadd.f32 %v2211_v28, %v1025_v26  ;;  %v1305_v4 = vadd.f32 %v1276_v12, %v1182_v33  ;;  %v1785_v26 = vlaneseq }
 0x11d   : > { %v1166_v7 = vpop.f32.mrf.mxu1 }
 0x11e   : > { %v2237_v37 = vpop.f32.mrf.mxu0  ;;  %v1185_v50 = vadd.f32 %v1166_v7, %v1023_v59  ;;  %v1310_v40 = vadd.f32 %v2781_v63, %v1187_v62 }
 0x11f   : > { %v2212_v61 = vpop.f32.mrf.mxu1 }
 0x120   : > { %v1669_v38 = vpop.f32.mrf.mxu0  ;;  %v1188_v11 = vadd.f32 %v2212_v61, %v1026_v42  ;;  %v1308_v2 = vadd.f32 %v2783_v9, %v1185_v50 }
 0x121   : > { %v1169_v51 = vpop.f32.mrf.mxu1 }
 0x122   : > { %v2238_v44 = vpop.f32.mrf.mxu0  ;;  %v1186_v28 = vadd.f32 %v1169_v51, %v1024_v20  ;;  %v1311_v63 = vadd.f32 %v2785_v13, %v1188_v11 }
 0x123   : > { %v2227_v29 = vpop.f32.mrf.mxu1 }
 0x124   : > { %v1540_v58 = vadd.f32 %v2227_v29, %v1306_v45  ;;  %v1672_v53 = vpop.f32.mrf.mxu0  ;;  %v1309_v9 = vadd.f32 %v2787_v14, %v1186_v28  ;;  %v1783_v29 = vunpack.c.l.s4 %v2287_v3 }
 0x125   : > { %v1507_v46 = vpop.f32.mrf.mxu1 }
 0x126   : > { %v1702_v5 = vadd.f32 %v2237_v37, %v1540_v58  ;;  %v1538_v10 = vadd.f32 %v1507_v46, %v1304_v47  ;;  %v2241_v56 = vpop.f32.mrf.mxu0  ;;  %v1786_v47 = vshrl.u32 %v1785_v26, 7 }
 0x127   : > { %v2228_v55 = vpop.f32.mrf.mxu1 }
 0x128   : > { %v1717_v8 = vadd.f32 %v2105_v39, %v1702_v5  ;;  %v1700_v36 = vadd.f32 %v1669_v38, %v1538_v10  ;;  %v1541_v0 = vadd.f32 %v2228_v55, %v1307_v21  ;;  %v1685_v30 = vpop.f32.mrf.mxu0  ;;  %v1784_v5 = vunpack.c.0.s8 %v1783_v29 }
 0x129   : > { %v1510_v17 = vpop.f32.mrf.mxu1 }
 0x12a   : > { %v1725_v18 = vmax.f32 %v1717_v8, 0.0  ;;  %v1715_v16 = vadd.f32 %v2105_v39, %v1700_v36  ;;  %v1703_v22 = vadd.f32 %v2238_v44, %v1541_v0  ;;  %v1539_v27 = vadd.f32 %v1510_v17, %v1305_v4  ;;  %v2242_v32 = vpop.f32.mrf.mxu0 }
 0x12b   : > { %v2231_v52 = vpop.f32.mrf.mxu1 }
 0x12c   : > { %1734 = vst.msk [vmem:[#allocation2 + $0x10] sm:$0xff] %vm1731_vm7, %v1725_v18  ;;  %v1723_v12 = vmax.f32 %v1715_v16, 0.0  ;;  %v1718_v6 = vadd.f32 %v2105_v39, %v1703_v22  ;;  %v1701_v1 = vadd.f32 %v1672_v53, %v1539_v27  ;;  %v1544_v54 = vadd.f32 %v2231_v52, %v1310_v40  ;;  %v1688_v51 = vpop.f32.mrf.mxu0 }
 0x12d   : > { %v1523_v35 = vpop.f32.mrf.mxu1 }
 0x12e   : > { %1732 = vst.msk [vmem:[#allocation2] sm:$0xff] %vm1731_vm7, %v1723_v12  ;;  %v1726_v7 = vmax.f32 %v1718_v6, 0.0  ;;  %v1716_v24 = vadd.f32 %v2105_v39, %v1701_v1  ;;  %v1706_v23 = vadd.f32 %v2241_v56, %v1544_v54  ;;  %v1542_v49 = vadd.f32 %v1523_v35, %v1308_v2 }
 0x12f   : > { %v2232_v37 = vpop.f32.mrf.mxu1 }
 0x130   : > { %1735 = vst.msk [vmem:[#allocation2 + $0x18] sm:$0xff] %vm1731_vm7, %v1726_v7  ;;  %v1724_v19 = vmax.f32 %v1716_v24, 0.0  ;;  %v1721_v34 = vadd.f32 %v2105_v39, %v1706_v23  ;;  %v1704_v61 = vadd.f32 %v1685_v30, %v1542_v49  ;;  %v1545_v48 = vadd.f32 %v2232_v37, %v1311_v63 }
 0x131   : > { %v1526_v15 = vpop.f32.mrf.mxu1  ;;  %v1787_v63 = vsub.s32 %v1784_v5, %v1786_v47 }
 0x132   : > { %1733 = vst.msk [vmem:[#allocation2 + $0x8] sm:$0xff] %vm1731_vm7, %v1724_v19  ;;  %v1729_v13 = vmax.f32 %v1721_v34, 0.0  ;;  %v1719_v38 = vadd.f32 %v2105_v39, %v1704_v61  ;;  %v1707_v31 = vadd.f32 %v2242_v32, %v1545_v48  ;;  %v1543_v43 = vadd.f32 %v1526_v15, %v1309_v9 }
 0x134   : > { %1738 = vst.msk [vmem:[#allocation2 + $0x30] sm:$0xff] %vm1731_vm7, %v1729_v13  ;;  %v1727_v57 = vmax.f32 %v1719_v38, 0.0  ;;  %v1722_v14 = vadd.f32 %v2105_v39, %v1707_v31  ;;  %v1705_v45 = vadd.f32 %v1688_v51, %v1543_v43 }
 0x135   : > { %v1828_v33 = vld [vmem:[#allocation2 + $0x6] ss:$16 sm:$0x3]  ;;  %v1832_v53 = vld [vmem:[#allocation2 + $0x7] ss:$16 sm:$0x3] }
 0x136   : > { %1736 = vst.msk [vmem:[#allocation2 + $0x20] sm:$0xff] %vm1731_vm7, %v1727_v57  ;;  %v1730_v60 = vmax.f32 %v1722_v14, 0.0  ;;  %v1720_v44 = vadd.f32 %v2105_v39, %v1705_v45  ;;  %v1762_v25 = vld [vmem:[#allocation2 + $0x2] ss:$16 sm:$0x3] }
 0x137   : > { %v1766_v46 = vld [vmem:[#allocation2 + $0x3] ss:$16 sm:$0x3]  ;;  %v1795_v42 = vld [vmem:[#allocation2 + $0x4] ss:$16 sm:$0x3] }
 0x138   : > { %1739 = vst.msk [vmem:[#allocation2 + $0x38] sm:$0xff] %vm1731_vm7, %v1730_v60  ;;  %v1728_v41 = vmax.f32 %v1720_v44, 0.0  ;;  %v1799_v55 = vld [vmem:[#allocation2 + $0x5] ss:$16 sm:$0x3] }
 0x139   : > { %v1836_v10 = vld [vmem:[#allocation2 + $0xe] ss:$16 sm:$0x3]  ;;  %v1840_v39 = vld [vmem:[#allocation2 + $0xf] ss:$16 sm:$0x3] }
 0x13a   : > { %1737 = vst.msk [vmem:[#allocation2 + $0x28] sm:$0xff] %vm1731_vm7, %v1728_v41  ;;  %v1770_v36 = vld [vmem:[#allocation2 + $0xa] ss:$16 sm:$0x3] }
 0x13b   : > { %v1774_v0 = vld [vmem:[#allocation2 + $0xb] ss:$16 sm:$0x3]  ;;  %v1803_v22 = vld [vmem:[#allocation2 + $0xc] ss:$16 sm:$0x3] }
 0x13c   : > { %v1807_v27 = vld [vmem:[#allocation2 + $0xd] ss:$16 sm:$0x3]  ;;  %v1740_v1 = vld [vmem:[#allocation2] ss:$16 sm:$0x3] }
 0x13d   : > { %v1829_v58 = vld [vmem:[#allocation2 + $0x6] ss:$16 sm:$0xc]  ;;  %v1833_v59 = vld [vmem:[#allocation2 + $0x7] ss:$16 sm:$0xc] }
 0x13e   : > { %v1763_v62 = vld [vmem:[#allocation2 + $0x2] ss:$16 sm:$0xc]  ;;  %v1767_v21 = vld [vmem:[#allocation2 + $0x3] ss:$16 sm:$0xc]  ;;  %v1830_v4 = vor.u32 %v1829_v58, %v1828_v33  ;;  %v1834_v8 = vor.u32 %v1833_v59, %v1832_v53 }
 0x13f   : > { %v1796_v50 = vld [vmem:[#allocation2 + $0x4] ss:$16 sm:$0xc]  ;;  %v1800_v56 = vld [vmem:[#allocation2 + $0x5] ss:$16 sm:$0xc]  ;;  %v1764_v18 = vor.u32 %v1763_v62, %v1762_v25  ;;  %v1768_v16 = vor.u32 %v1767_v21, %v1766_v46 }
 0x140   : > { %v1741_v20 = vld [vmem:[#allocation2] ss:$16 sm:$0xc]  ;;  %v1745_v40 = vld [vmem:[#allocation2 + $0x1] ss:$16 sm:$0xc]  ;;  %v1797_v12 = vor.u32 %v1796_v50, %v1795_v42  ;;  %v1801_v6 = vor.u32 %v1800_v56, %v1799_v55  ;;  %v1843_v49 = vmax.f32 %v1830_v4, %v1834_v8 }
 0x141   : > { %v1837_v11 = vld [vmem:[#allocation2 + $0xe] ss:$16 sm:$0xc]  ;;  %v1841_v17 = vld [vmem:[#allocation2 + $0xf] ss:$16 sm:$0xc]  ;;  %v1777_v61 = vmax.f32 %v1764_v18, %v1768_v16  ;;  %v1742_v15 = vor.u32 %v1741_v20, %v1740_v1 }
 0x142   : > { %v1838_v2 = vor.u32 %v1837_v11, %v1836_v10  ;;  %v1842_v28 = vor.u32 %v1841_v17, %v1840_v39  ;;  %v1771_v52 = vld [vmem:[#allocation2 + $0xa] ss:$16 sm:$0xc]  ;;  %v1775_v30 = vld [vmem:[#allocation2 + $0xb] ss:$16 sm:$0xc]  ;;  %v1810_v43 = vmax.f32 %v1797_v12, %v1801_v6 }
 0x143   : > { %v1744_v54 = vld [vmem:[#allocation2 + $0x1] ss:$16 sm:$0x3]  ;;  %v1772_v35 = vor.u32 %v1771_v52, %v1770_v36  ;;  %v1776_v7 = vor.u32 %v1775_v30, %v1774_v0  ;;  %v1804_v24 = vld [vmem:[#allocation2 + $0xc] ss:$16 sm:$0xc] }
 0x144   : > { %v1808_v23 = vld [vmem:[#allocation2 + $0xd] ss:$16 sm:$0xc]  ;;  %v1844_v9 = vmax.f32 %v1838_v2, %v1842_v28  ;;  %v1805_v37 = vor.u32 %v1804_v24, %v1803_v22  ;;  %v1749_v19 = vld [vmem:[#allocation2 + $0x8] ss:$16 sm:$0xc]  ;;  %v1746_v13 = vor.u32 %v1745_v40, %v1744_v54 }
 0x145   : > { %v1809_v32 = vor.u32 %v1808_v23, %v1807_v27  ;;  %v1753_v34 = vld [vmem:[#allocation2 + $0x9] ss:$16 sm:$0xc]  ;;  %v1778_v48 = vmax.f32 %v1772_v35, %v1776_v7  ;;  %v1748_v38 = vld [vmem:[#allocation2 + $0x8] ss:$16 sm:$0x3] }
 0x146   : > { %v1845_v31 = vmax.f32 %v1843_v49, %v1844_v9  ;;  %v1750_v57 = vor.u32 %v1749_v19, %v1748_v38  ;;  %v1752_v14 = vld [vmem:[#allocation2 + $0x9] ss:$16 sm:$0x3]  ;;  %v1755_v3 = vmax.f32 %v1742_v15, %v1746_v13 }
 0x147   : > { %v1811_v51 = vmax.f32 %v1805_v37, %v1809_v32  ;;  %v1779_v45 = vmax.f32 %v1777_v61, %v1778_v48  ;;  %v1754_v60 = vor.u32 %v1753_v34, %v1752_v14 }
 0x148   : > { %v1846_v44 = vpack.c.bf16 %v1845_v31, %v1845_v31 }
 0x149   : > { %v1812_v41 = vmax.f32 %v1810_v43, %v1811_v51  ;;  %v1780_v26 = vpack.c.bf16 %v1779_v45, %v1779_v45  ;;  %v1756_v29 = vmax.f32 %v1750_v57, %v1754_v60 }
 0x14a   : > { %v1854_v47 = vrot.slane %v1846_v44, %v1787_v63 }
 0x14b   : > { %v1788_v33 = vrot.slane %v1780_v26, %v1787_v63  ;;  %v1813_v58 = vpack.c.bf16 %v1812_v41, %v1812_v41  ;;  %v1757_v53 = vmax.f32 %v1755_v3, %v1756_v29 }
 0x14c   : > { %1855 = vrot.lane.b32.xlu1 %v1854_v47, %s2288_s14 }
 0x14d   : > { %1789 = vrot.lane.b32.xlu0 %v1788_v33, %s2289_s18  ;;  %v1758_v59 = vpack.c.bf16 %v1757_v53, %v1757_v53  ;;  %v1821_v25 = vrot.slane %v1813_v58, %v1787_v63 }
 0x14f   : > { %1760 = vst.msk [vmem:[%s168_s17] sm:$0x3] %vm1759_vm8, %v1758_v59 }
 0x151   : > { %1822 = vrot.lane.b32.xlu0 %v1821_v25, %s2290_s19 }
 0x1be   : > { %v1856_v21 = vpop.permute.xlu1 %1855 }
 0x1bf   : > { %v1790_v62 = vpop.permute.xlu0 %1789 }
 0x1c0   : > { %1793 = vst.msk [vmem:[%s168_s17] sm:$0x3] %vm1792_vm9, %v1790_v62 }
 0x1c3   : > { %v1823_v46 = vpop.permute.xlu0 %1822 }
 0x1c4   : > { %1826 = vst.msk [vmem:[%s168_s17] sm:$0x3] %vm1825_vm10, %v1823_v46 }
 0x1c5   : > { %1859 = vst.msk [vmem:[%s168_s17] sm:$0x3] %vm1858_vm11, %v1856_v21 }
 0x1c6 PF: > { %s13_s12 = sadd.s32 1, %s2285_s12  }
 0x1c7   : > { %p10_p4 = scmp.ge.s32.totalorder %s13_s12, 4  }
 0x1c9   :  { %12 = sbr.rel (!%p10_p4) target bundleno = 1 (0x1), region = 87 }

// kernel: simple_cnn_forward.3
= control target key start
LH: loop header
LB: loop body
LE: loop exit
PB: predicated region body
PF: predicated region fallthrough
CT: control target
= control target key end

     0   :  { %s3595_s12 = smov 0   ;;  %s5978_s0 = inlined_call_operand.vmem [shape: f32[2,18,18,1], index: 0, kind: input, shape index: {}]   ;;  %s5979_s1 = inlined_call_operand.vmem [shape: f32[9,1,16], index: 1, kind: input, shape index: {}]   ;;  %s5980_s2 = inlined_call_operand.vmem [shape: f32[1,16], index: 2, kind: input, shape index: {}]   ;;  %s5981_s3 = inlined_call_operand.vmem [shape: bf16[2,8,128], index: 3, kind: output, shape index: {}]  }
   0x1 LB: > { %s3304_s13 = sadd.s32 4294967295, %s3565_s12   ;;  %p3308_p0 = scmp.ge.s32.totalorder %s3565_s12, 1  ;;  %s3565_s12 = sphi %s3595_s12, %s13_s12  }
   0x2   : > { %p137_p1 = scmp.lt.s32.totalorder %s3565_s12, 3 }
   0x4   : > { %p138_p2 = pnand %p3308_p0, %p137_p1 }
   0x6   : > { %141 = sbr.rel (%p138_p2) target bundleno = 928 (0x3a0), region = 32 }
   0xb   : > { %p160_p3 = scmp.lt.s32.totalorder %s3304_s13, 1  ;;  %v3567_v0 = vmov 0   ;;  %vm2617_vm0 = vcmask 130048   ;;  %s3568_s19 = smov 32   ;;  %vm2717_vm1 = vcmask 125952   ;;  %vm2793_vm2 = vcmask 257152  }
   0xc   : > { %3555 = vset.pattern.permute.xlu1 %v3567_v0  ;;  %3554 = vset.pattern.permute.xlu0 %v3567_v0  ;;  %s3569_s20 = smov 16   ;;  %s3570_s21 = smov 48   ;;  %vm2869_vm3 = vcmask 388352   ;;  %vm2945_vm4 = vcmask 519552   ;;  %vm3021_vm5 = vcmask 650752   ;;  %vm3097_vm6 = vcmask 781952  }
   0xd   : > { %s6495_s13 = smov (!%p160_p3, %s3304_s13), 1  ;;  %s3571_s22 = smov 80   ;;  %vm3173_vm7 = vcmask 913152   ;;  %vm3249_vm8 = vcmask 1044352  }
   0xe   : > { %s3537_s14 = smul.u32 432, %s6495_s13  ;;  %s3572_s23 = smov 64  }
   0xf   : > { %s3573_s24 = smov 112   ;;  %s3574_s25 = smov 96  }
  0x10   : > { %s3609_s17 = scalar_lea.vmem %s5978_s0, %s3537_s14  ;;  %s3310_s26 = sshll.u32 %s6495_s13, 2 }
  0x11   : > { %v3612_v1 = vld [vmem:[%s3609_s17 + $0x18] sm:$0xff]  ;;  %v169_v2 = vld [vmem:[%s3609_s17] sm:$0xff]  ;;  %v170_v4 = vld [vmem:[%s3609_s17 + $0x8] sm:$0xff]  ;;  %s168_s29 = scalar_lea.vmem %s5981_s3, %s3310_s26 }
  0x12   : > { %214 = vperm.xlu1 %3555, %v3612_v1   ;;  %204 = vperm.xlu0 %3554, %v169_v2   ;;  %v3617_v3 = vld [vmem:[%s3609_s17 + $0x20] sm:$0xff]  ;;  %v3622_v5 = vld [vmem:[%s3609_s17 + $0x38] sm:$0xff]  ;;  %v3625_v6 = vld [vmem:[%s3609_s17 + $0x30] sm:$0xff] }
  0x13   : > { %v3630_v7 = vld [vmem:[%s3609_s17 + $0x50] sm:$0xff]  ;;  %v3633_v8 = vld [vmem:[%s3609_s17 + $0x48] sm:$0xff]  ;;  %v3641_v10 = vld [vmem:[%s3609_s17 + $0x60] sm:$0xff] }
  0x14   : > { %v3638_v9 = vld [vmem:[%s3609_s17 + $0x68] sm:$0xff]  ;;  %v3646_v11 = vld [vmem:[%s3609_s17 + $0x80] sm:$0xff]  ;;  %v3649_v12 = vld [vmem:[%s3609_s17 + $0x78] sm:$0xff] }
  0x15   : > { %v3654_v13 = vld [vmem:[%s3609_s17 + $0x98] sm:$0xff]  ;;  %v3657_v14 = vld [vmem:[%s3609_s17 + $0x90] sm:$0xff]  ;;  %v3665_v16 = vld [vmem:[%s3609_s17 + $0xa8] sm:$0xff] }
  0x16   : > { %219 = vperm.xlu1 %3555, %v3617_v3   ;;  %209 = vperm.xlu0 %3554, %v170_v4   ;;  %v3662_v15 = vld [vmem:[%s3609_s17 + $0xb0] sm:$0xff]  ;;  %v3670_v17 = vld [vmem:[%s3609_s17 + $0xc8] sm:$0xff]  ;;  %v3673_v18 = vld [vmem:[%s3609_s17 + $0xc0] sm:$0xff] }
  0x17   : > { %v3678_v19 = vld [vmem:[%s3609_s17 + $0xe0] sm:$0xff]  ;;  %v3681_v20 = vld [vmem:[%s3609_s17 + $0xd8] sm:$0xff]  ;;  %v3689_v22 = vld [vmem:[%s3609_s17 + $0xf0] sm:$0xff] }
  0x18   : > { %v3686_v21 = vld [vmem:[%s3609_s17 + $0xf8] sm:$0xff]  ;;  %v3694_v23 = vld [vmem:[%s3609_s17 + $0x110] sm:$0xff]  ;;  %v3697_v24 = vld [vmem:[%s3609_s17 + $0x108] sm:$0xff] }
  0x19   : > { %v3702_v25 = vld [vmem:[%s3609_s17 + $0x128] sm:$0xff]  ;;  %v3705_v26 = vld [vmem:[%s3609_s17 + $0x120] sm:$0xff]  ;;  %v3713_v28 = vld [vmem:[%s3609_s17 + $0x138] sm:$0xff] }
  0x1a   : > { %229 = vperm.xlu1 %3555, %v3622_v5   ;;  %224 = vperm.xlu0 %3554, %v3625_v6   ;;  %v3710_v27 = vld [vmem:[%s3609_s17 + $0x140] sm:$0xff]  ;;  %v3718_v29 = vld [vmem:[%s3609_s17 + $0x158] sm:$0xff]  ;;  %v3721_v30 = vld [vmem:[%s3609_s17 + $0x150] sm:$0xff] }
  0x1b   : > { %v3726_v31 = vld [vmem:[%s3609_s17 + $0x170] sm:$0xff]  ;;  %v3729_v32 = vld [vmem:[%s3609_s17 + $0x168] sm:$0xff]  ;;  %v3739_v36 = vld [vmem:[%s3609_s17 + $0x19] sm:$0xff] }
  0x1c   : > { %v433_v33 = vld [vmem:[%s3609_s17 + $0x9] sm:$0xff]  ;;  %v432_v34 = vld [vmem:[%s3609_s17 + $0x1] sm:$0xff]  ;;  %v3744_v37 = vld [vmem:[%s3609_s17 + $0x39] sm:$0xff] }
  0x1d   : > { %v3736_v35 = vld [vmem:[%s3609_s17 + $0x21] sm:$0xff]  ;;  %v3747_v38 = vld [vmem:[%s3609_s17 + $0x31] sm:$0xff]  ;;  %v3755_v40 = vld [vmem:[%s3609_s17 + $0x49] sm:$0xff] }
  0x1e   : > { %239 = vperm.xlu1 %3555, %v3630_v7   ;;  %234 = vperm.xlu0 %3554, %v3633_v8   ;;  %v3752_v39 = vld [vmem:[%s3609_s17 + $0x51] sm:$0xff]  ;;  %v3760_v41 = vld [vmem:[%s3609_s17 + $0x69] sm:$0xff]  ;;  %v3763_v42 = vld [vmem:[%s3609_s17 + $0x61] sm:$0xff] }
  0x1f   : > { %v3768_v43 = vld [vmem:[%s3609_s17 + $0x81] sm:$0xff]  ;;  %v3771_v44 = vld [vmem:[%s3609_s17 + $0x79] sm:$0xff]  ;;  %v3779_v46 = vld [vmem:[%s3609_s17 + $0x91] sm:$0xff] }
  0x20   : > { %v3776_v45 = vld [vmem:[%s3609_s17 + $0x99] sm:$0xff]  ;;  %v3784_v47 = vld [vmem:[%s3609_s17 + $0xb1] sm:$0xff]  ;;  %v3787_v48 = vld [vmem:[%s3609_s17 + $0xa9] sm:$0xff] }
  0x21   : > { %v3792_v49 = vld [vmem:[%s3609_s17 + $0xc9] sm:$0xff]  ;;  %v3795_v50 = vld [vmem:[%s3609_s17 + $0xc1] sm:$0xff]  ;;  %v3803_v52 = vld [vmem:[%s3609_s17 + $0xd9] sm:$0xff] }
  0x22   : > { %249 = vperm.xlu1 %3555, %v3638_v9   ;;  %244 = vperm.xlu0 %3554, %v3641_v10   ;;  %v3800_v51 = vld [vmem:[%s3609_s17 + $0xe1] sm:$0xff]  ;;  %v3808_v53 = vld [vmem:[%s3609_s17 + $0xf9] sm:$0xff]  ;;  %v3811_v54 = vld [vmem:[%s3609_s17 + $0xf1] sm:$0xff] }
  0x23   : > { %v3816_v55 = vld [vmem:[%s3609_s17 + $0x111] sm:$0xff]  ;;  %v3819_v56 = vld [vmem:[%s3609_s17 + $0x109] sm:$0xff]  ;;  %v3827_v58 = vld [vmem:[%s3609_s17 + $0x121] sm:$0xff] }
  0x24   : > { %6026 = vst [vmem:[#allocation3_spill] sm:$0xff] %v3819_v56  ;;  %v3824_v57 = vld [vmem:[%s3609_s17 + $0x129] sm:$0xff]  ;;  %6028 = vst [vmem:[#allocation5_spill] sm:$0xff] %v3827_v58  ;;  %v3832_v59 = vld [vmem:[%s3609_s17 + $0x141] sm:$0xff] }
  0x25   : > { %6027 = vst [vmem:[#allocation4_spill] sm:$0xff] %v3824_v57  ;;  %6029 = vst [vmem:[#allocation6_spill] sm:$0xff] %v3832_v59  ;;  %v3835_v60 = vld [vmem:[%s3609_s17 + $0x139] sm:$0xff]  ;;  %v3843_v62 = vld [vmem:[%s3609_s17 + $0x151] sm:$0xff] }
  0x26   : > { %259 = vperm.xlu1 %3555, %v3646_v11   ;;  %254 = vperm.xlu0 %3554, %v3649_v12   ;;  %6030 = vst [vmem:[#allocation7_spill] sm:$0xff] %v3835_v60  ;;  %v3840_v61 = vld [vmem:[%s3609_s17 + $0x159] sm:$0xff]  ;;  %6032 = vst [vmem:[#allocation9_spill] sm:$0xff] %v3843_v62  ;;  %v3848_v63 = vld [vmem:[%s3609_s17 + $0x171] sm:$0xff] }
  0x27   : > { %6031 = vst [vmem:[#allocation8_spill] sm:$0xff] %v3840_v61  ;;  %6033 = vst [vmem:[#allocation10_spill] sm:$0xff] %v3848_v63  ;;  %v3851_v0 = vld [vmem:[%s3609_s17 + $0x169] sm:$0xff] }
  0x28   : > { %6034 = vst [vmem:[#allocation11_spill] sm:$0xff] %v3851_v0 }
  0x2a   : > { %269 = vperm.xlu1 %3555, %v3654_v13   ;;  %264 = vperm.xlu0 %3554, %v3657_v14  }
  0x2e   : > { %279 = vperm.xlu1 %3555, %v3662_v15   ;;  %274 = vperm.xlu0 %3554, %v3665_v16  }
  0x32   : > { %289 = vperm.xlu1 %3555, %v3670_v17   ;;  %284 = vperm.xlu0 %3554, %v3673_v18  }
  0x36   : > { %299 = vperm.xlu1 %3555, %v3678_v19   ;;  %294 = vperm.xlu0 %3554, %v3681_v20  }
  0x3a   : > { %309 = vperm.xlu1 %3555, %v3686_v21   ;;  %304 = vperm.xlu0 %3554, %v3689_v22  }
  0x3e   : > { %319 = vperm.xlu1 %3555, %v3694_v23   ;;  %314 = vperm.xlu0 %3554, %v3697_v24  }
  0x42   : > { %329 = vperm.xlu1 %3555, %v3702_v25   ;;  %324 = vperm.xlu0 %3554, %v3705_v26  }
  0x46   : > { %339 = vperm.xlu1 %3555, %v3710_v27   ;;  %334 = vperm.xlu0 %3554, %v3713_v28  }
  0x4a   : > { %349 = vperm.xlu1 %3555, %v3718_v29   ;;  %344 = vperm.xlu0 %3554, %v3721_v30  }
  0x4e   : > { %359 = vperm.xlu1 %3555, %v3726_v31   ;;  %354 = vperm.xlu0 %3554, %v3729_v32  }
  0x52   : > { %473 = vperm.xlu1 %3555, %v433_v33   ;;  %468 = vperm.xlu0 %3554, %v432_v34   ;;  %v697_v33 = vld [vmem:[%s3609_s17 + $0xa] sm:$0xff]  ;;  %v696_v34 = vld [vmem:[%s3609_s17 + $0x2] sm:$0xff] }
  0x56   : > { %483 = vperm.xlu1 %3555, %v3736_v35   ;;  %478 = vperm.xlu0 %3554, %v3739_v36  }
  0x5a   : > { %493 = vperm.xlu1 %3555, %v3744_v37   ;;  %488 = vperm.xlu0 %3554, %v3747_v38  }
  0x5e   : > { %503 = vperm.xlu1 %3555, %v3752_v39   ;;  %498 = vperm.xlu0 %3554, %v3755_v40  }
  0x62   : > { %513 = vperm.xlu1 %3555, %v3760_v41   ;;  %508 = vperm.xlu0 %3554, %v3763_v42  }
  0x66   : > { %523 = vperm.xlu1 %3555, %v3768_v43   ;;  %518 = vperm.xlu0 %3554, %v3771_v44  }
  0x6a   : > { %533 = vperm.xlu1 %3555, %v3776_v45   ;;  %528 = vperm.xlu0 %3554, %v3779_v46  }
  0x6e   : > { %543 = vperm.xlu1 %3555, %v3784_v47   ;;  %538 = vperm.xlu0 %3554, %v3787_v48  }
  0x72   : > { %553 = vperm.xlu1 %3555, %v3792_v49   ;;  %548 = vperm.xlu0 %3554, %v3795_v50  }
  0x76   : > { %563 = vperm.xlu1 %3555, %v3800_v51   ;;  %558 = vperm.xlu0 %3554, %v3803_v52  }
  0x7a   : > { %573 = vperm.xlu1 %3555, %v3808_v53   ;;  %568 = vperm.xlu0 %3554, %v3811_v54  }
  0x7e   : > { %583 = vperm.xlu1 %3555, %v3816_v55   ;;  %578 = vperm.xlu0 %3554, %v3819_v56  }
  0x82   : > { %593 = vperm.xlu1 %3555, %v3824_v57   ;;  %588 = vperm.xlu0 %3554, %v3827_v58   ;;  %v4037_v57 = vld [vmem:[%s3609_s17 + $0x16a] sm:$0xff] }
  0x86   : > { %603 = vperm.xlu1 %3555, %v3832_v59   ;;  %598 = vperm.xlu0 %3554, %v3835_v60   ;;  %v4022_v59 = vld [vmem:[%s3609_s17 + $0x15a] sm:$0xff] }
  0x8a   : > { %613 = vperm.xlu1 %3555, %v3840_v61   ;;  %608 = vperm.xlu0 %3554, %v3843_v62   ;;  %v3866_v61 = vld [vmem:[%s3609_s17 + $0x22] sm:$0xff] }
  0x8b   : > { %6039 = vst [vmem:[#allocation16_spill] sm:$0xff] %v3866_v61 }
  0x8d   : > { %v3853_v2 = vpop.permute.xlu1 %214  ;;  %v3855_v4 = vpop.permute.xlu0 %204 }
  0x8e   : > { %6035 = vst [vmem:[#allocation12_spill] sm:$0xff] %v3853_v2  ;;  %6036 = vst [vmem:[#allocation13_spill] sm:$0xff] %v3855_v4  ;;  %623 = vperm.xlu1 %3555, %v3848_v63   ;;  %618 = vperm.xlu0 %3554, %v3851_v0   ;;  %v3869_v2 = vld [vmem:[%s3609_s17 + $0x1a] sm:$0xff] }
  0x8f   : > { %6040 = vst [vmem:[#allocation17_spill] sm:$0xff] %v3869_v2  ;;  %v4013_v0 = vld [vmem:[%s3609_s17 + $0x13a] sm:$0xff] }
  0x90   : > { %6086 = vst [vmem:[#allocation63_spill] sm:$0xff] %v4013_v0 }
  0x91   : > { %v3861_v60 = vpop.permute.xlu1 %219  ;;  %v3863_v62 = vpop.permute.xlu0 %209 }
  0x92   : > { %6037 = vst [vmem:[#allocation14_spill] sm:$0xff] %v3861_v60  ;;  %6038 = vst [vmem:[#allocation15_spill] sm:$0xff] %v3863_v62  ;;  %737 = vperm.xlu1 %3555, %v697_v33   ;;  %732 = vperm.xlu0 %3554, %v696_v34   ;;  %v3878_v60 = vld [vmem:[%s3609_s17 + $0x3a] sm:$0xff]  ;;  %v3881_v62 = vld [vmem:[%s3609_s17 + $0x32] sm:$0xff] }
  0x93   : > { %6043 = vst [vmem:[#allocation20_spill] sm:$0xff] %v3878_v60  ;;  %6044 = vst [vmem:[#allocation21_spill] sm:$0xff] %v3881_v62 }
  0x95   : > { %v3871_v4 = vpop.permute.xlu1 %229  ;;  %v3873_v63 = vpop.permute.xlu0 %224 }
  0x96   : > { %6041 = vst [vmem:[#allocation18_spill] sm:$0xff] %v3871_v4  ;;  %6042 = vst [vmem:[#allocation19_spill] sm:$0xff] %v3873_v63  ;;  %747 = vperm.xlu1 %3555, %v3866_v61   ;;  %742 = vperm.xlu0 %3554, %v3869_v2   ;;  %v3890_v63 = vld [vmem:[%s3609_s17 + $0x52] sm:$0xff]  ;;  %v3893_v4 = vld [vmem:[%s3609_s17 + $0x4a] sm:$0xff] }
  0x97   : > { %6047 = vst [vmem:[#allocation24_spill] sm:$0xff] %v3890_v63  ;;  %6048 = vst [vmem:[#allocation25_spill] sm:$0xff] %v3893_v4 }
  0x99   : > { %v3883_v33 = vpop.permute.xlu1 %239  ;;  %v3885_v34 = vpop.permute.xlu0 %234 }
  0x9a   : > { %6045 = vst [vmem:[#allocation22_spill] sm:$0xff] %v3883_v33  ;;  %6046 = vst [vmem:[#allocation23_spill] sm:$0xff] %v3885_v34  ;;  %757 = vperm.xlu1 %3555, %v3878_v60   ;;  %752 = vperm.xlu0 %3554, %v3881_v62   ;;  %v3902_v34 = vld [vmem:[%s3609_s17 + $0x6a] sm:$0xff]  ;;  %v3905_v33 = vld [vmem:[%s3609_s17 + $0x62] sm:$0xff] }
  0x9b   : > { %6051 = vst [vmem:[#allocation28_spill] sm:$0xff] %v3902_v34  ;;  %6052 = vst [vmem:[#allocation29_spill] sm:$0xff] %v3905_v33 }
  0x9d   : > { %v3895_v61 = vpop.permute.xlu1 %249  ;;  %v3897_v2 = vpop.permute.xlu0 %244 }
  0x9e   : > { %6049 = vst [vmem:[#allocation26_spill] sm:$0xff] %v3895_v61  ;;  %6050 = vst [vmem:[#allocation27_spill] sm:$0xff] %v3897_v2  ;;  %767 = vperm.xlu1 %3555, %v3890_v63   ;;  %762 = vperm.xlu0 %3554, %v3893_v4   ;;  %v3914_v2 = vld [vmem:[%s3609_s17 + $0x82] sm:$0xff]  ;;  %v3917_v61 = vld [vmem:[%s3609_s17 + $0x7a] sm:$0xff] }
  0x9f   : > { %6055 = vst [vmem:[#allocation32_spill] sm:$0xff] %v3914_v2  ;;  %6056 = vst [vmem:[#allocation33_spill] sm:$0xff] %v3917_v61 }
  0xa1   : > { %v3907_v60 = vpop.permute.xlu1 %259  ;;  %v3909_v62 = vpop.permute.xlu0 %254 }
  0xa2   : > { %6053 = vst [vmem:[#allocation30_spill] sm:$0xff] %v3907_v60  ;;  %6054 = vst [vmem:[#allocation31_spill] sm:$0xff] %v3909_v62  ;;  %777 = vperm.xlu1 %3555, %v3902_v34   ;;  %772 = vperm.xlu0 %3554, %v3905_v33   ;;  %v3926_v62 = vld [vmem:[%s3609_s17 + $0x9a] sm:$0xff]  ;;  %v3929_v60 = vld [vmem:[%s3609_s17 + $0x92] sm:$0xff] }
  0xa3   : > { %6059 = vst [vmem:[#allocation36_spill] sm:$0xff] %v3926_v62  ;;  %6060 = vst [vmem:[#allocation37_spill] sm:$0xff] %v3929_v60 }
  0xa5   : > { %v3919_v63 = vpop.permute.xlu1 %269  ;;  %v3921_v4 = vpop.permute.xlu0 %264 }
  0xa6   : > { %6057 = vst [vmem:[#allocation34_spill] sm:$0xff] %v3919_v63  ;;  %6058 = vst [vmem:[#allocation35_spill] sm:$0xff] %v3921_v4  ;;  %787 = vperm.xlu1 %3555, %v3914_v2   ;;  %782 = vperm.xlu0 %3554, %v3917_v61   ;;  %v3938_v4 = vld [vmem:[%s3609_s17 + $0xb2] sm:$0xff]  ;;  %v3941_v63 = vld [vmem:[%s3609_s17 + $0xaa] sm:$0xff] }
  0xa7   : > { %6063 = vst [vmem:[#allocation40_spill] sm:$0xff] %v3938_v4  ;;  %6064 = vst [vmem:[#allocation41_spill] sm:$0xff] %v3941_v63 }
  0xa9   : > { %v3931_v34 = vpop.permute.xlu1 %279  ;;  %v3933_v33 = vpop.permute.xlu0 %274 }
  0xaa   : > { %6061 = vst [vmem:[#allocation38_spill] sm:$0xff] %v3931_v34  ;;  %6062 = vst [vmem:[#allocation39_spill] sm:$0xff] %v3933_v33  ;;  %797 = vperm.xlu1 %3555, %v3926_v62   ;;  %792 = vperm.xlu0 %3554, %v3929_v60   ;;  %v3950_v33 = vld [vmem:[%s3609_s17 + $0xca] sm:$0xff]  ;;  %v3953_v34 = vld [vmem:[%s3609_s17 + $0xc2] sm:$0xff] }
  0xab   : > { %6067 = vst [vmem:[#allocation44_spill] sm:$0xff] %v3950_v33  ;;  %6068 = vst [vmem:[#allocation45_spill] sm:$0xff] %v3953_v34 }
  0xad   : > { %v3943_v2 = vpop.permute.xlu1 %289  ;;  %v3945_v61 = vpop.permute.xlu0 %284 }
  0xae   : > { %6065 = vst [vmem:[#allocation42_spill] sm:$0xff] %v3943_v2  ;;  %6066 = vst [vmem:[#allocation43_spill] sm:$0xff] %v3945_v61  ;;  %807 = vperm.xlu1 %3555, %v3938_v4   ;;  %802 = vperm.xlu0 %3554, %v3941_v63   ;;  %v3962_v61 = vld [vmem:[%s3609_s17 + $0xe2] sm:$0xff]  ;;  %v3965_v2 = vld [vmem:[%s3609_s17 + $0xda] sm:$0xff] }
  0xaf   : > { %6071 = vst [vmem:[#allocation48_spill] sm:$0xff] %v3962_v61  ;;  %6072 = vst [vmem:[#allocation49_spill] sm:$0xff] %v3965_v2 }
  0xb1   : > { %v3955_v62 = vpop.permute.xlu1 %299  ;;  %v3957_v60 = vpop.permute.xlu0 %294 }
  0xb2   : > { %6069 = vst [vmem:[#allocation46_spill] sm:$0xff] %v3955_v62  ;;  %6070 = vst [vmem:[#allocation47_spill] sm:$0xff] %v3957_v60  ;;  %817 = vperm.xlu1 %3555, %v3950_v33   ;;  %812 = vperm.xlu0 %3554, %v3953_v34   ;;  %v3974_v60 = vld [vmem:[%s3609_s17 + $0xfa] sm:$0xff]  ;;  %v3977_v62 = vld [vmem:[%s3609_s17 + $0xf2] sm:$0xff] }
  0xb3   : > { %6075 = vst [vmem:[#allocation52_spill] sm:$0xff] %v3974_v60  ;;  %6076 = vst [vmem:[#allocation53_spill] sm:$0xff] %v3977_v62 }
  0xb5   : > { %v3967_v4 = vpop.permute.xlu1 %309  ;;  %v3969_v63 = vpop.permute.xlu0 %304 }
  0xb6   : > { %6073 = vst [vmem:[#allocation50_spill] sm:$0xff] %v3967_v4  ;;  %6074 = vst [vmem:[#allocation51_spill] sm:$0xff] %v3969_v63  ;;  %827 = vperm.xlu1 %3555, %v3962_v61   ;;  %822 = vperm.xlu0 %3554, %v3965_v2   ;;  %v3986_v63 = vld [vmem:[%s3609_s17 + $0x112] sm:$0xff]  ;;  %v3989_v4 = vld [vmem:[%s3609_s17 + $0x10a] sm:$0xff] }
  0xb7   : > { %6079 = vst [vmem:[#allocation56_spill] sm:$0xff] %v3986_v63  ;;  %6080 = vst [vmem:[#allocation57_spill] sm:$0xff] %v3989_v4 }
  0xb9   : > { %v3979_v33 = vpop.permute.xlu1 %319  ;;  %v3981_v34 = vpop.permute.xlu0 %314 }
  0xba   : > { %6077 = vst [vmem:[#allocation54_spill] sm:$0xff] %v3979_v33  ;;  %6078 = vst [vmem:[#allocation55_spill] sm:$0xff] %v3981_v34  ;;  %837 = vperm.xlu1 %3555, %v3974_v60   ;;  %832 = vperm.xlu0 %3554, %v3977_v62   ;;  %v3998_v34 = vld [vmem:[%s3609_s17 + $0x12a] sm:$0xff]  ;;  %v4001_v33 = vld [vmem:[%s3609_s17 + $0x122] sm:$0xff] }
  0xbb   : > { %6082 = vst [vmem:[#allocation59_spill] sm:$0xff] %v3998_v34  ;;  %6083 = vst [vmem:[#allocation60_spill] sm:$0xff] %v4001_v33 }
  0xbd   : > { %v3991_v61 = vpop.permute.xlu1 %329  ;;  %v3993_v2 = vpop.permute.xlu0 %324 }
  0xbe   : > { %6081 = vst [vmem:[#allocation58_spill] sm:$0xff] %v3993_v2  ;;  %847 = vperm.xlu1 %3555, %v3986_v63   ;;  %842 = vperm.xlu0 %3554, %v3989_v4   ;;  %v4010_v2 = vld [vmem:[%s3609_s17 + $0x142] sm:$0xff] }
  0xbf   : > { %6085 = vst [vmem:[#allocation62_spill] sm:$0xff] %v4010_v2 }
  0xc1   : > { %v4003_v60 = vpop.permute.xlu1 %339  ;;  %v4005_v62 = vpop.permute.xlu0 %334 }
  0xc2   : > { %6084 = vst [vmem:[#allocation61_spill] sm:$0xff] %v4005_v62  ;;  %857 = vperm.xlu1 %3555, %v3998_v34   ;;  %852 = vperm.xlu0 %3554, %v4001_v33   ;;  %v4025_v62 = vld [vmem:[%s3609_s17 + $0x152] sm:$0xff] }
  0xc3   : > { %6088 = vst [vmem:[#allocation65_spill] sm:$0xff] %v4025_v62  ;;  %v4034_v33 = vld [vmem:[%s3609_s17 + $0x172] sm:$0xff] }
  0xc5   : > { %v4015_v63 = vpop.permute.xlu1 %349  ;;  %v4017_v4 = vpop.permute.xlu0 %344 }
  0xc6   : > { %6087 = vst [vmem:[#allocation64_spill] sm:$0xff] %v4017_v4  ;;  %867 = vperm.xlu1 %3555, %v4010_v2   ;;  %862 = vperm.xlu0 %3554, %v4013_v0  }
  0xc9   : > { %v4027_v58 = vpop.permute.xlu1 %359  ;;  %v4029_v34 = vpop.permute.xlu0 %354 }
  0xca   : > { %6089 = vst [vmem:[#allocation66_spill] sm:$0xff] %v4029_v34  ;;  %877 = vperm.xlu1 %3555, %v4022_v59   ;;  %872 = vperm.xlu0 %3554, %v4025_v62  }
  0xcd   : > { %v4039_v4 = vpop.permute.xlu1 %473  ;;  %v4041_v2 = vpop.permute.xlu0 %468 }
  0xce   : > { %6090 = vst [vmem:[#allocation67_spill] sm:$0xff] %v4039_v4  ;;  %6091 = vst [vmem:[#allocation68_spill] sm:$0xff] %v4041_v2  ;;  %887 = vperm.xlu1 %3555, %v4034_v33   ;;  %882 = vperm.xlu0 %3554, %v4037_v57  }
  0xd1   : > { %v4045_v0 = vpop.permute.xlu1 %483  ;;  %v4047_v56 = vpop.permute.xlu0 %478 }
  0xd2   : > { %6092 = vst [vmem:[#allocation69_spill] sm:$0xff] %v4047_v56  ;;  %1002 = vperm.xlu1 %3555, %v3617_v3   ;;  %997 = vperm.xlu0 %3554, %v3612_v1  }
  0xd5   : > { %v4051_v34 = vpop.permute.xlu1 %493  ;;  %v4053_v62 = vpop.permute.xlu0 %488 }
  0xd6   : > { %1012 = vperm.xlu1 %3555, %v3622_v5   ;;  %1007 = vperm.xlu0 %3554, %v3625_v6  }
  0xd9   : > { %v4057_v2 = vpop.permute.xlu1 %503  ;;  %v4059_v4 = vpop.permute.xlu0 %498 }
  0xda   : > { %1022 = vperm.xlu1 %3555, %v3630_v7   ;;  %1017 = vperm.xlu0 %3554, %v3633_v8  }
  0xdd   : > { %v4063_v56 = vpop.permute.xlu1 %513  ;;  %v4065_v3 = vpop.permute.xlu0 %508 }
  0xde   : > { %1032 = vperm.xlu1 %3555, %v3638_v9   ;;  %1027 = vperm.xlu0 %3554, %v3641_v10  }
  0xe1   : > { %v4069_v1 = vpop.permute.xlu1 %523  ;;  %v4071_v5 = vpop.permute.xlu0 %518 }
  0xe2   : > { %1042 = vperm.xlu1 %3555, %v3646_v11   ;;  %1037 = vperm.xlu0 %3554, %v3649_v12  }
  0xe5   : > { %v4075_v6 = vpop.permute.xlu1 %533  ;;  %v4077_v7 = vpop.permute.xlu0 %528 }
  0xe6   : > { %1052 = vperm.xlu1 %3555, %v3654_v13   ;;  %1047 = vperm.xlu0 %3554, %v3657_v14  }
  0xe9   : > { %v4081_v8 = vpop.permute.xlu1 %543  ;;  %v4083_v9 = vpop.permute.xlu0 %538 }
  0xea   : > { %1062 = vperm.xlu1 %3555, %v3662_v15   ;;  %1057 = vperm.xlu0 %3554, %v3665_v16  }
  0xed   : > { %v4087_v10 = vpop.permute.xlu1 %553  ;;  %v4089_v11 = vpop.permute.xlu0 %548 }
  0xee   : > { %1072 = vperm.xlu1 %3555, %v3670_v17   ;;  %1067 = vperm.xlu0 %3554, %v3673_v18   ;;  %v4114_v18 = vld [vmem:[%s5979_s1] ss:$0 sm:$0xff] }
  0xf1   : > { %v4093_v12 = vpop.permute.xlu1 %563  ;;  %v4095_v13 = vpop.permute.xlu0 %558 }
  0xf2   : > { %1082 = vperm.xlu1 %3555, %v3678_v19   ;;  %1077 = vperm.xlu0 %3554, %v3681_v20   ;;  %v4119_v19 = vld [vmem:[%s5979_s1 + $0x1] ss:$0 sm:$0xff] }
  0xf5   : > { %v4099_v14 = vpop.permute.xlu1 %573  ;;  %v4101_v15 = vpop.permute.xlu0 %568 }
  0xf6   : > { %6093 = vst [vmem:[#allocation70_spill] sm:$0xff] %v4099_v14  ;;  %6094 = vst [vmem:[#allocation71_spill] sm:$0xff] %v4101_v15  ;;  %1092 = vperm.xlu1 %3555, %v3686_v21   ;;  %1087 = vperm.xlu0 %3554, %v3689_v22   ;;  %v393_v22 = vmul.f32 %v4114_v18, %v3991_v61  ;;  %v395_v15 = vmul.f32 %v4114_v18, %v4003_v60 }
  0xf9   : > { %v4105_v16 = vpop.permute.xlu1 %583  ;;  %v4107_v17 = vpop.permute.xlu0 %578 }
  0xfa   : > { %6095 = vst [vmem:[#allocation72_spill] sm:$0xff] %v4105_v16  ;;  %6096 = vst [vmem:[#allocation73_spill] sm:$0xff] %v4107_v17  ;;  %1102 = vperm.xlu1 %3555, %v3694_v23   ;;  %1097 = vperm.xlu0 %3554, %v3697_v24  }
  0xfd   : > { %v594_v20 = vpop.permute.xlu1 %593  ;;  %v4121_v21 = vpop.permute.xlu0 %588 }
  0xfe   : > { %v657_v23 = vmul.f32 %v4119_v19, %v594_v20  ;;  %1112 = vperm.xlu1 %3555, %v3702_v25   ;;  %1107 = vperm.xlu0 %3554, %v3705_v26   ;;  %v397_v20 = vmul.f32 %v4114_v18, %v4015_v63  ;;  %v4156_v63 = vld [vmem:[%s3609_s17 + $0x188] sm:$0xff] }
 0x100   : > { %v4128_v24 = vadd.f32 %v657_v23, %v393_v22 }
 0x101   : > { %v604_v17 = vpop.permute.xlu1 %603  ;;  %v4130_v16 = vpop.permute.xlu0 %598 }
 0x102   : > { %v659_v14 = vmul.f32 %v4119_v19, %v604_v17  ;;  %1122 = vperm.xlu1 %3555, %v3710_v27   ;;  %1117 = vperm.xlu0 %3554, %v3713_v28   ;;  %v399_v28 = vmul.f32 %v4114_v18, %v4027_v58 }
 0x104   : > { %v4137_v61 = vadd.f32 %v659_v14, %v395_v15  ;;  %v4159_v15 = vld [vmem:[%s3609_s17 + $0x180] sm:$0xff] }
 0x105   : > { %v614_v25 = vpop.permute.xlu1 %613  ;;  %v4139_v26 = vpop.permute.xlu0 %608 }
 0x106   : > { %v661_v22 = vmul.f32 %v4119_v19, %v614_v25  ;;  %1132 = vperm.xlu1 %3555, %v3718_v29   ;;  %1127 = vperm.xlu0 %3554, %v3721_v30  }
 0x108   : > { %v4146_v60 = vadd.f32 %v661_v22, %v397_v20 }
 0x109   : > { %v624_v27 = vpop.permute.xlu1 %623  ;;  %v4148_v17 = vpop.permute.xlu0 %618 }
 0x10a   : > { %v663_v14 = vmul.f32 %v4119_v19, %v624_v27  ;;  %1142 = vperm.xlu1 %3555, %v3726_v31   ;;  %1137 = vperm.xlu0 %3554, %v3729_v32  }
 0x10c   : > { %v4161_v29 = vadd.f32 %v663_v14, %v399_v28  ;;  %v6121_v14 = vld [vmem:[#allocation4_spill] sm:$0xff] }
 0x10d   : > { %v4163_v30 = vpop.permute.xlu1 %737  ;;  %v4165_v23 = vpop.permute.xlu0 %732 }
 0x10e   : > { %1152 = vperm.xlu1 %3555, %v4156_v63   ;;  %1147 = vperm.xlu0 %3554, %v4159_v15  }
 0x111   : > { %v4169_v58 = vpop.permute.xlu1 %747  ;;  %v4171_v25 = vpop.permute.xlu0 %742 }
 0x112   : > { %6097 = vst [vmem:[#allocation74_spill] sm:$0xff] %v4169_v58  ;;  %6098 = vst [vmem:[#allocation75_spill] sm:$0xff] %v4171_v25  ;;  %1266 = vperm.xlu1 %3555, %v3736_v35   ;;  %1261 = vperm.xlu0 %3554, %v3739_v36   ;;  %v6300_v25 = vld [vmem:[#allocation69_spill] sm:$0xff] }
 0x113   : > { %v3510_v58 = vld [vmem:[%s3609_s17 + $0x152] sm:$0xff] }
 0x115   : > { %v4175_v31 = vpop.permute.xlu1 %757  ;;  %v4177_v32 = vpop.permute.xlu0 %752 }
 0x116   : > { %6099 = vst [vmem:[#allocation76_spill] sm:$0xff] %v4175_v31  ;;  %6100 = vst [vmem:[#allocation77_spill] sm:$0xff] %v4177_v32  ;;  %1276 = vperm.xlu1 %3555, %v3744_v37   ;;  %1271 = vperm.xlu0 %3554, %v3747_v38   ;;  %v6294_v32 = vld [vmem:[#allocation51_spill] sm:$0xff] }
 0x117   : > { %v4741_v31 = vmul.f32 %v4114_v18, %v6294_v32  ;;  %v634_v32 = vmul.f32 %v4119_v19, %v6300_v25  ;;  %v637_v25 = vmul.f32 %v4119_v19, %v4051_v34 }
 0x119   : > { %v4181_v20 = vpop.permute.xlu1 %767  ;;  %v4183_v22 = vpop.permute.xlu0 %762 }
 0x11a   : > { %6101 = vst [vmem:[#allocation78_spill] sm:$0xff] %v4181_v20  ;;  %6102 = vst [vmem:[#allocation79_spill] sm:$0xff] %v4183_v22  ;;  %1286 = vperm.xlu1 %3555, %v3752_v39   ;;  %1281 = vperm.xlu0 %3554, %v3755_v40   ;;  %v6293_v20 = vld [vmem:[#allocation50_spill] sm:$0xff] }
 0x11d   : > { %v4187_v27 = vpop.permute.xlu1 %777  ;;  %v4189_v35 = vpop.permute.xlu0 %772 }
 0x11e   : > { %6103 = vst [vmem:[#allocation80_spill] sm:$0xff] %v4187_v27  ;;  %6104 = vst [vmem:[#allocation81_spill] sm:$0xff] %v4189_v35  ;;  %1296 = vperm.xlu1 %3555, %v3760_v41   ;;  %1291 = vperm.xlu0 %3554, %v3763_v42   ;;  %v6289_v35 = vld [vmem:[#allocation47_spill] sm:$0xff]  ;;  %v6290_v27 = vld [vmem:[#allocation68_spill] sm:$0xff] }
 0x121   : > { %v4193_v36 = vpop.permute.xlu1 %787  ;;  %v4195_v37 = vpop.permute.xlu0 %782 }
 0x122   : > { %6105 = vst [vmem:[#allocation82_spill] sm:$0xff] %v4193_v36  ;;  %6106 = vst [vmem:[#allocation83_spill] sm:$0xff] %v4195_v37  ;;  %1306 = vperm.xlu1 %3555, %v3768_v43   ;;  %1301 = vperm.xlu0 %3554, %v3771_v44   ;;  %v6287_v37 = vld [vmem:[#allocation43_spill] sm:$0xff]  ;;  %v6288_v36 = vld [vmem:[#allocation46_spill] sm:$0xff] }
 0x125   : > { %v4199_v38 = vpop.permute.xlu1 %797  ;;  %v4201_v39 = vpop.permute.xlu0 %792 }
 0x126   : > { %6107 = vst [vmem:[#allocation84_spill] sm:$0xff] %v4199_v38  ;;  %6108 = vst [vmem:[#allocation85_spill] sm:$0xff] %v4201_v39  ;;  %1316 = vperm.xlu1 %3555, %v3776_v45   ;;  %1311 = vperm.xlu0 %3554, %v3779_v46  }
 0x129   : > { %v4205_v40 = vpop.permute.xlu1 %807  ;;  %v4207_v41 = vpop.permute.xlu0 %802 }
 0x12a   : > { %6109 = vst [vmem:[#allocation86_spill] sm:$0xff] %v4205_v40  ;;  %6110 = vst [vmem:[#allocation87_spill] sm:$0xff] %v4207_v41  ;;  %1326 = vperm.xlu1 %3555, %v3784_v47   ;;  %1321 = vperm.xlu0 %3554, %v3787_v48   ;;  %v3505_v40 = vld [vmem:[%s3609_s17 + $0x112] sm:$0xff] }
 0x12d   : > { %v4211_v42 = vpop.permute.xlu1 %817  ;;  %v4213_v43 = vpop.permute.xlu0 %812 }
 0x12e   : > { %6111 = vst [vmem:[#allocation88_spill] sm:$0xff] %v4211_v42  ;;  %6112 = vst [vmem:[#allocation89_spill] sm:$0xff] %v4213_v43  ;;  %1336 = vperm.xlu1 %3555, %v3792_v49   ;;  %1331 = vperm.xlu0 %3554, %v3795_v50   ;;  %v6119_v50 = vld [vmem:[#allocation3_spill] sm:$0xff]  ;;  %v6277_v43 = vld [vmem:[#allocation26_spill] sm:$0xff] }
 0x131   : > { %v4217_v44 = vpop.permute.xlu1 %827  ;;  %v4219_v45 = vpop.permute.xlu0 %822 }
 0x132   : > { %6113 = vst [vmem:[#allocation90_spill] sm:$0xff] %v4217_v44  ;;  %6114 = vst [vmem:[#allocation91_spill] sm:$0xff] %v4219_v45  ;;  %1346 = vperm.xlu1 %3555, %v3800_v51   ;;  %1341 = vperm.xlu0 %3554, %v3803_v52   ;;  %v4238_v51 = vld [vmem:[%s5979_s1 + $0x2] ss:$0 sm:$0xff] }
 0x133   : > { %v6276_v44 = vld [vmem:[#allocation23_spill] sm:$0xff] }
 0x135   : > { %v4223_v46 = vpop.permute.xlu1 %837  ;;  %v4225_v47 = vpop.permute.xlu0 %832 }
 0x136   : > { %6115 = vst [vmem:[#allocation92_spill] sm:$0xff] %v4223_v46  ;;  %6116 = vst [vmem:[#allocation93_spill] sm:$0xff] %v4225_v47  ;;  %1356 = vperm.xlu1 %3555, %v3808_v53   ;;  %1351 = vperm.xlu0 %3554, %v3811_v54   ;;  %v6122_v54 = vld [vmem:[#allocation5_spill] sm:$0xff]  ;;  %v6124_v47 = vld [vmem:[#allocation6_spill] sm:$0xff] }
 0x137   : > { %v6125_v46 = vld [vmem:[#allocation7_spill] sm:$0xff] }
 0x139   : > { %v4229_v48 = vpop.permute.xlu1 %847  ;;  %v4231_v49 = vpop.permute.xlu0 %842 }
 0x13a   : > { %6117 = vst [vmem:[#allocation94_spill] sm:$0xff] %v4229_v48  ;;  %6118 = vst [vmem:[#allocation95_spill] sm:$0xff] %v4231_v49  ;;  %1366 = vperm.xlu1 %3555, %v3816_v55   ;;  %1361 = vperm.xlu0 %3554, %v6119_v50  }
 0x13d   : > { %v858_v52 = vpop.permute.xlu1 %857  ;;  %v4240_v28 = vpop.permute.xlu0 %852 }
 0x13e   : > { %6120 = vst [vmem:[#allocation3_spill] sm:$0xff] %v4240_v28  ;;  %v921_v53 = vmul.f32 %v4238_v51, %v858_v52  ;;  %1376 = vperm.xlu1 %3555, %v6121_v14   ;;  %1371 = vperm.xlu0 %3554, %v6122_v54   ;;  %v6128_v54 = vld [vmem:[#allocation9_spill] sm:$0xff] }
 0x140   : > { %v4246_v49 = vadd.f32 %v921_v53, %v4128_v24  ;;  %v6127_v53 = vld [vmem:[#allocation8_spill] sm:$0xff] }
 0x141   : > { %v868_v55 = vpop.permute.xlu1 %867  ;;  %v4248_v48 = vpop.permute.xlu0 %862 }
 0x142   : > { %6123 = vst [vmem:[#allocation4_spill] sm:$0xff] %v4248_v48  ;;  %v923_v50 = vmul.f32 %v4238_v51, %v868_v55  ;;  %1386 = vperm.xlu1 %3555, %v6124_v47   ;;  %1381 = vperm.xlu0 %3554, %v6125_v46   ;;  %v6130_v47 = vld [vmem:[#allocation10_spill] sm:$0xff] }
 0x144   : > { %v4254_v52 = vadd.f32 %v923_v50, %v4137_v61  ;;  %v6131_v61 = vld [vmem:[#allocation11_spill] sm:$0xff]  ;;  %v3381_v50 = vld [vmem:[%s3609_s17 + $0x189] sm:$0xff] }
 0x145   : > { %v878_v14 = vpop.permute.xlu1 %877  ;;  %v4256_v28 = vpop.permute.xlu0 %872 }
 0x146   : > { %6126 = vst [vmem:[#allocation5_spill] sm:$0xff] %v4256_v28  ;;  %v925_v24 = vmul.f32 %v4238_v51, %v878_v14  ;;  %1396 = vperm.xlu1 %3555, %v6127_v53   ;;  %1391 = vperm.xlu0 %3554, %v6128_v54   ;;  %v3380_v28 = vld [vmem:[%s3609_s17 + $0x181] sm:$0xff] }
 0x148   : > { %v4262_v48 = vadd.f32 %v925_v24, %v4146_v60 }
 0x149   : > { %v888_v55 = vpop.permute.xlu1 %887  ;;  %v4264_v45 = vpop.permute.xlu0 %882 }
 0x14a   : > { %6129 = vst [vmem:[#allocation6_spill] sm:$0xff] %v4264_v45  ;;  %v927_v46 = vmul.f32 %v4238_v51, %v888_v55  ;;  %1406 = vperm.xlu1 %3555, %v6130_v47   ;;  %1401 = vperm.xlu0 %3554, %v6131_v61   ;;  %v6136_v55 = vld [vmem:[#allocation16_spill] sm:$0xff]  ;;  %v6137_v47 = vld [vmem:[#allocation17_spill] sm:$0xff] }
 0x14c   : > { %v4272_v14 = vadd.f32 %v927_v46, %v4161_v29  ;;  %v6140_v29 = vld [vmem:[#allocation20_spill] sm:$0xff]  ;;  %v6141_v46 = vld [vmem:[#allocation21_spill] sm:$0xff] }
 0x14d   : > { %v4274_v53 = vpop.permute.xlu1 %1002  ;;  %v4276_v54 = vpop.permute.xlu0 %997 }
 0x14e   : > { %6132 = vst [vmem:[#allocation7_spill] sm:$0xff] %v4274_v53  ;;  %6133 = vst [vmem:[#allocation8_spill] sm:$0xff] %v4276_v54  ;;  %1416 = vperm.xlu1 %3555, %v3381_v50   ;;  %1411 = vperm.xlu0 %3554, %v3380_v28   ;;  %v6144_v28 = vld [vmem:[#allocation24_spill] sm:$0xff]  ;;  %v6184_v54 = vld [vmem:[#allocation63_spill] sm:$0xff] }
 0x151   : > { %v4278_v60 = vpop.permute.xlu1 %1012  ;;  %v4280_v24 = vpop.permute.xlu0 %1007 }
 0x152   : > { %6134 = vst [vmem:[#allocation9_spill] sm:$0xff] %v4278_v60  ;;  %6135 = vst [vmem:[#allocation10_spill] sm:$0xff] %v4280_v24  ;;  %1530 = vperm.xlu1 %3555, %v6136_v55   ;;  %1525 = vperm.xlu0 %3554, %v6137_v47   ;;  %v6145_v60 = vld [vmem:[#allocation25_spill] sm:$0xff]  ;;  %v6148_v47 = vld [vmem:[#allocation28_spill] sm:$0xff] }
 0x155   : > { %v4284_v61 = vpop.permute.xlu1 %1022  ;;  %v4286_v45 = vpop.permute.xlu0 %1017 }
 0x156   : > { %6138 = vst [vmem:[#allocation11_spill] sm:$0xff] %v4284_v61  ;;  %6139 = vst [vmem:[#allocation16_spill] sm:$0xff] %v4286_v45  ;;  %1540 = vperm.xlu1 %3555, %v6140_v29   ;;  %1535 = vperm.xlu0 %3554, %v6141_v46   ;;  %v6149_v61 = vld [vmem:[#allocation29_spill] sm:$0xff]  ;;  %v6152_v46 = vld [vmem:[#allocation32_spill] sm:$0xff] }
 0x159   : > { %v4290_v53 = vpop.permute.xlu1 %1032  ;;  %v4292_v50 = vpop.permute.xlu0 %1027 }
 0x15a   : > { %6142 = vst [vmem:[#allocation17_spill] sm:$0xff] %v4290_v53  ;;  %6143 = vst [vmem:[#allocation20_spill] sm:$0xff] %v4292_v50  ;;  %1550 = vperm.xlu1 %3555, %v6144_v28   ;;  %1545 = vperm.xlu0 %3554, %v6145_v60   ;;  %v6153_v53 = vld [vmem:[#allocation33_spill] sm:$0xff]  ;;  %v6156_v60 = vld [vmem:[#allocation36_spill] sm:$0xff] }
 0x15d   : > { %v4296_v24 = vpop.permute.xlu1 %1042  ;;  %v4298_v55 = vpop.permute.xlu0 %1037 }
 0x15e   : > { %6146 = vst [vmem:[#allocation21_spill] sm:$0xff] %v4296_v24  ;;  %6147 = vst [vmem:[#allocation24_spill] sm:$0xff] %v4298_v55  ;;  %1560 = vperm.xlu1 %3555, %v6148_v47   ;;  %1555 = vperm.xlu0 %3554, %v6149_v61   ;;  %v6157_v24 = vld [vmem:[#allocation37_spill] sm:$0xff]  ;;  %v6160_v61 = vld [vmem:[#allocation40_spill] sm:$0xff] }
 0x161   : > { %v4302_v45 = vpop.permute.xlu1 %1052  ;;  %v4304_v29 = vpop.permute.xlu0 %1047 }
 0x162   : > { %6150 = vst [vmem:[#allocation25_spill] sm:$0xff] %v4302_v45  ;;  %6151 = vst [vmem:[#allocation28_spill] sm:$0xff] %v4304_v29  ;;  %1570 = vperm.xlu1 %3555, %v6152_v46   ;;  %1565 = vperm.xlu0 %3554, %v6153_v53   ;;  %v6161_v45 = vld [vmem:[#allocation41_spill] sm:$0xff]  ;;  %v6164_v53 = vld [vmem:[#allocation44_spill] sm:$0xff] }
 0x165   : > { %v4308_v50 = vpop.permute.xlu1 %1062  ;;  %v4310_v28 = vpop.permute.xlu0 %1057 }
 0x166   : > { %6154 = vst [vmem:[#allocation29_spill] sm:$0xff] %v4308_v50  ;;  %6155 = vst [vmem:[#allocation32_spill] sm:$0xff] %v4310_v28  ;;  %1580 = vperm.xlu1 %3555, %v6156_v60   ;;  %1575 = vperm.xlu0 %3554, %v6157_v24   ;;  %v6165_v50 = vld [vmem:[#allocation45_spill] sm:$0xff]  ;;  %v6168_v24 = vld [vmem:[#allocation48_spill] sm:$0xff] }
 0x169   : > { %v4314_v55 = vpop.permute.xlu1 %1072  ;;  %v4316_v47 = vpop.permute.xlu0 %1067 }
 0x16a   : > { %6158 = vst [vmem:[#allocation33_spill] sm:$0xff] %v4314_v55  ;;  %6159 = vst [vmem:[#allocation36_spill] sm:$0xff] %v4316_v47  ;;  %1590 = vperm.xlu1 %3555, %v6160_v61   ;;  %1585 = vperm.xlu0 %3554, %v6161_v45   ;;  %v6169_v55 = vld [vmem:[#allocation49_spill] sm:$0xff]  ;;  %v6172_v45 = vld [vmem:[#allocation52_spill] sm:$0xff] }
 0x16d   : > { %v4320_v29 = vpop.permute.xlu1 %1082  ;;  %v4322_v46 = vpop.permute.xlu0 %1077 }
 0x16e   : > { %6162 = vst [vmem:[#allocation37_spill] sm:$0xff] %v4320_v29  ;;  %6163 = vst [vmem:[#allocation40_spill] sm:$0xff] %v4322_v46  ;;  %1600 = vperm.xlu1 %3555, %v6164_v53   ;;  %1595 = vperm.xlu0 %3554, %v6165_v50   ;;  %v6173_v29 = vld [vmem:[#allocation53_spill] sm:$0xff]  ;;  %v6176_v50 = vld [vmem:[#allocation56_spill] sm:$0xff] }
 0x171   : > { %v4326_v28 = vpop.permute.xlu1 %1092  ;;  %v4328_v60 = vpop.permute.xlu0 %1087 }
 0x172   : > { %6166 = vst [vmem:[#allocation41_spill] sm:$0xff] %v4326_v28  ;;  %6167 = vst [vmem:[#allocation44_spill] sm:$0xff] %v4328_v60  ;;  %1610 = vperm.xlu1 %3555, %v6168_v24   ;;  %1605 = vperm.xlu0 %3554, %v6169_v55   ;;  %v6177_v28 = vld [vmem:[#allocation57_spill] sm:$0xff]  ;;  %v4347_v55 = vld [vmem:[%s5979_s1 + $0x3] ss:$0 sm:$0xff] }
 0x173   : > { %6178 = vst [vmem:[#allocation53_spill] sm:$0xff] %v4347_v55  ;;  %v6183_v60 = vld [vmem:[#allocation62_spill] sm:$0xff] }
 0x175   : > { %v4332_v47 = vpop.permute.xlu1 %1102  ;;  %v4334_v61 = vpop.permute.xlu0 %1097 }
 0x176   : > { %6170 = vst [vmem:[#allocation45_spill] sm:$0xff] %v4332_v47  ;;  %6171 = vst [vmem:[#allocation48_spill] sm:$0xff] %v4334_v61  ;;  %1620 = vperm.xlu1 %3555, %v6172_v45   ;;  %1615 = vperm.xlu0 %3554, %v6173_v29   ;;  %v6180_v61 = vld [vmem:[#allocation59_spill] sm:$0xff]  ;;  %v6181_v29 = vld [vmem:[#allocation60_spill] sm:$0xff] }
 0x179   : > { %v4338_v46 = vpop.permute.xlu1 %1112  ;;  %v4340_v53 = vpop.permute.xlu0 %1107 }
 0x17a   : > { %6174 = vst [vmem:[#allocation49_spill] sm:$0xff] %v4338_v46  ;;  %6175 = vst [vmem:[#allocation52_spill] sm:$0xff] %v4340_v53  ;;  %1630 = vperm.xlu1 %3555, %v6176_v50   ;;  %1625 = vperm.xlu0 %3554, %v6177_v28  }
 0x17d   : > { %v1123_v24 = vpop.permute.xlu1 %1122  ;;  %v4349_v47 = vpop.permute.xlu0 %1117 }
 0x17e   : > { %6179 = vst [vmem:[#allocation56_spill] sm:$0xff] %v4349_v47  ;;  %v1186_v45 = vmul.f32 %v4347_v55, %v1123_v24  ;;  %1640 = vperm.xlu1 %3555, %v6180_v61   ;;  %1635 = vperm.xlu0 %3554, %v6181_v29  }
 0x180   : > { %v4355_v53 = vadd.f32 %v1186_v45, %v4246_v49  ;;  %v6186_v45 = vld [vmem:[#allocation65_spill] sm:$0xff] }
 0x181   : > { %v1133_v50 = vpop.permute.xlu1 %1132  ;;  %v4357_v46 = vpop.permute.xlu0 %1127 }
 0x182   : > { %6182 = vst [vmem:[#allocation57_spill] sm:$0xff] %v4357_v46  ;;  %v1188_v28 = vmul.f32 %v4347_v55, %v1133_v50  ;;  %1650 = vperm.xlu1 %3555, %v6183_v60   ;;  %1645 = vperm.xlu0 %3554, %v6184_v54   ;;  %v4379_v54 = vld [vmem:[%s3609_s17 + $0x18a] sm:$0xff] }
 0x183   : > { %6188 = vst [vmem:[#allocation62_spill] sm:$0xff] %v4379_v54 }
 0x184   : > { %v4363_v24 = vadd.f32 %v1188_v28, %v4254_v52 }
 0x185   : > { %v1143_v61 = vpop.permute.xlu1 %1142  ;;  %v4365_v47 = vpop.permute.xlu0 %1137 }
 0x186   : > { %6185 = vst [vmem:[#allocation59_spill] sm:$0xff] %v4365_v47  ;;  %v1190_v49 = vmul.f32 %v4347_v55, %v1143_v61  ;;  %1660 = vperm.xlu1 %3555, %v4022_v59   ;;  %1655 = vperm.xlu0 %3554, %v6186_v45   ;;  %v4382_v59 = vld [vmem:[%s3609_s17 + $0x182] sm:$0xff] }
 0x187   : > { %6189 = vst [vmem:[#allocation63_spill] sm:$0xff] %v4382_v59 }
 0x188   : > { %v4371_v29 = vadd.f32 %v1190_v49, %v4262_v48  ;;  %v3418_v49 = vld [vmem:[%s3609_s17 + $0x30] sm:$0xff] }
 0x189   : > { %v1153_v60 = vpop.permute.xlu1 %1152  ;;  %v4373_v50 = vpop.permute.xlu0 %1147 }
 0x18a   : > { %6187 = vst [vmem:[#allocation60_spill] sm:$0xff] %v4373_v50  ;;  %v1192_v52 = vmul.f32 %v4347_v55, %v1153_v60  ;;  %1670 = vperm.xlu1 %3555, %v4034_v33   ;;  %1665 = vperm.xlu0 %3554, %v4037_v57   ;;  %v3419_v33 = vld [vmem:[%s3609_s17 + $0x38] sm:$0xff]  ;;  %v3420_v60 = vld [vmem:[%s3609_s17 + $0x48] sm:$0xff]  ;;  %v3422_v50 = vld [vmem:[%s3609_s17 + $0x60] sm:$0xff] }
 0x18b   : > { %v3445_v55 = vld [vmem:[%s3609_s17 + $0x170] sm:$0xff] }
 0x18c   : > { %v4385_v28 = vadd.f32 %v1192_v52, %v4272_v14  ;;  %v3421_v14 = vld [vmem:[%s3609_s17 + $0x50] sm:$0xff] }
 0x18d   : > { %v4387_v48 = vpop.permute.xlu1 %1266  ;;  %v4389_v61 = vpop.permute.xlu0 %1261 }
 0x18e   : > { %6190 = vst [vmem:[#allocation65_spill] sm:$0xff] %v4387_v48  ;;  %6191 = vst [vmem:[#allocation96_spill] sm:$0xff] %v4389_v61  ;;  %1680 = vperm.xlu1 %3555, %v4379_v54   ;;  %1675 = vperm.xlu0 %3554, %v4382_v59   ;;  %v3423_v48 = vld [vmem:[%s3609_s17 + $0x68] sm:$0xff]  ;;  %v3482_v59 = vld [vmem:[%s3609_s17 + $0x199] sm:$0xff] }
 0x191   : > { %v4395_v57 = vpop.permute.xlu1 %1276  ;;  %v4397_v45 = vpop.permute.xlu0 %1271 }
 0x192   : > { %6192 = vst [vmem:[#allocation97_spill] sm:$0xff] %v4395_v57  ;;  %6193 = vst [vmem:[#allocation98_spill] sm:$0xff] %v4397_v45  ;;  %1795 = vperm.xlu1 %3555, %v3419_v33   ;;  %1790 = vperm.xlu0 %3554, %v3418_v49   ;;  %v3425_v33 = vld [vmem:[%s3609_s17 + $0x80] sm:$0xff]  ;;  %v3424_v49 = vld [vmem:[%s3609_s17 + $0x78] sm:$0xff] }
 0x195   : > { %v4401_v52 = vpop.permute.xlu1 %1286  ;;  %v4403_v61 = vpop.permute.xlu0 %1281 }
 0x196   : > { %6194 = vst [vmem:[#allocation99_spill] sm:$0xff] %v4401_v52  ;;  %6195 = vst [vmem:[#allocation100_spill] sm:$0xff] %v4403_v61  ;;  %1805 = vperm.xlu1 %3555, %v3421_v14   ;;  %1800 = vperm.xlu0 %3554, %v3420_v60   ;;  %v3427_v14 = vld [vmem:[%s3609_s17 + $0x98] sm:$0xff]  ;;  %v3426_v60 = vld [vmem:[%s3609_s17 + $0x90] sm:$0xff] }
 0x199   : > { %v4407_v47 = vpop.permute.xlu1 %1296  ;;  %v4409_v57 = vpop.permute.xlu0 %1291 }
 0x19a   : > { %6196 = vst [vmem:[#allocation101_spill] sm:$0xff] %v4407_v47  ;;  %6197 = vst [vmem:[#allocation102_spill] sm:$0xff] %v4409_v57  ;;  %1815 = vperm.xlu1 %3555, %v3423_v48   ;;  %1810 = vperm.xlu0 %3554, %v3422_v50   ;;  %v3429_v50 = vld [vmem:[%s3609_s17 + $0xb0] sm:$0xff]  ;;  %v3428_v48 = vld [vmem:[%s3609_s17 + $0xa8] sm:$0xff] }
 0x19d   : > { %v4413_v45 = vpop.permute.xlu1 %1306  ;;  %v4415_v52 = vpop.permute.xlu0 %1301 }
 0x19e   : > { %6198 = vst [vmem:[#allocation103_spill] sm:$0xff] %v4413_v45  ;;  %6199 = vst [vmem:[#allocation104_spill] sm:$0xff] %v4415_v52  ;;  %1825 = vperm.xlu1 %3555, %v3425_v33   ;;  %1820 = vperm.xlu0 %3554, %v3424_v49   ;;  %v3431_v33 = vld [vmem:[%s3609_s17 + $0xc8] sm:$0xff]  ;;  %v3430_v49 = vld [vmem:[%s3609_s17 + $0xc0] sm:$0xff] }
 0x1a1   : > { %v4419_v61 = vpop.permute.xlu1 %1316  ;;  %v4421_v47 = vpop.permute.xlu0 %1311 }
 0x1a2   : > { %6200 = vst [vmem:[#allocation105_spill] sm:$0xff] %v4419_v61  ;;  %6201 = vst [vmem:[#allocation106_spill] sm:$0xff] %v4421_v47  ;;  %1835 = vperm.xlu1 %3555, %v3427_v14   ;;  %1830 = vperm.xlu0 %3554, %v3426_v60   ;;  %v3433_v14 = vld [vmem:[%s3609_s17 + $0xe0] sm:$0xff]  ;;  %v3432_v60 = vld [vmem:[%s3609_s17 + $0xd8] sm:$0xff] }
 0x1a5   : > { %v4425_v57 = vpop.permute.xlu1 %1326  ;;  %v4427_v45 = vpop.permute.xlu0 %1321 }
 0x1a6   : > { %6202 = vst [vmem:[#allocation107_spill] sm:$0xff] %v4425_v57  ;;  %6203 = vst [vmem:[#allocation108_spill] sm:$0xff] %v4427_v45  ;;  %1845 = vperm.xlu1 %3555, %v3429_v50   ;;  %1840 = vperm.xlu0 %3554, %v3428_v48   ;;  %v3435_v50 = vld [vmem:[%s3609_s17 + $0xf8] sm:$0xff]  ;;  %v3434_v48 = vld [vmem:[%s3609_s17 + $0xf0] sm:$0xff] }
 0x1a9   : > { %v4431_v52 = vpop.permute.xlu1 %1336  ;;  %v4433_v61 = vpop.permute.xlu0 %1331 }
 0x1aa   : > { %6204 = vst [vmem:[#allocation109_spill] sm:$0xff] %v4431_v52  ;;  %6205 = vst [vmem:[#allocation110_spill] sm:$0xff] %v4433_v61  ;;  %1855 = vperm.xlu1 %3555, %v3431_v33   ;;  %1850 = vperm.xlu0 %3554, %v3430_v49   ;;  %v3437_v33 = vld [vmem:[%s3609_s17 + $0x110] sm:$0xff]  ;;  %v3436_v49 = vld [vmem:[%s3609_s17 + $0x108] sm:$0xff] }
 0x1ad   : > { %v4437_v47 = vpop.permute.xlu1 %1346  ;;  %v4439_v57 = vpop.permute.xlu0 %1341 }
 0x1ae   : > { %6206 = vst [vmem:[#allocation111_spill] sm:$0xff] %v4437_v47  ;;  %6207 = vst [vmem:[#allocation112_spill] sm:$0xff] %v4439_v57  ;;  %1865 = vperm.xlu1 %3555, %v3433_v14   ;;  %1860 = vperm.xlu0 %3554, %v3432_v60   ;;  %v3439_v14 = vld [vmem:[%s3609_s17 + $0x128] sm:$0xff]  ;;  %v3438_v60 = vld [vmem:[%s3609_s17 + $0x120] sm:$0xff] }
 0x1b1   : > { %v4443_v45 = vpop.permute.xlu1 %1356  ;;  %v4445_v52 = vpop.permute.xlu0 %1351 }
 0x1b2   : > { %6208 = vst [vmem:[#allocation113_spill] sm:$0xff] %v4443_v45  ;;  %6209 = vst [vmem:[#allocation114_spill] sm:$0xff] %v4445_v52  ;;  %1875 = vperm.xlu1 %3555, %v3435_v50   ;;  %1870 = vperm.xlu0 %3554, %v3434_v48   ;;  %v3441_v50 = vld [vmem:[%s3609_s17 + $0x140] sm:$0xff]  ;;  %v3440_v48 = vld [vmem:[%s3609_s17 + $0x138] sm:$0xff] }
 0x1b5   : > { %v4449_v61 = vpop.permute.xlu1 %1366  ;;  %v4451_v47 = vpop.permute.xlu0 %1361 }
 0x1b6   : > { %6210 = vst [vmem:[#allocation115_spill] sm:$0xff] %v4449_v61  ;;  %6211 = vst [vmem:[#allocation116_spill] sm:$0xff] %v4451_v47  ;;  %1885 = vperm.xlu1 %3555, %v3437_v33   ;;  %1880 = vperm.xlu0 %3554, %v3436_v49   ;;  %v4464_v47 = vld [vmem:[%s5979_s1 + $0x4] ss:$0 sm:$0xff] }
 0x1b7   : > { %6214 = vst [vmem:[#allocation119_spill] sm:$0xff] %v4464_v47 }
 0x1b9   : > { %v4455_v57 = vpop.permute.xlu1 %1376  ;;  %v4457_v45 = vpop.permute.xlu0 %1371 }
 0x1ba   : > { %6212 = vst [vmem:[#allocation117_spill] sm:$0xff] %v4455_v57  ;;  %6213 = vst [vmem:[#allocation118_spill] sm:$0xff] %v4457_v45  ;;  %1895 = vperm.xlu1 %3555, %v3439_v14   ;;  %1890 = vperm.xlu0 %3554, %v3438_v60   ;;  %v3443_v57 = vld [vmem:[%s3609_s17 + $0x158] sm:$0xff]  ;;  %v3442_v45 = vld [vmem:[%s3609_s17 + $0x150] sm:$0xff] }
 0x1bd   : > { %v1387_v33 = vpop.permute.xlu1 %1386  ;;  %v4466_v49 = vpop.permute.xlu0 %1381 }
 0x1be   : > { %6215 = vst [vmem:[#allocation120_spill] sm:$0xff] %v4466_v49  ;;  %v1450_v61 = vmul.f32 %v4464_v47, %v1387_v33  ;;  %1905 = vperm.xlu1 %3555, %v3441_v50   ;;  %1900 = vperm.xlu0 %3554, %v3440_v48   ;;  %v3444_v49 = vld [vmem:[%s3609_s17 + $0x168] sm:$0xff] }
 0x1c0   : > { %v4472_v14 = vadd.f32 %v1450_v61, %v4355_v53 }
 0x1c1   : > { %v1397_v60 = vpop.permute.xlu1 %1396  ;;  %v4474_v52 = vpop.permute.xlu0 %1391 }
 0x1c2   : > { %6216 = vst [vmem:[#allocation121_spill] sm:$0xff] %v4474_v52  ;;  %v1452_v46 = vmul.f32 %v4464_v47, %v1397_v60  ;;  %1915 = vperm.xlu1 %3555, %v3443_v57   ;;  %1910 = vperm.xlu0 %3554, %v3442_v45   ;;  %v6269_v52 = vld [vmem:[#allocation14_spill] sm:$0xff] }
 0x1c4   : > { %v4480_v33 = vadd.f32 %v1452_v46, %v4363_v24  ;;  %v3449_v46 = vld [vmem:[%s3609_s17 + $0x1a0] sm:$0xff]  ;;  %v3448_v24 = vld [vmem:[%s3609_s17 + $0x198] sm:$0xff] }
 0x1c5   : > { %v1407_v50 = vpop.permute.xlu1 %1406  ;;  %v4482_v48 = vpop.permute.xlu0 %1401 }
 0x1c6   : > { %6217 = vst [vmem:[#allocation122_spill] sm:$0xff] %v4482_v48  ;;  %v1454_v53 = vmul.f32 %v4464_v47, %v1407_v50  ;;  %1925 = vperm.xlu1 %3555, %v3445_v55   ;;  %1920 = vperm.xlu0 %3554, %v3444_v49   ;;  %v3453_v50 = vld [vmem:[%s3609_s17 + $0x39] sm:$0xff] }
 0x1c7   : > { %v3486_v48 = vld [vmem:[%s3609_s17 + $0x32] sm:$0xff] }
 0x1c8   : > { %v4486_v61 = vadd.f32 %v1454_v53, %v4371_v29  ;;  %v3452_v53 = vld [vmem:[%s3609_s17 + $0x31] sm:$0xff] }
 0x1c9   : > { %v1417_v57 = vpop.permute.xlu1 %1416  ;;  %v4488_v45 = vpop.permute.xlu0 %1411 }
 0x1ca   : > { %6218 = vst [vmem:[#allocation123_spill] sm:$0xff] %v4488_v45  ;;  %v1456_v60 = vmul.f32 %v4464_v47, %v1417_v57  ;;  %1935 = vperm.xlu1 %3555, %v4156_v63   ;;  %1930 = vperm.xlu0 %3554, %v4159_v15   ;;  %v3455_v15 = vld [vmem:[%s3609_s17 + $0x51] sm:$0xff] }
 0x1cb   : > { %v6273_v47 = vld [vmem:[#allocation22_spill] sm:$0xff] }
 0x1cc   : > { %v4496_v55 = vadd.f32 %v1456_v60, %v4385_v28  ;;  %v3454_v28 = vld [vmem:[%s3609_s17 + $0x49] sm:$0xff] }
 0x1cd   : > { %v4498_v49 = vpop.permute.xlu1 %1530  ;;  %v4500_v29 = vpop.permute.xlu0 %1525 }
 0x1ce   : > { %6219 = vst [vmem:[#allocation124_spill] sm:$0xff] %v4498_v49  ;;  %6220 = vst [vmem:[#allocation125_spill] sm:$0xff] %v4500_v29  ;;  %1945 = vperm.xlu1 %3555, %v3449_v46   ;;  %1940 = vperm.xlu0 %3554, %v3448_v24   ;;  %v3457_v46 = vld [vmem:[%s3609_s17 + $0x69] sm:$0xff]  ;;  %v3456_v24 = vld [vmem:[%s3609_s17 + $0x61] sm:$0xff] }
 0x1d1   : > { %v4504_v57 = vpop.permute.xlu1 %1540  ;;  %v4506_v63 = vpop.permute.xlu0 %1535 }
 0x1d2   : > { %6221 = vst [vmem:[#allocation126_spill] sm:$0xff] %v4504_v57  ;;  %6222 = vst [vmem:[#allocation127_spill] sm:$0xff] %v4506_v63  ;;  %2059 = vperm.xlu1 %3555, %v3453_v50   ;;  %2054 = vperm.xlu0 %3554, %v3452_v53   ;;  %v3459_v50 = vld [vmem:[%s3609_s17 + $0x81] sm:$0xff]  ;;  %v3458_v53 = vld [vmem:[%s3609_s17 + $0x79] sm:$0xff] }
 0x1d5   : > { %v4510_v60 = vpop.permute.xlu1 %1550  ;;  %v4512_v49 = vpop.permute.xlu0 %1545 }
 0x1d6   : > { %6223 = vst [vmem:[#allocation128_spill] sm:$0xff] %v4510_v60  ;;  %6224 = vst [vmem:[#allocation129_spill] sm:$0xff] %v4512_v49  ;;  %2069 = vperm.xlu1 %3555, %v3455_v15   ;;  %2064 = vperm.xlu0 %3554, %v3454_v28   ;;  %v3461_v15 = vld [vmem:[%s3609_s17 + $0x99] sm:$0xff]  ;;  %v3460_v28 = vld [vmem:[%s3609_s17 + $0x91] sm:$0xff] }
 0x1d9   : > { %v4516_v29 = vpop.permute.xlu1 %1560  ;;  %v4518_v57 = vpop.permute.xlu0 %1555 }
 0x1da   : > { %6225 = vst [vmem:[#allocation130_spill] sm:$0xff] %v4516_v29  ;;  %6226 = vst [vmem:[#allocation131_spill] sm:$0xff] %v4518_v57  ;;  %2079 = vperm.xlu1 %3555, %v3457_v46   ;;  %2074 = vperm.xlu0 %3554, %v3456_v24   ;;  %v3463_v46 = vld [vmem:[%s3609_s17 + $0xb1] sm:$0xff]  ;;  %v3462_v24 = vld [vmem:[%s3609_s17 + $0xa9] sm:$0xff] }
 0x1dd   : > { %v4522_v63 = vpop.permute.xlu1 %1570  ;;  %v4524_v60 = vpop.permute.xlu0 %1565 }
 0x1de   : > { %6227 = vst [vmem:[#allocation132_spill] sm:$0xff] %v4522_v63  ;;  %6228 = vst [vmem:[#allocation133_spill] sm:$0xff] %v4524_v60  ;;  %2089 = vperm.xlu1 %3555, %v3459_v50   ;;  %2084 = vperm.xlu0 %3554, %v3458_v53   ;;  %v3465_v50 = vld [vmem:[%s3609_s17 + $0xc9] sm:$0xff]  ;;  %v3464_v53 = vld [vmem:[%s3609_s17 + $0xc1] sm:$0xff] }
 0x1e1   : > { %v4528_v49 = vpop.permute.xlu1 %1580  ;;  %v4530_v29 = vpop.permute.xlu0 %1575 }
 0x1e2   : > { %6229 = vst [vmem:[#allocation134_spill] sm:$0xff] %v4528_v49  ;;  %6230 = vst [vmem:[#allocation135_spill] sm:$0xff] %v4530_v29  ;;  %2099 = vperm.xlu1 %3555, %v3461_v15   ;;  %2094 = vperm.xlu0 %3554, %v3460_v28   ;;  %v3467_v15 = vld [vmem:[%s3609_s17 + $0xe1] sm:$0xff]  ;;  %v3466_v28 = vld [vmem:[%s3609_s17 + $0xd9] sm:$0xff] }
 0x1e5   : > { %v4534_v57 = vpop.permute.xlu1 %1590  ;;  %v4536_v63 = vpop.permute.xlu0 %1585 }
 0x1e6   : > { %6231 = vst [vmem:[#allocation136_spill] sm:$0xff] %v4534_v57  ;;  %6232 = vst [vmem:[#allocation137_spill] sm:$0xff] %v4536_v63  ;;  %2109 = vperm.xlu1 %3555, %v3463_v46   ;;  %2104 = vperm.xlu0 %3554, %v3462_v24   ;;  %v3469_v46 = vld [vmem:[%s3609_s17 + $0xf9] sm:$0xff]  ;;  %v3468_v24 = vld [vmem:[%s3609_s17 + $0xf1] sm:$0xff] }
 0x1e9   : > { %v4540_v60 = vpop.permute.xlu1 %1600  ;;  %v4542_v49 = vpop.permute.xlu0 %1595 }
 0x1ea   : > { %6233 = vst [vmem:[#allocation138_spill] sm:$0xff] %v4540_v60  ;;  %6234 = vst [vmem:[#allocation139_spill] sm:$0xff] %v4542_v49  ;;  %2119 = vperm.xlu1 %3555, %v3465_v50   ;;  %2114 = vperm.xlu0 %3554, %v3464_v53   ;;  %v3471_v50 = vld [vmem:[%s3609_s17 + $0x111] sm:$0xff]  ;;  %v3470_v53 = vld [vmem:[%s3609_s17 + $0x109] sm:$0xff] }
 0x1ed   : > { %v4546_v29 = vpop.permute.xlu1 %1610  ;;  %v4548_v57 = vpop.permute.xlu0 %1605 }
 0x1ee   : > { %6235 = vst [vmem:[#allocation140_spill] sm:$0xff] %v4546_v29  ;;  %6236 = vst [vmem:[#allocation141_spill] sm:$0xff] %v4548_v57  ;;  %2129 = vperm.xlu1 %3555, %v3467_v15   ;;  %2124 = vperm.xlu0 %3554, %v3466_v28   ;;  %v3473_v15 = vld [vmem:[%s3609_s17 + $0x129] sm:$0xff]  ;;  %v3472_v28 = vld [vmem:[%s3609_s17 + $0x121] sm:$0xff] }
 0x1f1   : > { %v4552_v63 = vpop.permute.xlu1 %1620  ;;  %v4554_v60 = vpop.permute.xlu0 %1615 }
 0x1f2   : > { %6237 = vst [vmem:[#allocation142_spill] sm:$0xff] %v4552_v63  ;;  %6238 = vst [vmem:[#allocation143_spill] sm:$0xff] %v4554_v60  ;;  %2139 = vperm.xlu1 %3555, %v3469_v46   ;;  %2134 = vperm.xlu0 %3554, %v3468_v24   ;;  %v3475_v46 = vld [vmem:[%s3609_s17 + $0x141] sm:$0xff]  ;;  %v3474_v24 = vld [vmem:[%s3609_s17 + $0x139] sm:$0xff] }
 0x1f5   : > { %v4558_v49 = vpop.permute.xlu1 %1630  ;;  %v4560_v29 = vpop.permute.xlu0 %1625 }
 0x1f6   : > { %6239 = vst [vmem:[#allocation144_spill] sm:$0xff] %v4558_v49  ;;  %6240 = vst [vmem:[#allocation145_spill] sm:$0xff] %v4560_v29  ;;  %2149 = vperm.xlu1 %3555, %v3471_v50   ;;  %2144 = vperm.xlu0 %3554, %v3470_v53   ;;  %v4573_v29 = vld [vmem:[%s5979_s1 + $0x5] ss:$0 sm:$0xff] }
 0x1f7   : > { %6243 = vst [vmem:[#allocation148_spill] sm:$0xff] %v4573_v29 }
 0x1f9   : > { %v4564_v57 = vpop.permute.xlu1 %1640  ;;  %v4566_v63 = vpop.permute.xlu0 %1635 }
 0x1fa   : > { %6241 = vst [vmem:[#allocation146_spill] sm:$0xff] %v4564_v57  ;;  %6242 = vst [vmem:[#allocation147_spill] sm:$0xff] %v4566_v63  ;;  %2159 = vperm.xlu1 %3555, %v3473_v15   ;;  %2154 = vperm.xlu0 %3554, %v3472_v28   ;;  %v3477_v57 = vld [vmem:[%s3609_s17 + $0x159] sm:$0xff]  ;;  %v3476_v15 = vld [vmem:[%s3609_s17 + $0x151] sm:$0xff] }
 0x1fd   : > { %v1651_v50 = vpop.permute.xlu1 %1650  ;;  %v4575_v53 = vpop.permute.xlu0 %1645 }
 0x1fe   : > { %6244 = vst [vmem:[#allocation149_spill] sm:$0xff] %v4575_v53  ;;  %v1714_v60 = vmul.f32 %v4573_v29, %v1651_v50  ;;  %2169 = vperm.xlu1 %3555, %v3475_v46   ;;  %2164 = vperm.xlu0 %3554, %v3474_v24   ;;  %v3478_v53 = vld [vmem:[%s3609_s17 + $0x169] sm:$0xff] }
 0x200   : > { %v4581_v28 = vadd.f32 %v1714_v60, %v4472_v14  ;;  %v3490_v60 = vld [vmem:[%s3609_s17 + $0x62] sm:$0xff] }
 0x201   : > { %v1661_v63 = vpop.permute.xlu1 %1660  ;;  %v4583_v49 = vpop.permute.xlu0 %1655 }
 0x202   : > { %6245 = vst [vmem:[#allocation150_spill] sm:$0xff] %v4583_v49  ;;  %v1716_v45 = vmul.f32 %v4573_v29, %v1661_v63  ;;  %2179 = vperm.xlu1 %3555, %v3477_v57   ;;  %2174 = vperm.xlu0 %3554, %v3476_v15   ;;  %v3488_v63 = vld [vmem:[%s3609_s17 + $0x4a] sm:$0xff] }
 0x204   : > { %v4589_v46 = vadd.f32 %v1716_v45, %v4480_v33  ;;  %v3494_v45 = vld [vmem:[%s3609_s17 + $0x92] sm:$0xff] }
 0x205   : > { %v1671_v24 = vpop.permute.xlu1 %1670  ;;  %v4591_v50 = vpop.permute.xlu0 %1665 }
 0x206   : > { %6246 = vst [vmem:[#allocation151_spill] sm:$0xff] %v4589_v46  ;;  %6247 = vst [vmem:[#allocation152_spill] sm:$0xff] %v4591_v50  ;;  %v1718_v14 = vmul.f32 %v4573_v29, %v1671_v24  ;;  %2318 = vperm.xlu1 %3555, %v3486_v48   ;;  %2184 = vperm.xlu0 %3554, %v3478_v53   ;;  %v3492_v24 = vld [vmem:[%s3609_s17 + $0x7a] sm:$0xff] }
 0x208   : > { %v4597_v57 = vadd.f32 %v1718_v14, %v4486_v61  ;;  %v3487_v61 = vld [vmem:[%s3609_s17 + $0x3a] sm:$0xff]  ;;  %v3496_v14 = vld [vmem:[%s3609_s17 + $0xaa] sm:$0xff] }
 0x209   : > { %v1681_v15 = vpop.permute.xlu1 %1680  ;;  %v4599_v49 = vpop.permute.xlu0 %1675 }
 0x20a   : > { %6248 = vst [vmem:[#allocation153_spill] sm:$0xff] %v4597_v57  ;;  %6249 = vst [vmem:[#allocation154_spill] sm:$0xff] %v4599_v49  ;;  %v1720_v33 = vmul.f32 %v4573_v29, %v1681_v15  ;;  %2338 = vperm.xlu1 %3555, %v3490_v60   ;;  %2328 = vperm.xlu0 %3554, %v3488_v63   ;;  %v3489_v63 = vld [vmem:[%s3609_s17 + $0x52] sm:$0xff] }
 0x20b   : > { %v6268_v29 = vld [vmem:[#allocation13_spill] sm:$0xff] }
 0x20c   : > { %v4605_v48 = vadd.f32 %v1720_v33, %v4496_v55  ;;  %v3491_v55 = vld [vmem:[%s3609_s17 + $0x6a] sm:$0xff] }
 0x20d   : > { %v4607_v53 = vpop.permute.xlu1 %1795  ;;  %v4609_v50 = vpop.permute.xlu0 %1790 }
 0x20e   : > { %6250 = vst [vmem:[#allocation155_spill] sm:$0xff] %v4605_v48  ;;  %6251 = vst [vmem:[#allocation156_spill] sm:$0xff] %v4607_v53  ;;  %2358 = vperm.xlu1 %3555, %v3494_v45   ;;  %2348 = vperm.xlu0 %3554, %v3492_v24   ;;  %v3498_v45 = vld [vmem:[%s3609_s17 + $0xc2] sm:$0xff] }
 0x20f   : > { %6252 = vst [vmem:[#allocation157_spill] sm:$0xff] %v4609_v50  ;;  %v3493_v24 = vld [vmem:[%s3609_s17 + $0x82] sm:$0xff] }
 0x210   : > { %v6278_v48 = vld [vmem:[#allocation27_spill] sm:$0xff] }
 0x211   : > { %v4613_v15 = vpop.permute.xlu1 %1805  ;;  %v4615_v60 = vpop.permute.xlu0 %1800 }
 0x212   : > { %6253 = vst [vmem:[#allocation158_spill] sm:$0xff] %v4613_v15  ;;  %6254 = vst [vmem:[#allocation159_spill] sm:$0xff] %v4615_v60  ;;  %2323 = vperm.xlu1 %3555, %v3487_v61   ;;  %2368 = vperm.xlu0 %3554, %v3496_v14   ;;  %v3495_v61 = vld [vmem:[%s3609_s17 + $0x9a] sm:$0xff] }
 0x213   : > { %v3500_v14 = vld [vmem:[%s3609_s17 + $0xda] sm:$0xff] }
 0x215   : > { %v4619_v33 = vpop.permute.xlu1 %1815  ;;  %v4621_v53 = vpop.permute.xlu0 %1810 }
 0x216   : > { %6255 = vst [vmem:[#allocation160_spill] sm:$0xff] %v4619_v33  ;;  %6256 = vst [vmem:[#allocation161_spill] sm:$0xff] %v4621_v53  ;;  %2343 = vperm.xlu1 %3555, %v3491_v55   ;;  %2333 = vperm.xlu0 %3554, %v3489_v63   ;;  %v3502_v55 = vld [vmem:[%s3609_s17 + $0xf2] sm:$0xff] }
 0x217   : > { %v3497_v63 = vld [vmem:[%s3609_s17 + $0xb2] sm:$0xff] }
 0x219   : > { %v4625_v49 = vpop.permute.xlu1 %1825  ;;  %v4627_v15 = vpop.permute.xlu0 %1820 }
 0x21a   : > { %6257 = vst [vmem:[#allocation162_spill] sm:$0xff] %v4625_v49  ;;  %6258 = vst [vmem:[#allocation163_spill] sm:$0xff] %v4627_v15  ;;  %2378 = vperm.xlu1 %3555, %v3498_v45   ;;  %2353 = vperm.xlu0 %3554, %v3493_v24   ;;  %v3499_v45 = vld [vmem:[%s3609_s17 + $0xca] sm:$0xff] }
 0x21b   : > { %v3504_v24 = vld [vmem:[%s3609_s17 + $0x10a] sm:$0xff] }
 0x21d   : > { %v4631_v60 = vpop.permute.xlu1 %1835  ;;  %v4633_v33 = vpop.permute.xlu0 %1830 }
 0x21e   : > { %6259 = vst [vmem:[#allocation164_spill] sm:$0xff] %v4631_v60  ;;  %6260 = vst [vmem:[#allocation165_spill] sm:$0xff] %v4633_v33  ;;  %2363 = vperm.xlu1 %3555, %v3495_v61   ;;  %2388 = vperm.xlu0 %3554, %v3500_v14   ;;  %v3506_v61 = vld [vmem:[%s3609_s17 + $0x122] sm:$0xff] }
 0x21f   : > { %v3501_v14 = vld [vmem:[%s3609_s17 + $0xe2] sm:$0xff] }
 0x221   : > { %v4637_v53 = vpop.permute.xlu1 %1845  ;;  %v4639_v49 = vpop.permute.xlu0 %1840 }
 0x222   : > { %6261 = vst [vmem:[#allocation166_spill] sm:$0xff] %v4637_v53  ;;  %6262 = vst [vmem:[#allocation167_spill] sm:$0xff] %v4639_v49  ;;  %2398 = vperm.xlu1 %3555, %v3502_v55   ;;  %2373 = vperm.xlu0 %3554, %v3497_v63   ;;  %v3503_v49 = vld [vmem:[%s3609_s17 + $0xfa] sm:$0xff]  ;;  %v6267_v55 = vld [vmem:[#allocation12_spill] sm:$0xff] }
 0x223   : > { %v3508_v53 = vld [vmem:[%s3609_s17 + $0x13a] sm:$0xff]  ;;  %v370_v63 = vmul.f32 %v4114_v18, %v6267_v55  ;;  %v375_v55 = vmul.f32 %v4114_v18, %v6273_v47 }
 0x225   : > { %v4643_v15 = vpop.permute.xlu1 %1855  ;;  %v4645_v60 = vpop.permute.xlu0 %1850 }
 0x226   : > { %6263 = vst [vmem:[#allocation168_spill] sm:$0xff] %v4643_v15  ;;  %6264 = vst [vmem:[#allocation169_spill] sm:$0xff] %v4645_v60  ;;  %2383 = vperm.xlu1 %3555, %v3499_v45   ;;  %2408 = vperm.xlu0 %3554, %v3504_v24   ;;  %v368_v15 = vmul.f32 %v4114_v18, %v6268_v29  ;;  %v371_v45 = vmul.f32 %v4114_v18, %v6269_v52  ;;  %v6270_v24 = vld [vmem:[#allocation15_spill] sm:$0xff] }
 0x227   : > { %v369_v60 = vmul.f32 %v4114_v18, %v6270_v24  ;;  %v4675_v52 = vmul.f32 %v4114_v18, %v6276_v44  ;;  %v4679_v24 = vmul.f32 %v4114_v18, %v6277_v43  ;;  %v6281_v44 = vld [vmem:[#allocation34_spill] sm:$0xff]  ;;  %v6282_v43 = vld [vmem:[#allocation35_spill] sm:$0xff] }
 0x228   : > { %v4695_v42 = vmul.f32 %v4114_v18, %v6281_v44  ;;  %v4699_v41 = vmul.f32 %v4114_v18, %v6282_v43  ;;  %v6286_v44 = vld [vmem:[#allocation67_spill] sm:$0xff]  ;;  %v4719_v43 = vmul.f32 %v4114_v18, %v6287_v37  ;;  %v4737_v37 = vmul.f32 %v4114_v18, %v6293_v20 }
 0x229   : > { %v4649_v33 = vpop.permute.xlu1 %1865  ;;  %v4651_v50 = vpop.permute.xlu0 %1860  ;;  %v633_v38 = vmul.f32 %v4119_v19, %v6286_v44  ;;  %v635_v20 = vmul.f32 %v4119_v19, %v4045_v0 }
 0x22a   : > { %6265 = vst [vmem:[#allocation170_spill] sm:$0xff] %v4649_v33  ;;  %6266 = vst [vmem:[#allocation171_spill] sm:$0xff] %v4651_v50  ;;  %2418 = vperm.xlu1 %3555, %v3506_v61   ;;  %2393 = vperm.xlu0 %3554, %v3501_v14   ;;  %v6271_v33 = vld [vmem:[#allocation18_spill] sm:$0xff]  ;;  %v6272_v14 = vld [vmem:[#allocation19_spill] sm:$0xff] }
 0x22b   : > { %v373_v61 = vmul.f32 %v4114_v18, %v6271_v33  ;;  %v372_v50 = vmul.f32 %v4114_v18, %v6272_v14  ;;  %v4683_v33 = vmul.f32 %v4114_v18, %v6278_v48  ;;  %v6279_v14 = vld [vmem:[#allocation30_spill] sm:$0xff]  ;;  %v3480_v48 = vld [vmem:[%s3609_s17 + $0x181] sm:$0xff]  ;;  %v4793_v34 = vadd.f32 %v635_v20, %v371_v45 }
 0x22c   : > { %v4687_v47 = vmul.f32 %v4114_v18, %v6279_v14  ;;  %v6284_v14 = vld [vmem:[#allocation39_spill] sm:$0xff] }
 0x22d   : > { %v4669_v54 = vpop.permute.xlu1 %1875  ;;  %v4671_v29 = vpop.permute.xlu0 %1870  ;;  %v4709_v57 = vmul.f32 %v4114_v18, %v6284_v14  ;;  %v4727_v14 = vmul.f32 %v4114_v18, %v6289_v35  ;;  %v6296_v35 = vld [vmem:[#allocation55_spill] sm:$0xff] }
 0x22e   : > { %6274 = vst [vmem:[#allocation12_spill] sm:$0xff] %v4669_v54  ;;  %6275 = vst [vmem:[#allocation13_spill] sm:$0xff] %v4671_v29  ;;  %2403 = vperm.xlu1 %3555, %v3503_v49   ;;  %2428 = vperm.xlu0 %3554, %v3508_v53   ;;  %v6280_v54 = vld [vmem:[#allocation31_spill] sm:$0xff]  ;;  %v6283_v49 = vld [vmem:[#allocation38_spill] sm:$0xff] }
 0x22f   : > { %v4691_v29 = vmul.f32 %v4114_v18, %v6280_v54  ;;  %v4705_v53 = vmul.f32 %v4114_v18, %v6283_v49  ;;  %v6285_v54 = vld [vmem:[#allocation42_spill] sm:$0xff]  ;;  %v4723_v49 = vmul.f32 %v4114_v18, %v6288_v36 }
 0x230   : > { %v4713_v39 = vmul.f32 %v4114_v18, %v6285_v54  ;;  %v632_v54 = vmul.f32 %v4119_v19, %v6290_v27  ;;  %v6295_v36 = vld [vmem:[#allocation54_spill] sm:$0xff]  ;;  %v4749_v27 = vmul.f32 %v4114_v18, %v6296_v35 }
 0x231   : > { %v4731_v22 = vpop.permute.xlu1 %1885  ;;  %v4733_v44 = vpop.permute.xlu0 %1880  ;;  %v4745_v46 = vmul.f32 %v4114_v18, %v6295_v36  ;;  %v6301_v36 = vld [vmem:[#allocation61_spill] sm:$0xff] }
 0x232   : > { %6291 = vst [vmem:[#allocation14_spill] sm:$0xff] %v4731_v22  ;;  %6292 = vst [vmem:[#allocation15_spill] sm:$0xff] %v4733_v44  ;;  %2194 = vperm.xlu1 %3555, %v3480_v48   ;;  %2413 = vperm.xlu0 %3554, %v3505_v40   ;;  %v6298_v22 = vld [vmem:[#allocation58_spill] sm:$0xff]  ;;  %v4763_v48 = vmul.f32 %v4114_v18, %v6301_v36  ;;  %v6303_v40 = vld [vmem:[#allocation64_spill] sm:$0xff]  ;;  %v4775_v0 = vadd.f32 %v632_v54, %v368_v15 }
 0x233   : > { %6297 = vst [vmem:[#allocation18_spill] sm:$0xff] %v4749_v27  ;;  %v4753_v44 = vmul.f32 %v4114_v18, %v6298_v22  ;;  %v4767_v35 = vmul.f32 %v4114_v18, %v6303_v40  ;;  %v6305_v27 = vld [vmem:[#allocation66_spill] sm:$0xff]  ;;  %v636_v36 = vmul.f32 %v4119_v19, %v4053_v62  ;;  %v639_v40 = vmul.f32 %v4119_v19, %v4057_v2 }
 0x234   : > { %6302 = vst [vmem:[#allocation22_spill] sm:$0xff] %v4763_v48  ;;  %v4771_v22 = vmul.f32 %v4114_v18, %v6305_v27  ;;  %v638_v18 = vmul.f32 %v4119_v19, %v4059_v4  ;;  %v640_v15 = vmul.f32 %v4119_v19, %v4065_v3  ;;  %v4795_v62 = vadd.f32 %v634_v32, %v370_v63  ;;  %v3479_v54 = vld [vmem:[%s3609_s17 + $0x171] sm:$0xff] }
 0x235   : > { %6299 = vst [vmem:[#allocation19_spill] sm:$0xff] %v4753_v44  ;;  %6304 = vst [vmem:[#allocation23_spill] sm:$0xff] %v4767_v35  ;;  %v4773_v44 = vadd.f32 %v633_v38, %v369_v60  ;;  %v4783_v35 = vpop.permute.xlu1 %1895  ;;  %v4785_v48 = vpop.permute.xlu0 %1890  ;;  %v641_v38 = vmul.f32 %v4119_v19, %v4063_v56  ;;  %v643_v2 = vmul.f32 %v4119_v19, %v4069_v1  ;;  %v3512_v4 = vld [vmem:[%s3609_s17 + $0x16a] sm:$0xff] }
 0x236   : > { %6306 = vst [vmem:[#allocation26_spill] sm:$0xff] %v4785_v48  ;;  %2438 = vperm.xlu1 %3555, %v3510_v58   ;;  %2204 = vperm.xlu0 %3554, %v3482_v59   ;;  %v642_v60 = vmul.f32 %v4119_v19, %v4071_v5  ;;  %v645_v56 = vmul.f32 %v4119_v19, %v4075_v6  ;;  %v3507_v27 = vld [vmem:[%s3609_s17 + $0x12a] sm:$0xff] }
 0x237   : > { %v644_v3 = vmul.f32 %v4119_v19, %v4077_v7  ;;  %v647_v58 = vmul.f32 %v4119_v19, %v4081_v8  ;;  %v646_v59 = vmul.f32 %v4119_v19, %v4083_v9  ;;  %v4811_v63 = vadd.f32 %v637_v25, %v373_v61 }
 0x238   : > { %v4813_v1 = vadd.f32 %v636_v36, %v372_v50  ;;  %v4815_v5 = vadd.f32 %v639_v40, %v375_v55  ;;  %v649_v6 = vmul.f32 %v4119_v19, %v4087_v10  ;;  %v4824_v8 = vadd.f32 %v638_v18, %v4675_v52  ;;  %v3556_v19 = vld [vmem:[%s5979_s1 + $0x1] ss:$0 sm:$0xff] }
 0x239   : > { %v4819_v45 = vpop.permute.xlu1 %1905  ;;  %v4821_v7 = vpop.permute.xlu0 %1900  ;;  %v4827_v9 = vadd.f32 %v641_v38, %v4679_v24  ;;  %v4830_v61 = vadd.f32 %v640_v15, %v4683_v33  ;;  %v4833_v50 = vadd.f32 %v643_v2, %v4687_v47  ;;  %v4836_v10 = vadd.f32 %v642_v60, %v4691_v29  ;;  %v3509_v24 = vld [vmem:[%s3609_s17 + $0x142] sm:$0xff]  ;;  %v6313_v38 = vld [vmem:[#allocation73_spill] sm:$0xff] }
 0x23a   : > { %6307 = vst [vmem:[#allocation27_spill] sm:$0xff] %v4819_v45  ;;  %6308 = vst [vmem:[#allocation30_spill] sm:$0xff] %v4821_v7  ;;  %2189 = vperm.xlu1 %3555, %v3479_v54   ;;  %2448 = vperm.xlu0 %3554, %v3512_v4   ;;  %v648_v55 = vmul.f32 %v3556_v19, %v4089_v11  ;;  %v651_v52 = vmul.f32 %v3556_v19, %v4093_v12  ;;  %v6309_v12 = vld [vmem:[#allocation70_spill] sm:$0xff]  ;;  %v6310_v36 = vld [vmem:[#allocation71_spill] sm:$0xff] }
 0x23b   : > { %v4846_v33 = vadd.f32 %v645_v56, %v4695_v42  ;;  %v4849_v20 = vadd.f32 %v644_v3, %v4699_v41  ;;  %v4852_v47 = vadd.f32 %v647_v58, %v4705_v53  ;;  %v4855_v29 = vadd.f32 %v646_v59, %v4709_v57  ;;  %v4866_v41 = vld [vmem:[%s5979_s1 + $0x6] ss:$0 sm:$0xff]  ;;  %v6312_v57 = vld [vmem:[#allocation72_spill] sm:$0xff]  ;;  %v3516_v4 = vld [vmem:[%s3609_s17 + $0x19a] sm:$0xff] }
 0x23c   : > { %v4858_v32 = vadd.f32 %v649_v6, %v4713_v39  ;;  %v650_v11 = vmul.f32 %v3556_v19, %v4095_v13  ;;  %v653_v25 = vmul.f32 %v3556_v19, %v6309_v12  ;;  %v652_v42 = vmul.f32 %v3556_v19, %v6310_v36  ;;  %v3481_v12 = vld [vmem:[%s3609_s17 + $0x189] sm:$0xff]  ;;  %v6386_v7 = vld [vmem:[#allocation119_spill] sm:$0xff] }
 0x23d   : > { %v1916_v53 = vpop.permute.xlu1 %1915  ;;  %v4868_v40 = vpop.permute.xlu0 %1910  ;;  %v655_v18 = vmul.f32 %v3556_v19, %v6312_v57  ;;  %v654_v39 = vmul.f32 %v3556_v19, %v6313_v38  ;;  %v4874_v13 = vadd.f32 %v648_v55, %v4719_v43  ;;  %v4877_v2 = vadd.f32 %v651_v52, %v4723_v49  ;;  %v6318_v55 = vld [vmem:[#allocation22_spill] sm:$0xff]  ;;  %v6322_v57 = vld [vmem:[#allocation151_spill] sm:$0xff]  ;;  %v6387_v45 = vld [vmem:[#allocation96_spill] sm:$0xff] }
 0x23e   : > { %6311 = vst [vmem:[#allocation31_spill] sm:$0xff] %v4868_v40  ;;  %v1979_v15 = vmul.f32 %v4866_v41, %v1916_v53  ;;  %2433 = vperm.xlu1 %3555, %v3509_v24   ;;  %2423 = vperm.xlu0 %3554, %v3507_v27   ;;  %v656_v60 = vmul.f32 %v3556_v19, %v4121_v21  ;;  %v6320_v27 = vld [vmem:[#allocation75_spill] sm:$0xff] }
 0x23f   : > { %v658_v54 = vmul.f32 %v3556_v19, %v4130_v16  ;;  %v660_v56 = vmul.f32 %v3556_v19, %v4139_v26  ;;  %v662_v3 = vmul.f32 %v3556_v19, %v4148_v17  ;;  %v897_v58 = vmul.f32 %v4238_v51, %v4163_v30  ;;  %v6317_v19 = vld [vmem:[#allocation19_spill] sm:$0xff] }
 0x240   : > { %v4887_v59 = vadd.f32 %v1979_v15, %v4581_v28  ;;  %v4890_v43 = vadd.f32 %v650_v11, %v4727_v14  ;;  %v4893_v21 = vadd.f32 %v653_v25, %v4737_v37  ;;  %v4896_v16 = vadd.f32 %v652_v42, %v4741_v31  ;;  %v6315_v28 = vld [vmem:[#allocation18_spill] sm:$0xff]  ;;  %v6316_v37 = vld [vmem:[#allocation63_spill] sm:$0xff] }
 0x241   : > { %v896_v26 = vmul.f32 %v4238_v51, %v4165_v23  ;;  %v1926_v17 = vpop.permute.xlu1 %1925  ;;  %v4900_v49 = vpop.permute.xlu0 %1920  ;;  %v4903_v30 = vadd.f32 %v655_v18, %v4745_v46  ;;  %v4906_v6 = vadd.f32 %v654_v39, %v6315_v28  ;;  %v4911_v31 = vadd.f32 %v656_v60, %v6317_v19  ;;  %v6319_v23 = vld [vmem:[#allocation74_spill] sm:$0xff]  ;;  %v3483_v11 = vld [vmem:[%s3609_s17 + $0x1a1] sm:$0xff]  ;;  %v6325_v60 = vld [vmem:[#allocation77_spill] sm:$0xff] }
 0x242   : > { %6314 = vst [vmem:[#allocation34_spill] sm:$0xff] %v4900_v49  ;;  %v1981_v14 = vmul.f32 %v4866_v41, %v1926_v17  ;;  %2468 = vperm.xlu1 %3555, %v3516_v4   ;;  %2458 = vperm.xlu0 %3554, %v6316_v37   ;;  %v4914_v52 = vadd.f32 %v658_v54, %v6318_v55  ;;  %v6321_v25 = vld [vmem:[#allocation23_spill] sm:$0xff]  ;;  %v6324_v39 = vld [vmem:[#allocation76_spill] sm:$0xff]  ;;  %v6326_v4 = vld [vmem:[#allocation78_spill] sm:$0xff] }
 0x243   : > { %v899_v24 = vmul.f32 %v4238_v51, %v6319_v23  ;;  %v898_v46 = vmul.f32 %v4238_v51, %v6320_v27  ;;  %v4923_v36 = vadd.f32 %v660_v56, %v6321_v25  ;;  %v4926_v42 = vadd.f32 %v662_v3, %v4771_v22  ;;  %v6328_v3 = vld [vmem:[#allocation79_spill] sm:$0xff]  ;;  %v6329_v17 = vld [vmem:[#allocation80_spill] sm:$0xff]  ;;  %v6330_v37 = vld [vmem:[#allocation81_spill] sm:$0xff] }
 0x244   : > { %v4929_v53 = vadd.f32 %v897_v58, %v4773_v44  ;;  %v4932_v18 = vadd.f32 %v1981_v14, %v6322_v57  ;;  %v4935_v38 = vadd.f32 %v896_v26, %v4775_v0  ;;  %v901_v15 = vmul.f32 %v4238_v51, %v6324_v39  ;;  %v6331_v55 = vld [vmem:[#allocation82_spill] sm:$0xff]  ;;  %v6332_v57 = vld [vmem:[#allocation83_spill] sm:$0xff] }
 0x245   : > { %v900_v54 = vmul.f32 %v4238_v51, %v6325_v60  ;;  %v903_v22 = vmul.f32 %v4238_v51, %v6326_v4  ;;  %v1936_v56 = vpop.permute.xlu1 %1935  ;;  %v4943_v44 = vpop.permute.xlu0 %1930  ;;  %v902_v58 = vmul.f32 %v4238_v51, %v6328_v3  ;;  %v905_v0 = vmul.f32 %v4238_v51, %v6329_v17  ;;  %v3513_v27 = vld [vmem:[%s3609_s17 + $0x172] sm:$0xff]  ;;  %v3511_v25 = vld [vmem:[%s3609_s17 + $0x15a] sm:$0xff]  ;;  %v6333_v60 = vld [vmem:[#allocation84_spill] sm:$0xff] }
 0x246   : > { %6323 = vst [vmem:[#allocation35_spill] sm:$0xff] %v4932_v18  ;;  %6327 = vst [vmem:[#allocation38_spill] sm:$0xff] %v4943_v44  ;;  %v1983_v26 = vmul.f32 %v4866_v41, %v1936_v56  ;;  %2209 = vperm.xlu1 %3555, %v3483_v11   ;;  %2199 = vperm.xlu0 %3554, %v3481_v12   ;;  %v4951_v28 = vadd.f32 %v899_v24, %v4793_v34  ;;  %v6334_v12 = vld [vmem:[#allocation85_spill] sm:$0xff]  ;;  %v6337_v3 = vld [vmem:[#allocation86_spill] sm:$0xff] }
 0x247   : > { %v4954_v14 = vadd.f32 %v898_v46, %v4795_v62  ;;  %v904_v19 = vmul.f32 %v4238_v51, %v6330_v37  ;;  %v907_v23 = vmul.f32 %v4238_v51, %v6331_v55  ;;  %v906_v39 = vmul.f32 %v4238_v51, %v6332_v57  ;;  %v6335_v24 = vld [vmem:[#allocation153_spill] sm:$0xff] }
 0x248   : > { %v909_v11 = vmul.f32 %v4238_v51, %v6333_v60  ;;  %v908_v34 = vmul.f32 %v4238_v51, %v6334_v12  ;;  %v4969_v62 = vadd.f32 %v1983_v26, %v6335_v24  ;;  %v4972_v46 = vadd.f32 %v901_v15, %v4811_v63  ;;  %v6339_v15 = vld [vmem:[#allocation87_spill] sm:$0xff]  ;;  %v6344_v60 = vld [vmem:[#allocation90_spill] sm:$0xff]  ;;  %v6356_v44 = vld [vmem:[#allocation53_spill] sm:$0xff] }
 0x249   : > { %v4975_v4 = vadd.f32 %v900_v54, %v4813_v1  ;;  %v4978_v56 = vadd.f32 %v903_v22, %v4815_v5  ;;  %v911_v17 = vmul.f32 %v4238_v51, %v6337_v3  ;;  %v1946_v37 = vpop.permute.xlu1 %1945  ;;  %v4982_v55 = vpop.permute.xlu0 %1940  ;;  %v4985_v57 = vadd.f32 %v902_v58, %v4824_v8  ;;  %v3557_v51 = vld [vmem:[%s5979_s1 + $0x2] ss:$0 sm:$0xff]  ;;  %v6340_v54 = vld [vmem:[#allocation88_spill] sm:$0xff] }
 0x24a   : > { %6336 = vst [vmem:[#allocation39_spill] sm:$0xff] %v4969_v62  ;;  %6338 = vst [vmem:[#allocation42_spill] sm:$0xff] %v4982_v55  ;;  %v4988_v26 = vadd.f32 %v905_v0, %v4827_v9  ;;  %v1985_v63 = vmul.f32 %v4866_v41, %v1946_v37  ;;  %2453 = vperm.xlu1 %3555, %v3513_v27   ;;  %2443 = vperm.xlu0 %3554, %v3511_v25   ;;  %v3517_v9 = vld [vmem:[%s3609_s17 + $0x1a2] sm:$0xff]  ;;  %v6343_v27 = vld [vmem:[#allocation89_spill] sm:$0xff] }
 0x24b   : > { %v4992_v1 = vadd.f32 %v904_v19, %v4830_v61  ;;  %v4995_v5 = vadd.f32 %v907_v23, %v4833_v50  ;;  %v910_v8 = vmul.f32 %v3557_v51, %v6339_v15  ;;  %v913_v22 = vmul.f32 %v3557_v51, %v6340_v54  ;;  %v6341_v50 = vld [vmem:[#allocation155_spill] sm:$0xff]  ;;  %v6348_v37 = vld [vmem:[#allocation94_spill] sm:$0xff] }
 0x24c   : > { %v5004_v58 = vadd.f32 %v906_v39, %v4836_v10  ;;  %v5007_v0 = vadd.f32 %v909_v11, %v4846_v33  ;;  %v5010_v61 = vadd.f32 %v908_v34, %v4849_v20  ;;  %v5013_v19 = vadd.f32 %v1985_v63, %v6341_v50  ;;  %v6345_v24 = vld [vmem:[#allocation91_spill] sm:$0xff]  ;;  %v6346_v33 = vld [vmem:[#allocation92_spill] sm:$0xff]  ;;  %v6347_v20 = vld [vmem:[#allocation93_spill] sm:$0xff] }
 0x24d   : > { %v5016_v23 = vadd.f32 %v911_v17, %v4852_v47  ;;  %v912_v25 = vmul.f32 %v3557_v51, %v6343_v27  ;;  %v915_v12 = vmul.f32 %v3557_v51, %v6344_v60  ;;  %v914_v3 = vmul.f32 %v3557_v51, %v6345_v24  ;;  %v5021_v10 = vpop.permute.xlu1 %2059  ;;  %v5023_v39 = vpop.permute.xlu0 %2054  ;;  %v6349_v15 = vld [vmem:[#allocation62_spill] sm:$0xff]  ;;  %v6350_v54 = vld [vmem:[#allocation95_spill] sm:$0xff]  ;;  %v6352_v24 = vld [vmem:[#allocation4_spill] sm:$0xff] }
 0x24e   : > { %6342 = vst [vmem:[#allocation67_spill] sm:$0xff] %v5013_v19  ;;  %v917_v11 = vmul.f32 %v3557_v51, %v6346_v33  ;;  %v916_v34 = vmul.f32 %v3557_v51, %v6347_v20  ;;  %v919_v63 = vmul.f32 %v3557_v51, %v6348_v37  ;;  %2473 = vperm.xlu1 %3555, %v3517_v9   ;;  %v6351_v27 = vld [vmem:[#allocation3_spill] sm:$0xff]  ;;  %v6353_v19 = vld [vmem:[#allocation5_spill] sm:$0xff]  ;;  %v6354_v33 = vld [vmem:[#allocation6_spill] sm:$0xff] }
 0x24f   : > { %2463 = vperm.xlu0 %3554, %v6349_v15   ;;  %v942_v47 = vadd.f32 %v910_v8, %v4855_v29  ;;  %v945_v17 = vadd.f32 %v913_v22, %v4858_v32  ;;  %v918_v50 = vmul.f32 %v3557_v51, %v6350_v54  ;;  %v920_v60 = vmul.f32 %v3557_v51, %v6351_v27  ;;  %v6355_v20 = vld [vmem:[#allocation7_spill] sm:$0xff]  ;;  %v6357_v32 = vld [vmem:[#allocation8_spill] sm:$0xff] }
 0x250   : > { %v922_v62 = vmul.f32 %v3557_v51, %v6352_v24  ;;  %v924_v18 = vmul.f32 %v3557_v51, %v6353_v19  ;;  %v926_v55 = vmul.f32 %v3557_v51, %v6354_v33  ;;  %v1162_v37 = vmul.f32 %v6356_v44, %v6355_v20  ;;  %v6360_v24 = vld [vmem:[#allocation11_spill] sm:$0xff]  ;;  %v6366_v20 = vld [vmem:[#allocation25_spill] sm:$0xff] }
 0x251   : > { %v944_v9 = vadd.f32 %v912_v25, %v4874_v13  ;;  %v947_v15 = vadd.f32 %v915_v12, %v4877_v2  ;;  %v5041_v29 = vadd.f32 %v914_v3, %v4890_v43  ;;  %v1161_v8 = vmul.f32 %v6356_v44, %v6357_v32  ;;  %v5045_v22 = vpop.permute.xlu1 %2069  ;;  %v5047_v54 = vpop.permute.xlu0 %2064  ;;  %v6358_v13 = vld [vmem:[#allocation9_spill] sm:$0xff]  ;;  %v6359_v12 = vld [vmem:[#allocation10_spill] sm:$0xff] }
 0x252   : > { %v949_v19 = vadd.f32 %v917_v11, %v4893_v21  ;;  %v5051_v51 = vadd.f32 %v916_v34, %v4896_v16  ;;  %v5054_v27 = vadd.f32 %v919_v63, %v4903_v30  ;;  %v1164_v2 = vmul.f32 %v6356_v44, %v6358_v13  ;;  %v6361_v34 = vld [vmem:[#allocation16_spill] sm:$0xff] }
 0x253   : > { %v5059_v43 = vadd.f32 %v918_v50, %v4906_v6  ;;  %v5062_v25 = vadd.f32 %v920_v60, %v4911_v31  ;;  %v1163_v3 = vmul.f32 %v6356_v44, %v6359_v12  ;;  %v1166_v21 = vmul.f32 %v6356_v44, %v6360_v24  ;;  %v6362_v50 = vld [vmem:[#allocation17_spill] sm:$0xff]  ;;  %v6367_v13 = vld [vmem:[#allocation28_spill] sm:$0xff] }
 0x254   : > { %v5069_v16 = vadd.f32 %v922_v62, %v4914_v52  ;;  %v5072_v30 = vadd.f32 %v924_v18, %v4923_v36  ;;  %v5075_v11 = vadd.f32 %v926_v55, %v4926_v42  ;;  %v5078_v6 = vadd.f32 %v1162_v37, %v4929_v53  ;;  %v6363_v52 = vld [vmem:[#allocation20_spill] sm:$0xff]  ;;  %v6364_v53 = vld [vmem:[#allocation21_spill] sm:$0xff] }
 0x255   : > { %v5081_v31 = vadd.f32 %v1161_v8, %v4935_v38  ;;  %v1165_v63 = vmul.f32 %v6356_v44, %v6361_v34  ;;  %v1168_v60 = vmul.f32 %v6356_v44, %v6362_v50  ;;  %v1167_v62 = vmul.f32 %v6356_v44, %v6363_v52  ;;  %v5089_v36 = vpop.permute.xlu1 %2079  ;;  %v5091_v18 = vpop.permute.xlu0 %2074  ;;  %v6365_v55 = vld [vmem:[#allocation24_spill] sm:$0xff]  ;;  %v6368_v24 = vld [vmem:[#allocation29_spill] sm:$0xff] }
 0x256   : > { %v5094_v42 = vadd.f32 %v1164_v2, %v4951_v28  ;;  %v1170_v38 = vmul.f32 %v6356_v44, %v6364_v53  ;;  %v1169_v33 = vmul.f32 %v6356_v44, %v6365_v55  ;;  %v1172_v37 = vmul.f32 %v6356_v44, %v6366_v20  ;;  %v6369_v2 = vld [vmem:[#allocation32_spill] sm:$0xff]  ;;  %v6370_v50 = vld [vmem:[#allocation33_spill] sm:$0xff] }
 0x257   : > { %v1195_v32 = vadd.f32 %v1163_v3, %v4954_v14  ;;  %v1198_v8 = vadd.f32 %v1166_v21, %v4972_v46  ;;  %v1171_v12 = vmul.f32 %v6356_v44, %v6367_v13  ;;  %v1174_v28 = vmul.f32 %v6356_v44, %v6368_v24  ;;  %v6371_v53 = vld [vmem:[#allocation36_spill] sm:$0xff]  ;;  %v6372_v20 = vld [vmem:[#allocation37_spill] sm:$0xff] }
 0x258   : > { %v1173_v34 = vmul.f32 %v6356_v44, %v6369_v2  ;;  %v1176_v52 = vmul.f32 %v6356_v44, %v6370_v50  ;;  %v1175_v55 = vmul.f32 %v6356_v44, %v6371_v53  ;;  %v1178_v14 = vmul.f32 %v6356_v44, %v6372_v20  ;;  %v6373_v13 = vld [vmem:[#allocation40_spill] sm:$0xff] }
 0x259   : > { %v1197_v46 = vadd.f32 %v1165_v63, %v4975_v4  ;;  %v1200_v3 = vadd.f32 %v1168_v60, %v4978_v56  ;;  %v5119_v21 = vadd.f32 %v1167_v62, %v4985_v57  ;;  %v1177_v24 = vmul.f32 %v6356_v44, %v6373_v13  ;;  %v5123_v2 = vpop.permute.xlu1 %2089  ;;  %v5125_v49 = vpop.permute.xlu0 %2084  ;;  %v3558_v4 = vld [vmem:[%s5979_s1 + $0x3] ss:$0 sm:$0xff]  ;;  %v6374_v56 = vld [vmem:[#allocation41_spill] sm:$0xff]  ;;  %v6375_v60 = vld [vmem:[#allocation44_spill] sm:$0xff] }
 0x25a   : > { %v1202_v50 = vadd.f32 %v1170_v38, %v4988_v26  ;;  %v5129_v53 = vadd.f32 %v1169_v33, %v4992_v1  ;;  %v5132_v20 = vadd.f32 %v1172_v37, %v4995_v5  ;;  %v1180_v57 = vmul.f32 %v3558_v4, %v6374_v56  ;;  %v6376_v62 = vld [vmem:[#allocation45_spill] sm:$0xff]  ;;  %v6379_v56 = vld [vmem:[#allocation52_spill] sm:$0xff] }
 0x25b   : > { %v5139_v44 = vadd.f32 %v1171_v12, %v5004_v58  ;;  %v5142_v63 = vadd.f32 %v1174_v28, %v5007_v0  ;;  %v1179_v26 = vmul.f32 %v3558_v4, %v6375_v60  ;;  %v1182_v1 = vmul.f32 %v3558_v4, %v6376_v62  ;;  %v6377_v58 = vld [vmem:[#allocation48_spill] sm:$0xff]  ;;  %v6378_v0 = vld [vmem:[#allocation49_spill] sm:$0xff] }
 0x25c   : > { %v5147_v38 = vadd.f32 %v1173_v34, %v5010_v61  ;;  %v5150_v5 = vadd.f32 %v1176_v52, %v5016_v23  ;;  %v5152_v33 = vadd.f32 %v1175_v55, %v942_v47  ;;  %v5154_v37 = vadd.f32 %v1178_v14, %v945_v17  ;;  %v6381_v23 = vld [vmem:[#allocation56_spill] sm:$0xff]  ;;  %v6382_v47 = vld [vmem:[#allocation57_spill] sm:$0xff]  ;;  %v6383_v17 = vld [vmem:[#allocation59_spill] sm:$0xff] }
 0x25d   : > { %v5156_v13 = vadd.f32 %v1177_v24, %v944_v9  ;;  %v1181_v12 = vmul.f32 %v3558_v4, %v6377_v58  ;;  %v1184_v28 = vmul.f32 %v3558_v4, %v6378_v0  ;;  %v1183_v60 = vmul.f32 %v3558_v4, %v6379_v56  ;;  %v5161_v40 = vpop.permute.xlu1 %2099  ;;  %v5163_v62 = vpop.permute.xlu0 %2094  ;;  %v6384_v24 = vld [vmem:[#allocation60_spill] sm:$0xff]  ;;  %v6385_v0 = vld [vmem:[#allocation65_spill] sm:$0xff] }
 0x25e   : > { %6380 = vst [vmem:[#allocation43_spill] sm:$0xff] %v5161_v40  ;;  %v5165_v61 = vadd.f32 %v1180_v57, %v947_v15  ;;  %v1185_v34 = vmul.f32 %v3558_v4, %v6381_v23  ;;  %v1187_v52 = vmul.f32 %v3558_v4, %v6382_v47  ;;  %v1189_v55 = vmul.f32 %v3558_v4, %v6383_v17  ;;  %v6388_v40 = vld [vmem:[#allocation97_spill] sm:$0xff]  ;;  %v6389_v57 = vld [vmem:[#allocation98_spill] sm:$0xff]  ;;  %v6390_v47 = vld [vmem:[#allocation99_spill] sm:$0xff] }
 0x25f   : > { %v1211_v9 = vadd.f32 %v1179_v26, %v5041_v29  ;;  %v1214_v14 = vadd.f32 %v1182_v1, %v949_v19  ;;  %v1191_v58 = vmul.f32 %v3558_v4, %v6384_v24  ;;  %v1426_v56 = vmul.f32 %v6386_v7, %v6385_v0  ;;  %v6391_v26 = vld [vmem:[#allocation100_spill] sm:$0xff] }
 0x260   : > { %v1425_v48 = vmul.f32 %v6386_v7, %v6387_v45  ;;  %v1428_v15 = vmul.f32 %v6386_v7, %v6388_v40  ;;  %v1427_v23 = vmul.f32 %v6386_v7, %v6389_v57  ;;  %v1430_v17 = vmul.f32 %v6386_v7, %v6390_v47  ;;  %v6395_v47 = vld [vmem:[#allocation103_spill] sm:$0xff] }
 0x261   : > { %v1213_v29 = vadd.f32 %v1181_v12, %v5051_v51  ;;  %v1216_v19 = vadd.f32 %v1184_v28, %v5054_v27  ;;  %v1215_v4 = vadd.f32 %v1183_v60, %v5059_v43  ;;  %v1429_v1 = vmul.f32 %v6386_v7, %v6391_v26  ;;  %v5187_v24 = vpop.permute.xlu1 %2109  ;;  %v5189_v45 = vpop.permute.xlu0 %2104  ;;  %v6393_v51 = vld [vmem:[#allocation101_spill] sm:$0xff]  ;;  %v6394_v28 = vld [vmem:[#allocation102_spill] sm:$0xff] }
 0x262   : > { %6392 = vst [vmem:[#allocation46_spill] sm:$0xff] %v5187_v24  ;;  %v1217_v40 = vadd.f32 %v1185_v34, %v5062_v25  ;;  %v5193_v0 = vadd.f32 %v1187_v52, %v5069_v16  ;;  %v5196_v57 = vadd.f32 %v1189_v55, %v5072_v30  ;;  %v1432_v27 = vmul.f32 %v6386_v7, %v6393_v51  ;;  %v6398_v26 = vld [vmem:[#allocation106_spill] sm:$0xff] }
 0x263   : > { %v5201_v43 = vadd.f32 %v1191_v58, %v5075_v11  ;;  %v5204_v12 = vadd.f32 %v1426_v56, %v5078_v6  ;;  %v1431_v60 = vmul.f32 %v6386_v7, %v6394_v28  ;;  %v1434_v25 = vmul.f32 %v6386_v7, %v6395_v47  ;;  %v6396_v6 = vld [vmem:[#allocation104_spill] sm:$0xff]  ;;  %v6397_v58 = vld [vmem:[#allocation105_spill] sm:$0xff]  ;;  %v6404_v47 = vld [vmem:[#allocation110_spill] sm:$0xff] }
 0x264   : > { %v5211_v16 = vadd.f32 %v1425_v48, %v5081_v31  ;;  %v5214_v30 = vadd.f32 %v1428_v15, %v5094_v42  ;;  %v5216_v34 = vadd.f32 %v1427_v23, %v1195_v32  ;;  %v5218_v52 = vadd.f32 %v1430_v17, %v1198_v8  ;;  %v6401_v32 = vld [vmem:[#allocation107_spill] sm:$0xff]  ;;  %v6403_v23 = vld [vmem:[#allocation109_spill] sm:$0xff]  ;;  %v6408_v24 = vld [vmem:[#allocation114_spill] sm:$0xff] }
 0x265   : > { %v5220_v11 = vadd.f32 %v1429_v1, %v1197_v46  ;;  %v1433_v55 = vmul.f32 %v6386_v7, %v6396_v6  ;;  %v1436_v56 = vmul.f32 %v6386_v7, %v6397_v58  ;;  %v1435_v51 = vmul.f32 %v6386_v7, %v6398_v26  ;;  %v5228_v48 = vpop.permute.xlu1 %2119  ;;  %v5230_v31 = vpop.permute.xlu0 %2114  ;;  %v6402_v46 = vld [vmem:[#allocation108_spill] sm:$0xff]  ;;  %v6405_v58 = vld [vmem:[#allocation111_spill] sm:$0xff] }
 0x266   : > { %6399 = vst [vmem:[#allocation47_spill] sm:$0xff] %v5228_v48  ;;  %6400 = vst [vmem:[#allocation68_spill] sm:$0xff] %v5230_v31  ;;  %v5232_v42 = vadd.f32 %v1432_v27, %v1200_v3  ;;  %v1438_v8 = vmul.f32 %v6386_v7, %v6401_v32  ;;  %v1437_v15 = vmul.f32 %v6386_v7, %v6402_v46  ;;  %v6406_v3 = vld [vmem:[#allocation112_spill] sm:$0xff]  ;;  %v6407_v48 = vld [vmem:[#allocation113_spill] sm:$0xff] }
 0x267   : > { %v1440_v17 = vmul.f32 %v6386_v7, %v6403_v23  ;;  %v1463_v1 = vadd.f32 %v1431_v60, %v5119_v21  ;;  %v1466_v28 = vadd.f32 %v1434_v25, %v1202_v50  ;;  %v1439_v6 = vmul.f32 %v6386_v7, %v6404_v47  ;;  %v6409_v31 = vld [vmem:[#allocation115_spill] sm:$0xff]  ;;  %v6410_v25 = vld [vmem:[#allocation116_spill] sm:$0xff] }
 0x268   : > { %v1442_v26 = vmul.f32 %v6386_v7, %v6405_v58  ;;  %v1441_v27 = vmul.f32 %v6386_v7, %v6406_v3  ;;  %v1444_v32 = vmul.f32 %v6386_v7, %v6407_v48  ;;  %v1443_v46 = vmul.f32 %v6386_v7, %v6408_v24 }
 0x269   : > { %v1446_v23 = vmul.f32 %v6386_v7, %v6409_v31  ;;  %v5254_v21 = vadd.f32 %v1433_v55, %v5129_v53  ;;  %v5257_v50 = vadd.f32 %v1436_v56, %v5132_v20  ;;  %v5260_v60 = vadd.f32 %v1435_v51, %v5139_v44  ;;  %v5264_v58 = vpop.permute.xlu1 %2129  ;;  %v5266_v48 = vpop.permute.xlu0 %2124  ;;  %v6412_v20 = vld [vmem:[#allocation117_spill] sm:$0xff]  ;;  %v6413_v51 = vld [vmem:[#allocation118_spill] sm:$0xff] }
 0x26a   : > { %v1445_v47 = vmul.f32 %v6386_v7, %v6410_v25  ;;  %6411 = vst [vmem:[#allocation50_spill] sm:$0xff] %v5264_v58  ;;  %v5269_v24 = vadd.f32 %v1438_v8, %v5142_v63  ;;  %v5272_v31 = vadd.f32 %v1437_v15, %v5147_v38  ;;  %v5275_v53 = vadd.f32 %v1440_v17, %v5150_v5  ;;  %v6414_v63 = vld [vmem:[#allocation120_spill] sm:$0xff] }
 0x26b   : > { %v1448_v44 = vmul.f32 %v6386_v7, %v6412_v20  ;;  %v5280_v55 = vadd.f32 %v1439_v6, %v5152_v33  ;;  %v5283_v56 = vadd.f32 %v1442_v26, %v5154_v37  ;;  %v1447_v3 = vmul.f32 %v6386_v7, %v6413_v51  ;;  %v6415_v6 = vld [vmem:[#allocation121_spill] sm:$0xff]  ;;  %v6416_v26 = vld [vmem:[#allocation122_spill] sm:$0xff]  ;;  %v6417_v20 = vld [vmem:[#allocation123_spill] sm:$0xff] }
 0x26c   : > { %v1449_v8 = vmul.f32 %v6386_v7, %v6414_v63  ;;  %v5290_v38 = vadd.f32 %v1441_v27, %v5156_v13  ;;  %v5293_v5 = vadd.f32 %v1444_v32, %v5165_v61  ;;  %v5295_v15 = vadd.f32 %v1443_v46, %v1211_v9  ;;  %v6420_v9 = vld [vmem:[#allocation124_spill] sm:$0xff]  ;;  %v6423_v46 = vld [vmem:[#allocation126_spill] sm:$0xff] }
 0x26d   : > { %v1478_v17 = vadd.f32 %v1446_v23, %v1214_v14  ;;  %v5297_v33 = vadd.f32 %v1445_v47, %v1213_v29  ;;  %v1451_v37 = vmul.f32 %v6386_v7, %v6415_v6  ;;  %v1453_v25 = vmul.f32 %v6386_v7, %v6416_v26  ;;  %v5305_v63 = vpop.permute.xlu1 %2139  ;;  %v5307_v13 = vpop.permute.xlu0 %2134  ;;  %v6421_v27 = vld [vmem:[#allocation148_spill] sm:$0xff]  ;;  %v6422_v29 = vld [vmem:[#allocation125_spill] sm:$0xff] }
 0x26e   : > { %v1455_v51 = vmul.f32 %v6386_v7, %v6417_v20  ;;  %6418 = vst [vmem:[#allocation51_spill] sm:$0xff] %v5305_v63  ;;  %6419 = vst [vmem:[#allocation54_spill] sm:$0xff] %v5307_v13  ;;  %v5309_v61 = vadd.f32 %v1448_v44, %v1216_v19  ;;  %v1690_v14 = vmul.f32 %v6421_v27, %v6420_v9  ;;  %v6424_v7 = vld [vmem:[#allocation127_spill] sm:$0xff]  ;;  %v6425_v20 = vld [vmem:[#allocation128_spill] sm:$0xff] }
 0x26f   : > { %v1689_v32 = vmul.f32 %v6421_v27, %v6422_v29  ;;  %v1692_v23 = vmul.f32 %v6421_v27, %v6423_v46  ;;  %v5317_v47 = vadd.f32 %v1447_v3, %v1215_v4  ;;  %v5319_v6 = vadd.f32 %v1449_v8, %v1217_v40  ;;  %v6426_v44 = vld [vmem:[#allocation129_spill] sm:$0xff]  ;;  %v6427_v9 = vld [vmem:[#allocation130_spill] sm:$0xff]  ;;  %v6428_v29 = vld [vmem:[#allocation131_spill] sm:$0xff] }
 0x270   : > { %v1691_v26 = vmul.f32 %v6421_v27, %v6424_v7  ;;  %v1694_v19 = vmul.f32 %v6421_v27, %v6425_v20  ;;  %v1693_v63 = vmul.f32 %v6421_v27, %v6426_v44  ;;  %v1696_v58 = vmul.f32 %v6421_v27, %v6427_v9  ;;  %v6429_v46 = vld [vmem:[#allocation144_spill] sm:$0xff] }
 0x271   : > { %v1695_v13 = vmul.f32 %v6421_v27, %v6428_v29  ;;  %v1710_v4 = vmul.f32 %v6421_v27, %v6429_v46  ;;  %v5334_v40 = vadd.f32 %v1451_v37, %v5193_v0  ;;  %v5337_v3 = vadd.f32 %v1453_v25, %v5196_v57  ;;  %v6430_v7 = vld [vmem:[#allocation132_spill] sm:$0xff]  ;;  %v5344_v44 = vpop.permute.xlu1 %2149  ;;  %v5346_v9 = vpop.permute.xlu0 %2144  ;;  %v6433_v25 = vld [vmem:[#allocation133_spill] sm:$0xff] }
 0x272   : > { %v5340_v8 = vadd.f32 %v1455_v51, %v5201_v43  ;;  %v1698_v20 = vmul.f32 %v6421_v27, %v6430_v7  ;;  %6431 = vst [vmem:[#allocation55_spill] sm:$0xff] %v5344_v44  ;;  %6432 = vst [vmem:[#allocation58_spill] sm:$0xff] %v5346_v9  ;;  %v5349_v29 = vadd.f32 %v1690_v14, %v5204_v12  ;;  %v6434_v12 = vld [vmem:[#allocation134_spill] sm:$0xff]  ;;  %v6437_v7 = vld [vmem:[#allocation137_spill] sm:$0xff] }
 0x273   : > { %v5352_v46 = vadd.f32 %v1689_v32, %v5211_v16  ;;  %v5355_v0 = vadd.f32 %v1692_v23, %v5214_v30  ;;  %v1975_v57 = vmul.f32 %v4866_v41, %v4783_v35  ;;  %v5360_v43 = vadd.f32 %v1691_v26, %v5216_v34  ;;  %v6435_v23 = vld [vmem:[#allocation135_spill] sm:$0xff]  ;;  %v6436_v26 = vld [vmem:[#allocation136_spill] sm:$0xff] }
 0x274   : > { %v5363_v37 = vadd.f32 %v1694_v19, %v5218_v52  ;;  %v1697_v51 = vmul.f32 %v6421_v27, %v6433_v25  ;;  %v1700_v14 = vmul.f32 %v6421_v27, %v6434_v12  ;;  %v5370_v16 = vadd.f32 %v1693_v63, %v5220_v11  ;;  %v5388_v11 = vld [vmem:[%s5979_s1 + $0x7] ss:$0 sm:$0xff] }
 0x275   : > { %v5373_v30 = vadd.f32 %v1696_v58, %v5232_v42  ;;  %v5375_v32 = vadd.f32 %v1695_v13, %v1463_v1  ;;  %v1742_v35 = vadd.f32 %v1710_v4, %v1478_v17  ;;  %v5377_v34 = vadd.f32 %v1698_v20, %v1466_v28  ;;  %v2160_v42 = vpop.permute.xlu1 %2159  ;;  %v5390_v1 = vpop.permute.xlu0 %2154  ;;  %v6439_v58 = vld [vmem:[#allocation138_spill] sm:$0xff]  ;;  %v6440_v17 = vld [vmem:[#allocation139_spill] sm:$0xff] }
 0x276   : > { %v1699_v52 = vmul.f32 %v6421_v27, %v6435_v23  ;;  %v1702_v19 = vmul.f32 %v6421_v27, %v6436_v26  ;;  %v1701_v25 = vmul.f32 %v6421_v27, %v6437_v7  ;;  %6438 = vst [vmem:[#allocation69_spill] sm:$0xff] %v5390_v1  ;;  %v1704_v28 = vmul.f32 %v6421_v27, %v6439_v58  ;;  %v6441_v23 = vld [vmem:[#allocation140_spill] sm:$0xff]  ;;  %v6442_v7 = vld [vmem:[#allocation141_spill] sm:$0xff]  ;;  %v6443_v1 = vld [vmem:[#allocation142_spill] sm:$0xff] }
 0x277   : > { %v1703_v63 = vmul.f32 %v6421_v27, %v6440_v17  ;;  %v2007_v13 = vadd.f32 %v1975_v57, %v1742_v35  ;;  %v2239_v4 = vmul.f32 %v5388_v11, %v2160_v42  ;;  %v5398_v20 = vadd.f32 %v1697_v51, %v5254_v21  ;;  %v6444_v9 = vld [vmem:[#allocation143_spill] sm:$0xff]  ;;  %v6445_v35 = vld [vmem:[#allocation145_spill] sm:$0xff] }
 0x278   : > { %v5401_v12 = vadd.f32 %v1700_v14, %v5257_v50  ;;  %v1706_v26 = vmul.f32 %v6421_v27, %v6441_v23  ;;  %v1705_v44 = vmul.f32 %v6421_v27, %v6442_v7  ;;  %v1708_v58 = vmul.f32 %v6421_v27, %v6443_v1  ;;  %v6446_v14 = vld [vmem:[#allocation146_spill] sm:$0xff]  ;;  %v6447_v23 = vld [vmem:[#allocation147_spill] sm:$0xff] }
 0x279   : > { %v1707_v57 = vmul.f32 %v6421_v27, %v6444_v9  ;;  %v1709_v42 = vmul.f32 %v6421_v27, %v6445_v35  ;;  %v5413_v21 = vadd.f32 %v2239_v4, %v2007_v13  ;;  %v5416_v50 = vadd.f32 %v1699_v52, %v5260_v60  ;;  %v5425_v7 = vpop.permute.xlu1 %2169  ;;  %v5427_v9 = vpop.permute.xlu0 %2164 }
 0x27a   : > { %v5419_v51 = vadd.f32 %v1702_v19, %v5269_v24  ;;  %v1712_v17 = vmul.f32 %v6421_v27, %v6446_v14  ;;  %v1711_v1 = vmul.f32 %v6421_v27, %v6447_v23  ;;  %v5430_v35 = vadd.f32 %v1701_v25, %v5272_v31  ;;  %v6448_v24 = vld [vmem:[#allocation149_spill] sm:$0xff]  ;;  %v6449_v14 = vld [vmem:[#allocation150_spill] sm:$0xff]  ;;  %v6450_v31 = vld [vmem:[#allocation152_spill] sm:$0xff] }
 0x27b   : > { %v5433_v13 = vadd.f32 %v1704_v28, %v5275_v53  ;;  %v5436_v60 = vadd.f32 %v1703_v63, %v5280_v55  ;;  %v1713_v52 = vmul.f32 %v6421_v27, %v6448_v24  ;;  %v5441_v19 = vadd.f32 %v1706_v26, %v5283_v56  ;;  %v6451_v56 = vld [vmem:[#allocation157_spill] sm:$0xff]  ;;  %v6452_v26 = vld [vmem:[#allocation154_spill] sm:$0xff] }
 0x27c   : > { %v5444_v4 = vadd.f32 %v1705_v44, %v5290_v38  ;;  %v1715_v23 = vmul.f32 %v6421_v27, %v6449_v14  ;;  %v1717_v25 = vmul.f32 %v6421_v27, %v6450_v31  ;;  %v5451_v53 = vadd.f32 %v1708_v58, %v5293_v5  ;;  %v6453_v5 = vld [vmem:[#allocation156_spill] sm:$0xff] }
 0x27d   : > { %v5454_v55 = vadd.f32 %v1707_v57, %v5295_v15  ;;  %v5457_v28 = vadd.f32 %v1709_v42, %v5297_v33  ;;  %v1954_v63 = vmul.f32 %v4866_v41, %v6451_v56  ;;  %v5462_v38 = vadd.f32 %v1712_v17, %v5309_v61  ;;  %v2180_v15 = vpop.permute.xlu1 %2179  ;;  %v5471_v57 = vpop.permute.xlu0 %2174  ;;  %v6454_v42 = vld [vmem:[#allocation158_spill] sm:$0xff]  ;;  %v6456_v56 = vld [vmem:[#allocation160_spill] sm:$0xff] }
 0x27e   : > { %v5465_v44 = vadd.f32 %v1711_v1, %v5317_v47  ;;  %v1719_v24 = vmul.f32 %v6421_v27, %v6452_v26  ;;  %v1955_v58 = vmul.f32 %v4866_v41, %v6453_v5  ;;  %v5474_v33 = vadd.f32 %v1713_v52, %v5319_v6  ;;  %v6455_v1 = vld [vmem:[#allocation159_spill] sm:$0xff]  ;;  %v5494_v52 = vld [vmem:[%s5979_s1 + $0x8] ss:$0 sm:$0xff]  ;;  %v6457_v26 = vld [vmem:[#allocation161_spill] sm:$0xff] }
 0x27f   : > { %v1957_v14 = vmul.f32 %v4866_v41, %v6454_v42  ;;  %v2218_v61 = vmul.f32 %v5388_v11, %v5023_v39  ;;  %v2243_v47 = vmul.f32 %v5388_v11, %v2180_v15  ;;  %v5482_v17 = vadd.f32 %v1715_v23, %v5334_v40  ;;  %v6458_v23 = vld [vmem:[#allocation162_spill] sm:$0xff]  ;;  %v6460_v42 = vld [vmem:[#allocation163_spill] sm:$0xff] }
 0x280   : > { %v5485_v27 = vadd.f32 %v1717_v25, %v5337_v3  ;;  %v1956_v31 = vmul.f32 %v4866_v41, %v6455_v1  ;;  %v1959_v6 = vmul.f32 %v4866_v41, %v6456_v56  ;;  %v1986_v39 = vadd.f32 %v1954_v63, %v5352_v46 }
 0x281   : > { %v1958_v40 = vmul.f32 %v4866_v41, %v6457_v26  ;;  %v1961_v3 = vmul.f32 %v4866_v41, %v6458_v23  ;;  %v5502_v25 = vadd.f32 %v2243_v47, %v4887_v59  ;;  %v5505_v5 = vadd.f32 %v1719_v24, %v5340_v8  ;;  %v2319_v63 = vpop.permute.xlu1 %2318  ;;  %v5512_v56 = vpop.permute.xlu0 %2184  ;;  %v6462_v47 = vld [vmem:[#allocation165_spill] sm:$0xff] }
 0x282   : > { %v1987_v15 = vadd.f32 %v1955_v58, %v5349_v29  ;;  %v1960_v1 = vmul.f32 %v4866_v41, %v6460_v42  ;;  %v2220_v46 = vmul.f32 %v5388_v11, %v5047_v54  ;;  %v5515_v26 = vadd.f32 %v1957_v14, %v5355_v0  ;;  %v6461_v58 = vld [vmem:[#allocation164_spill] sm:$0xff]  ;;  %v5531_v0 = vld [vmem:[%s5980_s2] ss:$0 sm:$0xff] }
 0x283   : > { %6459 = vst [vmem:[#allocation61_spill] sm:$0xff] %v5502_v25  ;;  %v2250_v23 = vadd.f32 %v2218_v61, %v1986_v39  ;;  %v2222_v59 = vmul.f32 %v5388_v11, %v5091_v18  ;;  %v2482_v8 = vmul.f32 %v5494_v52, %v2319_v63  ;;  %v1988_v29 = vadd.f32 %v1956_v31, %v5360_v43  ;;  %v6463_v43 = vld [vmem:[#allocation166_spill] sm:$0xff] }
 0x284   : > { %v5522_v24 = vadd.f32 %v1959_v6, %v5363_v37  ;;  %v1963_v54 = vmul.f32 %v4866_v41, %v6461_v58  ;;  %v1962_v42 = vmul.f32 %v4866_v41, %v6462_v47  ;;  %v1990_v18 = vadd.f32 %v1958_v40, %v5370_v16 }
 0x285   : > { %v5535_v14 = vadd.f32 %v1961_v3, %v5373_v30  ;;  %v1965_v37 = vmul.f32 %v4866_v41, %v6463_v43  ;;  %v2514_v61 = vadd.f32 %v2482_v8, %v2250_v23  ;;  %v1992_v31 = vadd.f32 %v1960_v1, %v5375_v32  ;;  %v2339_v58 = vpop.permute.xlu1 %2338  ;;  %v2329_v47 = vpop.permute.xlu0 %2328  ;;  %v6464_v1 = vld [vmem:[#allocation167_spill] sm:$0xff] }
 0x286   : > { %v2252_v6 = vadd.f32 %v2220_v46, %v1988_v29  ;;  %v2224_v39 = vmul.f32 %v5388_v11, %v5125_v49  ;;  %v2226_v63 = vmul.f32 %v5388_v11, %v5163_v62  ;;  %v2254_v25 = vadd.f32 %v2222_v59, %v1990_v18  ;;  %v6465_v46 = vld [vmem:[#allocation168_spill] sm:$0xff] }
 0x287   : > { %v2553_v16 = vadd.f32 %v5531_v0, %v2514_v61  ;;  %v2486_v30 = vmul.f32 %v5494_v52, %v2339_v58  ;;  %v2484_v40 = vmul.f32 %v5494_v52, %v2329_v47  ;;  %v5548_v3 = vadd.f32 %v1963_v54, %v5377_v34 }
 0x288   : > { %v1994_v32 = vadd.f32 %v1962_v42, %v5398_v20  ;;  %v1964_v49 = vmul.f32 %v4866_v41, %v6464_v1  ;;  %v1967_v62 = vmul.f32 %v4866_v41, %v6465_v46  ;;  %v5556_v23 = vadd.f32 %v1965_v37, %v5401_v12 }
 0x289   : > { %v2585_v59 = vmax.f32 %v2553_v16, 0.0  ;;  %v2518_v8 = vadd.f32 %v2486_v30, %v2254_v25  ;;  %v2516_v29 = vadd.f32 %v2484_v40, %v2252_v6  ;;  %v2219_v18 = vmul.f32 %v5388_v11, %v5021_v10  ;;  %v2359_v54 = vpop.permute.xlu1 %2358  ;;  %v2349_v42 = vpop.permute.xlu0 %2348 }
 0x28a   : > { %v2256_v43 = vadd.f32 %v2224_v39, %v1992_v31  ;;  %v2258_v34 = vadd.f32 %v2226_v63, %v1994_v32  ;;  %v2228_v20 = vmul.f32 %v5388_v11, %v5189_v45  ;;  %v2490_v37 = vmul.f32 %v5494_v52, %v2359_v54  ;;  %v6466_v31 = vld [vmem:[#allocation169_spill] sm:$0xff]  ;;  %v6467_v39 = vld [vmem:[#allocation170_spill] sm:$0xff] }
 0x28b   : > { %2618 = vst.msk [vmem:[#allocation2] sm:$0xff] %vm2617_vm0, %v2585_v59  ;;  %v2557_v61 = vadd.f32 %v5531_v0, %v2518_v8  ;;  %v2555_v12 = vadd.f32 %v5531_v0, %v2516_v29  ;;  %v2488_v25 = vmul.f32 %v5494_v52, %v2349_v42  ;;  %v1996_v6 = vadd.f32 %v1964_v49, %v5416_v50 }
 0x28c   : > { %v5569_v10 = vadd.f32 %v1967_v62, %v5419_v51  ;;  %v1966_v45 = vmul.f32 %v4866_v41, %v6466_v31  ;;  %v1969_v63 = vmul.f32 %v4866_v41, %v6467_v39  ;;  %v2522_v16 = vadd.f32 %v2490_v37, %v2258_v34  ;;  %v6470_v37 = vld [vmem:[#allocation68_spill] sm:$0xff] }
 0x28d   : > { %v2589_v58 = vmax.f32 %v2557_v61, 0.0  ;;  %v2587_v47 = vmax.f32 %v2555_v12, 0.0  ;;  %v2520_v30 = vadd.f32 %v2488_v25, %v2256_v43  ;;  %v2251_v40 = vadd.f32 %v2219_v18, %v1987_v15  ;;  %v2324_v51 = vpop.permute.xlu1 %2323  ;;  %v2369_v49 = vpop.permute.xlu0 %2368  ;;  %v6469_v18 = vld [vmem:[#allocation12_spill] sm:$0xff] }
 0x28e   : > { %v2221_v32 = vmul.f32 %v5388_v11, %v5045_v22  ;;  %v2223_v50 = vmul.f32 %v5388_v11, %v5089_v36  ;;  %v2260_v1 = vadd.f32 %v2228_v20, %v1996_v6  ;;  %v2561_v46 = vadd.f32 %v5531_v0, %v2522_v16  ;;  %v6468_v36 = vld [vmem:[#allocation171_spill] sm:$0xff] }
 0x28f   : > { %2622 = vst.msk [vmem:[#allocation2 + $0x20] sm:$0xff] %vm2617_vm0, %v2589_v58  ;;  %2620 = vst.msk [vmem:[#allocation2 + $0x10] sm:$0xff] %vm2617_vm0, %v2587_v47  ;;  %v2559_v62 = vadd.f32 %v5531_v0, %v2520_v30  ;;  %v2483_v59 = vmul.f32 %v5494_v52, %v2324_v51  ;;  %v2492_v15 = vmul.f32 %v5494_v52, %v2369_v49  ;;  %v6472_v47 = vld [vmem:[#allocation14_spill] sm:$0xff]  ;;  %v6473_v51 = vld [vmem:[#allocation43_spill] sm:$0xff] }
 0x290   : > { %v1998_v22 = vadd.f32 %v1966_v45, %v5430_v35  ;;  %v5587_v8 = vadd.f32 %v1969_v63, %v5433_v13  ;;  %v1968_v29 = vmul.f32 %v4866_v41, %v6468_v36  ;;  %v1971_v43 = vmul.f32 %v4866_v41, %v6469_v18  ;;  %v6471_v63 = vld [vmem:[#allocation13_spill] sm:$0xff] }
 0x291   : > { %v2593_v34 = vmax.f32 %v2561_v46, 0.0  ;;  %v2591_v20 = vmax.f32 %v2559_v62, 0.0  ;;  %v2515_v54 = vadd.f32 %v2483_v59, %v2251_v40  ;;  %v2524_v42 = vadd.f32 %v2492_v15, %v2260_v1  ;;  %v2344_v25 = vpop.permute.xlu1 %2343  ;;  %v2334_v6 = vpop.permute.xlu0 %2333 }
 0x292   : > { %v2253_v61 = vadd.f32 %v2221_v32, %v5515_v26  ;;  %v2255_v12 = vadd.f32 %v2223_v50, %v5522_v24  ;;  %v2225_v35 = vmul.f32 %v5388_v11, %v5123_v2  ;;  %v2230_v13 = vmul.f32 %v5388_v11, %v6470_v37 }
 0x293   : > { %2626 = vst.msk [vmem:[#allocation2 + $0x40] sm:$0xff] %vm2617_vm0, %v2593_v34  ;;  %2624 = vst.msk [vmem:[#allocation2 + $0x30] sm:$0xff] %vm2617_vm0, %v2591_v20  ;;  %v2554_v31 = vadd.f32 %v5531_v0, %v2515_v54  ;;  %v2563_v45 = vadd.f32 %v5531_v0, %v2524_v42  ;;  %v2487_v26 = vmul.f32 %v5494_v52, %v2344_v25 }
 0x294   : > { %v2485_v24 = vmul.f32 %v5494_v52, %v2334_v6  ;;  %v2000_v39 = vadd.f32 %v1968_v29, %v5436_v60  ;;  %v5607_v2 = vadd.f32 %v1971_v43, %v5441_v19  ;;  %v1970_v58 = vmul.f32 %v4866_v41, %v6471_v63  ;;  %v6475_v43 = vld [vmem:[#allocation26_spill] sm:$0xff]  ;;  %v6478_v63 = vld [vmem:[#allocation27_spill] sm:$0xff] }
 0x295   : > { %v1973_v16 = vmul.f32 %v4866_v41, %v6472_v47  ;;  %v2586_v30 = vmax.f32 %v2554_v31, 0.0  ;;  %v2595_v40 = vmax.f32 %v2563_v45, 0.0  ;;  %v2519_v32 = vadd.f32 %v2487_v26, %v2255_v12  ;;  %v2379_v19 = vpop.permute.xlu1 %2378  ;;  %v2354_v62 = vpop.permute.xlu0 %2353  ;;  %v6479_v47 = vld [vmem:[#allocation30_spill] sm:$0xff] }
 0x296   : > { %v2517_v50 = vadd.f32 %v2485_v24, %v2253_v61  ;;  %v2257_v1 = vadd.f32 %v2225_v35, %v5535_v14  ;;  %v2227_v49 = vmul.f32 %v5388_v11, %v6473_v51  ;;  %v2262_v46 = vadd.f32 %v2230_v13, %v1998_v22  ;;  %v6476_v35 = vld [vmem:[#allocation46_spill] sm:$0xff]  ;;  %v6480_v51 = vld [vmem:[#allocation47_spill] sm:$0xff] }
 0x297   : > { %v2232_v60 = vmul.f32 %v5388_v11, %v5266_v48  ;;  %2619 = vst.msk [vmem:[#allocation2 + $0x8] sm:$0xff] %vm2617_vm0, %v2586_v30  ;;  %2628 = vst.msk [vmem:[#allocation2 + $0x50] sm:$0xff] %vm2617_vm0, %v2595_v40  ;;  %v2558_v59 = vadd.f32 %v5531_v0, %v2519_v32  ;;  %v2494_v36 = vmul.f32 %v5494_v52, %v2379_v19  ;;  %v6474_v48 = vld [vmem:[#allocation15_spill] sm:$0xff] }
 0x298   : > { %v2556_v15 = vadd.f32 %v5531_v0, %v2517_v50  ;;  %v2489_v14 = vmul.f32 %v5494_v52, %v2354_v62  ;;  %v2002_v29 = vadd.f32 %v1970_v58, %v5444_v4  ;;  %v5626_v22 = vadd.f32 %v1973_v16, %v5451_v53  ;;  %v6477_v4 = vld [vmem:[#allocation54_spill] sm:$0xff] }
 0x299   : > { %v1972_v18 = vmul.f32 %v4866_v41, %v6474_v48  ;;  %v1974_v34 = vmul.f32 %v4866_v41, %v6475_v43  ;;  %v2590_v20 = vmax.f32 %v2558_v59, 0.0  ;;  %v2526_v42 = vadd.f32 %v2494_v36, %v2262_v46  ;;  %v2364_v25 = vpop.permute.xlu1 %2363  ;;  %v2389_v6 = vpop.permute.xlu0 %2388 }
 0x29a   : > { %v2588_v54 = vmax.f32 %v2556_v15, 0.0  ;;  %v2521_v61 = vadd.f32 %v2489_v14, %v2257_v1  ;;  %v2259_v12 = vadd.f32 %v2227_v49, %v5548_v3  ;;  %v2229_v37 = vmul.f32 %v5388_v11, %v6476_v35 }
 0x29b   : > { %v2264_v13 = vadd.f32 %v2232_v60, %v2000_v39  ;;  %v2234_v53 = vmul.f32 %v5388_v11, %v6477_v4  ;;  %2623 = vst.msk [vmem:[#allocation2 + $0x28] sm:$0xff] %vm2617_vm0, %v2590_v20  ;;  %v2565_v31 = vadd.f32 %v5531_v0, %v2526_v42  ;;  %v2491_v26 = vmul.f32 %v5494_v52, %v2364_v25  ;;  %v6481_v60 = vld [vmem:[#allocation58_spill] sm:$0xff] }
 0x29c   : > { %2621 = vst.msk [vmem:[#allocation2 + $0x18] sm:$0xff] %vm2617_vm0, %v2588_v54  ;;  %v2560_v45 = vadd.f32 %v5531_v0, %v2521_v61  ;;  %v2496_v3 = vmul.f32 %v5494_v52, %v2389_v6  ;;  %v2004_v24 = vadd.f32 %v1972_v18, %v5454_v55  ;;  %v2006_v39 = vadd.f32 %v1974_v34, %v5457_v28  ;;  %v6483_v18 = vld [vmem:[#allocation34_spill] sm:$0xff] }
 0x29d   : > { %v1977_v58 = vmul.f32 %v4866_v41, %v6478_v63  ;;  %v1976_v16 = vmul.f32 %v4866_v41, %v6479_v47  ;;  %v2597_v30 = vmax.f32 %v2565_v31, 0.0  ;;  %v2523_v32 = vadd.f32 %v2491_v26, %v2259_v12  ;;  %v2399_v28 = vpop.permute.xlu1 %2398  ;;  %v2374_v19 = vpop.permute.xlu0 %2373  ;;  %v6484_v12 = vld [vmem:[#allocation50_spill] sm:$0xff] }
 0x29e   : > { %v2592_v40 = vmax.f32 %v2560_v45, 0.0  ;;  %v2528_v50 = vadd.f32 %v2496_v3, %v2264_v13  ;;  %v2261_v1 = vadd.f32 %v2229_v37, %v5556_v23  ;;  %v2231_v49 = vmul.f32 %v5388_v11, %v6480_v51  ;;  %v6486_v26 = vld [vmem:[#allocation38_spill] sm:$0xff] }
 0x29f   : > { %v2266_v46 = vadd.f32 %v2234_v53, %v2002_v29  ;;  %v2236_v55 = vmul.f32 %v5388_v11, %v6481_v60  ;;  %2630 = vst.msk [vmem:[#allocation2 + $0x60] sm:$0xff] %vm2617_vm0, %v2597_v30  ;;  %v2562_v62 = vadd.f32 %v5531_v0, %v2523_v32  ;;  %v2498_v15 = vmul.f32 %v5494_v52, %v2399_v28  ;;  %v6482_v29 = vld [vmem:[#allocation31_spill] sm:$0xff] }
 0x2a0   : > { %2625 = vst.msk [vmem:[#allocation2 + $0x38] sm:$0xff] %vm2617_vm0, %v2592_v40  ;;  %v2567_v59 = vadd.f32 %v5531_v0, %v2528_v50  ;;  %v2493_v23 = vmul.f32 %v5494_v52, %v2374_v19  ;;  %v5661_v36 = vadd.f32 %v1977_v58, %v5462_v38  ;;  %v2008_v14 = vadd.f32 %v1976_v16, %v5465_v44  ;;  %v6485_v38 = vld [vmem:[#allocation69_spill] sm:$0xff]  ;;  %v6488_v32 = vld [vmem:[#allocation51_spill] sm:$0xff] }
 0x2a1   : > { %v1978_v48 = vmul.f32 %v4866_v41, %v6482_v29  ;;  %v1980_v43 = vmul.f32 %v4866_v41, %v6483_v18  ;;  %v2594_v34 = vmax.f32 %v2562_v62, 0.0  ;;  %v2530_v54 = vadd.f32 %v2498_v15, %v2266_v46  ;;  %v2384_v44 = vpop.permute.xlu1 %2383  ;;  %v2409_v4 = vpop.permute.xlu0 %2408  ;;  %v2797_v19 = vld [vmem:[#allocation2 + $0x4] ss:$32 sm:$0x2] }
 0x2a2   : > { %v2599_v20 = vmax.f32 %v2567_v59, 0.0  ;;  %v2525_v42 = vadd.f32 %v2493_v23, %v2261_v1  ;;  %v2263_v61 = vadd.f32 %v2231_v49, %v5569_v10  ;;  %v2233_v35 = vmul.f32 %v5388_v11, %v6484_v12  ;;  %v2796_v29 = vld [vmem:[#allocation2 + $0x4] ss:$32 sm:$0x1] }
 0x2a3   : > { %v2268_v37 = vadd.f32 %v2236_v55, %v2004_v24  ;;  %v2238_v13 = vmul.f32 %v5388_v11, %v6485_v38  ;;  %2627 = vst.msk [vmem:[#allocation2 + $0x48] sm:$0xff] %vm2617_vm0, %v2594_v34  ;;  %v2569_v53 = vadd.f32 %v5531_v0, %v2530_v54  ;;  %v2495_v6 = vmul.f32 %v5494_v52, %v2384_v44  ;;  %v6487_v24 = vld [vmem:[#allocation42_spill] sm:$0xff]  ;;  %v5707_v18 = vld [vmem:[#allocation2 + $0x2] ss:$32 sm:$0x2] }
 0x2a4   : > { %2632 = vst.msk [vmem:[#allocation2 + $0x70] sm:$0xff] %vm2617_vm0, %v2599_v20  ;;  %v2564_v25 = vadd.f32 %v5531_v0, %v2525_v42  ;;  %v2500_v10 = vmul.f32 %v5494_v52, %v2409_v4  ;;  %v2010_v31 = vadd.f32 %v1978_v48, %v5474_v33  ;;  %v5681_v45 = vadd.f32 %v1980_v43, %v5482_v17  ;;  %v2813_v48 = vld [vmem:[#allocation2 + $0x5] ss:$32 sm:$0x2] }
 0x2a5   : > { %v1982_v3 = vmul.f32 %v4866_v41, %v6486_v26  ;;  %v1984_v63 = vmul.f32 %v4866_v41, %v6487_v24  ;;  %v2601_v58 = vmax.f32 %v2569_v53, 0.0  ;;  %v2527_v16 = vadd.f32 %v2495_v6, %v2263_v61  ;;  %v2419_v17 = vpop.permute.xlu1 %2418  ;;  %v2394_v51 = vpop.permute.xlu0 %2393  ;;  %v2799_v54 = vld [vmem:[#allocation2 + $0x4] ss:$32 sm:$0x4] }
 0x2a6   : > { %v2596_v47 = vmax.f32 %v2564_v25, 0.0  ;;  %v2532_v30 = vadd.f32 %v2500_v10, %v2268_v37  ;;  %v2265_v40 = vadd.f32 %v2233_v35, %v5587_v8  ;;  %v2235_v50 = vmul.f32 %v5388_v11, %v6488_v32  ;;  %v5715_v42 = vld [vmem:[#allocation2 + $0x3] ss:$32 sm:$0x2] }
 0x2a7   : > { %v2270_v1 = vadd.f32 %v2238_v13, %v2006_v39  ;;  %v2240_v33 = vmul.f32 %v5388_v11, %v5427_v9  ;;  %2634 = vst.msk [vmem:[#allocation2 + $0x80] sm:$0xff] %vm2617_vm0, %v2601_v58  ;;  %v2566_v41 = vadd.f32 %v5531_v0, %v2527_v16  ;;  %v2502_v46 = vmul.f32 %v5494_v52, %v2419_v17  ;;  %v6489_v39 = vld [vmem:[#allocation55_spill] sm:$0xff]  ;;  %v5725_v37 = vld [vmem:[#allocation2 + $0x15] ss:$32 sm:$0x2] }
 0x2a8   : > { %2629 = vst.msk [vmem:[#allocation2 + $0x58] sm:$0xff] %vm2617_vm0, %v2596_v47  ;;  %v2571_v49 = vadd.f32 %v5531_v0, %v2532_v30  ;;  %v2497_v8 = vmul.f32 %v5494_v52, %v2394_v51  ;;  %v5699_v60 = vadd.f32 %v1982_v3, %v5485_v27  ;;  %v2237_v9 = vmul.f32 %v5388_v11, %v6489_v39  ;;  %v2815_v35 = vld [vmem:[#allocation2 + $0x5] ss:$32 sm:$0x4] }
 0x2a9   : > { %v2241_v55 = vmul.f32 %v5388_v11, %v5425_v7  ;;  %v2242_v28 = vmul.f32 %v5388_v11, %v5471_v57  ;;  %v2598_v62 = vmax.f32 %v2566_v41, 0.0  ;;  %v2534_v15 = vadd.f32 %v2502_v46, %v2270_v1  ;;  %v2404_v20 = vpop.permute.xlu1 %2403  ;;  %v2429_v57 = vpop.permute.xlu0 %2428  ;;  %v2720_v38 = vld [vmem:[#allocation2 + $0x2] ss:$32 sm:$0x1] }
 0x2aa   : > { %v2603_v59 = vmax.f32 %v2571_v49, 0.0  ;;  %v2529_v23 = vadd.f32 %v2497_v8, %v2265_v40  ;;  %v5710_v27 = vadd.f32 %v1984_v63, %v5505_v5  ;;  %v2267_v43 = vadd.f32 %v2235_v50, %v5607_v2  ;;  %v2736_v13 = vld [vmem:[#allocation2 + $0x3] ss:$32 sm:$0x1] }
 0x2ab   : > { %v2272_v34 = vadd.f32 %v2240_v33, %v2008_v14  ;;  %v2244_v7 = vmul.f32 %v5388_v11, %v5512_v56  ;;  %2631 = vst.msk [vmem:[#allocation2 + $0x68] sm:$0xff] %vm2617_vm0, %v2598_v62  ;;  %v2573_v61 = vadd.f32 %v5531_v0, %v2534_v15  ;;  %v2499_v12 = vmul.f32 %v5494_v52, %v2404_v20  ;;  %v2812_v14 = vld [vmem:[#allocation2 + $0x5] ss:$32 sm:$0x1] }
 0x2ac   : > { %2636 = vst.msk [vmem:[#allocation2 + $0x90] sm:$0xff] %vm2617_vm0, %v2603_v59  ;;  %v2568_v5 = vadd.f32 %v5531_v0, %v2529_v23  ;;  %v2504_v2 = vmul.f32 %v5494_v52, %v2429_v57  ;;  %v5723_v56 = vld [vmem:[#allocation2 + $0x14] ss:$32 sm:$0x2]  ;;  %v2269_v44 = vadd.f32 %v2237_v9, %v5626_v22  ;;  %v5729_v4 = vadd.f32 %v2241_v55, %v5661_v36 }
 0x2ad   : > { %v5731_v53 = vadd.f32 %v2242_v28, %v2010_v31  ;;  %v2798_v25 = vor.u32 %v2797_v19, %v2796_v29  ;;  %v2723_v6 = vld [vmem:[#allocation2 + $0x2] ss:$32 sm:$0x4]  ;;  %v2739_v10 = vld [vmem:[#allocation2 + $0x3] ss:$32 sm:$0x4]  ;;  %v2531_v24 = vadd.f32 %v2499_v12, %v2267_v43  ;;  %v5734_v30 = vadd.f32 %v2244_v7, %v5681_v45  ;;  %v5736_v40 = vpop.permute.xlu1 %2194  ;;  %v2414_v22 = vpop.permute.xlu0 %2413 }
 0x2ae   : > { %v2605_v26 = vmax.f32 %v2573_v61, 0.0  ;;  %v2600_v3 = vmax.f32 %v2568_v5, 0.0  ;;  %v2536_v63 = vadd.f32 %v2504_v2, %v2272_v34  ;;  %v2828_v58 = vld [vmem:[#allocation2 + $0x14] ss:$32 sm:$0x1]  ;;  %v2814_v36 = vor.u32 %v2813_v48, %v2812_v14 }
 0x2af   : > { %v2844_v47 = vld [vmem:[#allocation2 + $0x15] ss:$32 sm:$0x1]  ;;  %v2753_v16 = vld [vmem:[#allocation2 + $0x12] ss:$32 sm:$0x2]  ;;  %v2722_v50 = vor.u32 %v5707_v18, %v2720_v38  ;;  %v2738_v1 = vor.u32 %v5715_v42, %v2736_v13  ;;  %v2570_v51 = vadd.f32 %v5531_v0, %v2531_v24  ;;  %v2501_v41 = vmul.f32 %v5494_v52, %v2414_v22 }
 0x2b0   : > { %v2831_v32 = vld [vmem:[#allocation2 + $0x14] ss:$32 sm:$0x4]  ;;  %v2847_v31 = vld [vmem:[#allocation2 + $0x15] ss:$32 sm:$0x4]  ;;  %v2575_v45 = vadd.f32 %v5531_v0, %v2536_v63  ;;  %v5745_v49 = vor.u32 %v2799_v54, %v2798_v25  ;;  %v5749_v23 = vor.u32 %v2815_v35, %v2814_v36  ;;  %v2830_v29 = vor.u32 %v5723_v56, %v2828_v58 }
 0x2b1   : > { %v2769_v33 = vld [vmem:[#allocation2 + $0x13] ss:$32 sm:$0x2]  ;;  %v2873_v17 = vld [vmem:[#allocation2 + $0x6] ss:$32 sm:$0x2]  ;;  %v2846_v48 = vor.u32 %v5725_v37, %v2844_v47  ;;  %v5753_v18 = vor.u32 %v2723_v6, %v2722_v50  ;;  %v2533_v20 = vadd.f32 %v2501_v41, %v2269_v44  ;;  %v5759_v42 = vor.u32 %v2739_v10, %v2738_v1  ;;  %v2439_v5 = vpop.permute.xlu1 %2438  ;;  %v2205_v12 = vpop.permute.xlu0 %2204 }
 0x2b2   : > { %2638 = vst.msk [vmem:[#allocation2 + $0xa0] sm:$0xff] %vm2617_vm0, %v2605_v26  ;;  %2633 = vst.msk [vmem:[#allocation2 + $0x78] sm:$0xff] %vm2617_vm0, %v2600_v3  ;;  %v2752_v46 = vld [vmem:[#allocation2 + $0x12] ss:$32 sm:$0x1]  ;;  %v2602_v34 = vmax.f32 %v2570_v51, 0.0  ;;  %v2506_v6 = vmul.f32 %v5494_v52, %v2439_v5  ;;  %v5771_v10 = vor.u32 %v2831_v32, %v2830_v29 }
 0x2b3   : > { %v2755_v8 = vld [vmem:[#allocation2 + $0x12] ss:$32 sm:$0x4]  ;;  %v2768_v39 = vld [vmem:[#allocation2 + $0x13] ss:$32 sm:$0x1]  ;;  %v2754_v2 = vor.u32 %v2753_v16, %v2752_v46  ;;  %v2572_v25 = vadd.f32 %v5531_v0, %v2533_v20  ;;  %v5775_v3 = vor.u32 %v2847_v31, %v2846_v48 }
 0x2b4   : > { %v2771_v9 = vld [vmem:[#allocation2 + $0x13] ss:$32 sm:$0x4]  ;;  %v2872_v55 = vld [vmem:[#allocation2 + $0x6] ss:$32 sm:$0x1]  ;;  %v2770_v14 = vor.u32 %v2769_v33, %v2768_v39  ;;  %v2538_v1 = vadd.f32 %v2506_v6, %v5731_v53 }
 0x2b5   : > { %v2875_v28 = vld [vmem:[#allocation2 + $0x6] ss:$32 sm:$0x4]  ;;  %v2888_v19 = vld [vmem:[#allocation2 + $0x7] ss:$32 sm:$0x1]  ;;  %v2874_v35 = vor.u32 %v2873_v17, %v2872_v55  ;;  %v5779_v58 = vor.u32 %v2755_v8, %v2754_v2  ;;  %v5790_v51 = vpop.permute.xlu1 %2189 }
 0x2b6   : > { %v2889_v62 = vld [vmem:[#allocation2 + $0x7] ss:$32 sm:$0x2]  ;;  %v5747_v15 = vld [vmem:[#allocation2 + $0x4] ss:$32 sm:$0x8]  ;;  %v5783_v16 = vor.u32 %v2771_v9, %v2770_v14  ;;  %v2577_v9 = vadd.f32 %v5531_v0, %v2538_v1 }
 0x2b7   : > { %v2891_v59 = vld [vmem:[#allocation2 + $0x7] ss:$32 sm:$0x4]  ;;  %v2905_v43 = vld [vmem:[#allocation2 + $0x16] ss:$32 sm:$0x2]  ;;  %v2890_v37 = vor.u32 %v2889_v62, %v2888_v19  ;;  %v2876_v22 = vor.u32 %v2875_v28, %v2874_v35  ;;  %v2802_v32 = vor.u32 %v5747_v15, %v5745_v49  ;;  %v2246_v15 = vmul.f32 %v5388_v11, %v5736_v40 }
 0x2b8   : > { %v2607_v7 = vmax.f32 %v2575_v45, 0.0  ;;  %v5755_v57 = vld [vmem:[#allocation2 + $0x5] ss:$32 sm:$0x8]  ;;  %2635 = vst.msk [vmem:[#allocation2 + $0x88] sm:$0xff] %vm2617_vm0, %v2602_v34  ;;  %v2604_v50 = vmax.f32 %v2572_v25, 0.0  ;;  %v2449_v45 = vpop.permute.xlu0 %2448 }
 0x2b9   : > { %v5757_v54 = vld [vmem:[#allocation2 + $0x2] ss:$32 sm:$0x8]  ;;  %v5761_v61 = vld [vmem:[#allocation2 + $0x3] ss:$32 sm:$0x8]  ;;  %v2892_v36 = vor.u32 %v2891_v59, %v2890_v37  ;;  %v2818_v41 = vor.u32 %v5755_v57, %v5749_v23  ;;  %v2508_v55 = vmul.f32 %v5494_v52, %v2449_v45  ;;  %v2278_v6 = vadd.f32 %v2246_v15, %v5699_v60 }
 0x2ba   : > { %v5763_v56 = vld [vmem:[#allocation2 + $0x6] ss:$32 sm:$0x8]  ;;  %v5765_v38 = vld [vmem:[#allocation2 + $0x7] ss:$32 sm:$0x8]  ;;  %v2726_v46 = vor.u32 %v5757_v54, %v5753_v18  ;;  %v2742_v8 = vor.u32 %v5761_v61, %v5759_v42  ;;  %v2248_v42 = vmul.f32 %v5388_v11, %v2205_v12  ;;  %v2434_v61 = vpop.permute.xlu1 %2433 }
 0x2bb   : > { %v2904_v13 = vld [vmem:[#allocation2 + $0x16] ss:$32 sm:$0x1]  ;;  %2640 = vst.msk [vmem:[#allocation2 + $0xb0] sm:$0xff] %vm2617_vm0, %v2607_v7  ;;  %v2878_v53 = vor.u32 %v5763_v56, %v2876_v22  ;;  %2637 = vst.msk [vmem:[#allocation2 + $0x98] sm:$0xff] %vm2617_vm0, %v2604_v50  ;;  %v2894_v62 = vor.u32 %v5765_v38, %v2892_v36  ;;  %v2609_v34 = vmax.f32 %v2577_v9, 0.0  ;;  %v2540_v7 = vadd.f32 %v2508_v55, %v5734_v30 }
 0x2bc   : > { %v2907_v44 = vld [vmem:[#allocation2 + $0x16] ss:$32 sm:$0x4]  ;;  %v5773_v26 = vld [vmem:[#allocation2 + $0x14] ss:$32 sm:$0x8]  ;;  %v2906_v31 = vor.u32 %v2905_v43, %v2904_v13  ;;  %v2424_v5 = vpop.permute.xlu0 %2423  ;;  %v2505_v38 = vmul.f32 %v5494_v52, %v2434_v61 }
 0x2bd   : > { %v2921_v24 = vld [vmem:[#allocation2 + $0x17] ss:$32 sm:$0x2]  ;;  %v5777_v63 = vld [vmem:[#allocation2 + $0x15] ss:$32 sm:$0x8]  ;;  %v2834_v23 = vor.u32 %v5773_v26, %v5771_v10  ;;  %v2579_v37 = vadd.f32 %v5531_v0, %v2540_v7  ;;  %v2503_v13 = vmul.f32 %v5494_v52, %v2424_v5 }
 0x2be   : > { %v5781_v47 = vld [vmem:[#allocation2 + $0x12] ss:$32 sm:$0x8]  ;;  %v5788_v33 = vld [vmem:[#allocation2 + $0x13] ss:$32 sm:$0x8]  ;;  %v5805_v59 = vor.u32 %v2907_v44, %v2906_v31  ;;  %v2850_v29 = vor.u32 %v5777_v63, %v5775_v3 }
 0x2bf   : > { %v2920_v17 = vld [vmem:[#allocation2 + $0x17] ss:$32 sm:$0x1]  ;;  %v5799_v39 = vld [vmem:[#allocation2 + $0x16] ss:$32 sm:$0x8]  ;;  %v2758_v20 = vor.u32 %v5781_v47, %v5779_v58  ;;  %v2774_v57 = vor.u32 %v5788_v33, %v5783_v16  ;;  %v2537_v47 = vadd.f32 %v2505_v38, %v5729_v4  ;;  %v2535_v16 = vadd.f32 %v2503_v13, %v5413_v21  ;;  %v2469_v33 = vpop.permute.xlu1 %2468 }
 0x2c0   : > { %v2923_v49 = vld [vmem:[#allocation2 + $0x17] ss:$32 sm:$0x4]  ;;  %v2803_v28 = vld [vmem:[#allocation2 + $0x4] ss:$32 sm:$0x10]  ;;  %v2922_v43 = vor.u32 %v2921_v24, %v2920_v17  ;;  %v2910_v30 = vor.u32 %v5799_v39, %v5805_v59  ;;  %v2459_v31 = vpop.permute.xlu0 %2458 }
 0x2c1   : > { %v2819_v19 = vld [vmem:[#allocation2 + $0x5] ss:$32 sm:$0x10]  ;;  %v2727_v48 = vld [vmem:[#allocation2 + $0x2] ss:$32 sm:$0x10]  ;;  %v5821_v2 = vor.u32 %v2803_v28, %v2802_v32  ;;  %v2280_v32 = vadd.f32 %v2248_v42, %v5710_v27  ;;  %v2512_v27 = vmul.f32 %v5494_v52, %v2469_v33  ;;  %v2245_v28 = vmul.f32 %v5388_v11, %v5790_v51 }
 0x2c2   : > { %v2743_v18 = vld [vmem:[#allocation2 + $0x3] ss:$32 sm:$0x10]  ;;  %v2879_v54 = vld [vmem:[#allocation2 + $0x6] ss:$32 sm:$0x10]  ;;  %v2924_v56 = vor.u32 %v2923_v49, %v2922_v43  ;;  %v5829_v44 = vor.u32 %v2819_v19, %v2818_v41  ;;  %v5832_v10 = vor.u32 %v2727_v48, %v2726_v46  ;;  %v2576_v46 = vadd.f32 %v5531_v0, %v2537_v47 }
 0x2c3   : > { %v5818_v40 = vld [vmem:[#allocation2 + $0x17] ss:$32 sm:$0x8]  ;;  %v2835_v14 = vld [vmem:[#allocation2 + $0x14] ss:$32 sm:$0x10]  ;;  %v5834_v26 = vor.u32 %v2743_v18, %v2742_v8  ;;  %v5836_v24 = vor.u32 %v2879_v54, %v2878_v53  ;;  %v2574_v8 = vadd.f32 %v5531_v0, %v2535_v16  ;;  %v2510_v53 = vmul.f32 %v5494_v52, %v2459_v31  ;;  %v2210_v7 = vpop.permute.xlu1 %2209 }
 0x2c4   : > { %v2895_v35 = vld [vmem:[#allocation2 + $0x7] ss:$32 sm:$0x10]  ;;  %2642 = vst.msk [vmem:[#allocation2 + $0xc0] sm:$0xff] %vm2617_vm0, %v2609_v34  ;;  %v2611_v58 = vmax.f32 %v2579_v37, 0.0  ;;  %v5847_v17 = vor.u32 %v2835_v14, %v2834_v23  ;;  %v2926_v21 = vor.u32 %v5818_v40, %v2924_v56  ;;  %v2544_v18 = vadd.f32 %v2512_v27, %v2280_v32  ;;  %v2200_v54 = vpop.permute.xlu0 %2199 }
 0x2c5   : > { %v2851_v12 = vld [vmem:[#allocation2 + $0x15] ss:$32 sm:$0x10]  ;;  %v2759_v25 = vld [vmem:[#allocation2 + $0x12] ss:$32 sm:$0x10]  ;;  %v5844_v50 = vor.u32 %v2895_v35, %v2894_v62  ;;  %v2542_v43 = vadd.f32 %v2510_v53, %v2278_v6  ;;  %v2249_v16 = vmul.f32 %v5388_v11, %v2210_v7 }
 0x2c6   : > { %v2775_v3 = vld [vmem:[#allocation2 + $0x13] ss:$32 sm:$0x10]  ;;  %v2911_v63 = vld [vmem:[#allocation2 + $0x16] ss:$32 sm:$0x10]  ;;  %v5849_v45 = vor.u32 %v2851_v12, %v2850_v29  ;;  %v5871_v59 = vor.u32 %v2759_v25, %v2758_v20  ;;  %v2583_v5 = vadd.f32 %v5531_v0, %v2544_v18 }
 0x2c7   : > { %v5840_v22 = vld [vmem:[#allocation2 + $0x4] ss:$32 sm:$0x20]  ;;  %v5842_v36 = vld [vmem:[#allocation2 + $0x5] ss:$32 sm:$0x20]  ;;  %v5873_v15 = vor.u32 %v2775_v3, %v2774_v57  ;;  %v5875_v23 = vor.u32 %v2911_v63, %v2910_v30  ;;  %v2581_v14 = vadd.f32 %v5531_v0, %v2542_v43 }
 0x2c8   : > { %v2927_v60 = vld [vmem:[#allocation2 + $0x17] ss:$32 sm:$0x10]  ;;  %v3025_v1 = vld [vmem:[#allocation2 + $0xa] ss:$32 sm:$0x2]  ;;  %v2806_v51 = vor.u32 %v5840_v22, %v5821_v2  ;;  %v2822_v40 = vor.u32 %v5842_v36, %v5829_v44  ;;  %v2454_v22 = vpop.permute.xlu1 %2453  ;;  %v2444_v36 = vpop.permute.xlu0 %2443 }
 0x2c9   : > { %v5851_v41 = vld [vmem:[#allocation2 + $0x2] ss:$32 sm:$0x20]  ;;  %v5853_v4 = vld [vmem:[#allocation2 + $0x3] ss:$32 sm:$0x20]  ;;  %v5887_v42 = vor.u32 %v2927_v60, %v2926_v21  ;;  %v2509_v33 = vmul.f32 %v5494_v52, %v2454_v22  ;;  %v2507_v31 = vmul.f32 %v5494_v52, %v2444_v36 }
 0x2ca   : > { %2644 = vst.msk [vmem:[#allocation2 + $0xd0] sm:$0xff] %vm2617_vm0, %v2611_v58  ;;  %v5861_v39 = vld [vmem:[#allocation2 + $0x6] ss:$32 sm:$0x20]  ;;  %v2608_v29 = vmax.f32 %v2576_v46, 0.0  ;;  %v2606_v48 = vmax.f32 %v2574_v8, 0.0  ;;  %v2730_v2 = vor.u32 %v5851_v41, %v5832_v10  ;;  %v2746_v35 = vor.u32 %v5853_v4, %v5834_v26 }
 0x2cb   : > { %v5863_v49 = vld [vmem:[#allocation2 + $0x7] ss:$32 sm:$0x20]  ;;  %v3024_v9 = vld [vmem:[#allocation2 + $0xa] ss:$32 sm:$0x1]  ;;  %v2882_v44 = vor.u32 %v5861_v39, %v5836_v24  ;;  %v2247_v24 = vmul.f32 %v5388_v11, %v2200_v54 }
 0x2cc   : > { %v3027_v55 = vld [vmem:[#allocation2 + $0xa] ss:$32 sm:$0x4]  ;;  %v5867_v19 = vld [vmem:[#allocation2 + $0x14] ss:$32 sm:$0x20]  ;;  %v3026_v61 = vor.u32 %v3025_v1, %v3024_v9  ;;  %v2898_v12 = vor.u32 %v5863_v49, %v5844_v50  ;;  %v2474_v18 = vpop.permute.xlu1 %2473  ;;  %v2464_v43 = vpop.permute.xlu0 %2463 }
 0x2cd   : > { %v5869_v62 = vld [vmem:[#allocation2 + $0x15] ss:$32 sm:$0x20]  ;;  %v5877_v34 = vld [vmem:[#allocation2 + $0x12] ss:$32 sm:$0x20]  ;;  %v2838_v58 = vor.u32 %v5867_v19, %v5847_v17 }
 0x2ce   : > { %v5883_v20 = vld [vmem:[#allocation2 + $0x13] ss:$32 sm:$0x20]  ;;  %v5885_v57 = vld [vmem:[#allocation2 + $0x16] ss:$32 sm:$0x20]  ;;  %v5906_v25 = vor.u32 %v3027_v55, %v3026_v61  ;;  %v2854_v47 = vor.u32 %v5869_v62, %v5849_v45  ;;  %v2762_v1 = vor.u32 %v5877_v34, %v5871_v59  ;;  %v2511_v61 = vmul.f32 %v5494_v52, %v2464_v43 }
 0x2cf   : > { %2641 = vst.msk [vmem:[#allocation2 + $0xb8] sm:$0xff] %vm2617_vm0, %v2608_v29  ;;  %2639 = vst.msk [vmem:[#allocation2 + $0xa8] sm:$0xff] %vm2617_vm0, %v2606_v48  ;;  %v5897_v30 = vld [vmem:[#allocation2 + $0x17] ss:$32 sm:$0x20]  ;;  %v6490_v38 = vld [vmem:[#allocation35_spill] sm:$0xff]  ;;  %v2778_v11 = vor.u32 %v5883_v20, %v5873_v15  ;;  %v2914_v41 = vor.u32 %v5885_v57, %v5875_v23  ;;  %v2513_v57 = vmul.f32 %v5494_v52, %v2474_v18 }
 0x2d0   : > { %v5899_v56 = vld [vmem:[#allocation2 + $0xa] ss:$32 sm:$0x8]  ;;  %v3041_v37 = vld [vmem:[#allocation2 + $0xb] ss:$32 sm:$0x2]  ;;  %v2277_v13 = vadd.f32 %v2245_v28, %v6490_v38  ;;  %v2930_v46 = vor.u32 %v5897_v30, %v5887_v42 }
 0x2d1   : > { %v3040_v6 = vld [vmem:[#allocation2 + $0xb] ss:$32 sm:$0x1]  ;;  %v2615_v3 = vmax.f32 %v2583_v5, 0.0  ;;  %v2613_v63 = vmax.f32 %v2581_v14, 0.0  ;;  %v3030_v8 = vor.u32 %v5899_v56, %v5906_v25  ;;  %v6491_v49 = vld [vmem:[#allocation61_spill] sm:$0xff] }
 0x2d2   : > { %v3043_v10 = vld [vmem:[#allocation2 + $0xb] ss:$32 sm:$0x4]  ;;  %v2807_v26 = vld [vmem:[#allocation2 + $0x4] ss:$32 sm:$0x40]  ;;  %v3042_v32 = vor.u32 %v3041_v37, %v3040_v6  ;;  %v2541_v39 = vadd.f32 %v2509_v33, %v2277_v13  ;;  %v2539_v9 = vadd.f32 %v2507_v31, %v6491_v49 }
 0x2d3   : > { %v2823_v50 = vld [vmem:[#allocation2 + $0x5] ss:$32 sm:$0x40]  ;;  %v2731_v60 = vld [vmem:[#allocation2 + $0x2] ss:$32 sm:$0x40]  ;;  %v5924_v4 = vor.u32 %v2807_v26, %v2806_v51 }
 0x2d4   : > { %2648 = vst.msk [vmem:[#allocation2 + $0xf0] sm:$0xff] %vm2617_vm0, %v2615_v3  ;;  %2646 = vst.msk [vmem:[#allocation2 + $0xe0] sm:$0xff] %vm2617_vm0, %v2613_v63  ;;  %v2747_v17 = vld [vmem:[#allocation2 + $0x3] ss:$32 sm:$0x40]  ;;  %v5930_v27 = vor.u32 %v3043_v10, %v3042_v32  ;;  %v2824_v55 = vor.u32 %v2823_v50, %v2822_v40  ;;  %v5935_v19 = vor.u32 %v2731_v60, %v2730_v2 }
 0x2d5   : > { %v2883_v45 = vld [vmem:[#allocation2 + $0x6] ss:$32 sm:$0x40]  ;;  %v2899_v21 = vld [vmem:[#allocation2 + $0x7] ss:$32 sm:$0x40]  ;;  %v5939_v7 = vor.u32 %v2747_v17, %v2746_v35  ;;  %v2580_v20 = vadd.f32 %v5531_v0, %v2541_v39  ;;  %v2578_v40 = vadd.f32 %v5531_v0, %v2539_v9 }
 0x2d6   : > { %v5932_v53 = vld [vmem:[#allocation2 + $0xb] ss:$32 sm:$0x8]  ;;  %v2839_v28 = vld [vmem:[#allocation2 + $0x14] ss:$32 sm:$0x40]  ;;  %v5941_v51 = vor.u32 %v2883_v45, %v2882_v44  ;;  %v5947_v37 = vor.u32 %v2899_v21, %v2898_v12 }
 0x2d7   : > { %v3056_v62 = vld [vmem:[#allocation2 + $0x1a] ss:$32 sm:$0x1]  ;;  %v6492_v15 = vld [vmem:[#allocation67_spill] sm:$0xff]  ;;  %v2840_v2 = vor.u32 %v2839_v28, %v2838_v58  ;;  %v3046_v35 = vor.u32 %v5932_v53, %v5930_v27  ;;  %v2612_v44 = vmax.f32 %v2580_v20, 0.0  ;;  %v2610_v6 = vmax.f32 %v2578_v40, 0.0 }
 0x2d8   : > { %v3057_v59 = vld [vmem:[#allocation2 + $0x1a] ss:$32 sm:$0x2]  ;;  %v2281_v23 = vadd.f32 %v2249_v16, %v6492_v15  ;;  %v6493_v29 = vld [vmem:[#allocation39_spill] sm:$0xff] }
 0x2d9   : > { %v2279_v48 = vadd.f32 %v2247_v24, %v6493_v29  ;;  %v2855_v34 = vld [vmem:[#allocation2 + $0x15] ss:$32 sm:$0x40]  ;;  %v2763_v54 = vld [vmem:[#allocation2 + $0x12] ss:$32 sm:$0x40]  ;;  %v3058_v38 = vor.u32 %v3057_v59, %v3056_v62 }
 0x2da   : > { %v2779_v5 = vld [vmem:[#allocation2 + $0x13] ss:$32 sm:$0x40]  ;;  %v2915_v14 = vld [vmem:[#allocation2 + $0x16] ss:$32 sm:$0x40]  ;;  %v2545_v10 = vadd.f32 %v2513_v57, %v2281_v23  ;;  %v2856_v52 = vor.u32 %v2855_v34, %v2854_v47  ;;  %v2764_v36 = vor.u32 %v2763_v54, %v2762_v1 }
 0x2db   : > { %v3059_v13 = vld [vmem:[#allocation2 + $0x1a] ss:$32 sm:$0x4]  ;;  %v2543_v3 = vadd.f32 %v2511_v61, %v2279_v48  ;;  %v2931_v63 = vld [vmem:[#allocation2 + $0x17] ss:$32 sm:$0x40]  ;;  %v2780_v50 = vor.u32 %v2779_v5, %v2778_v11  ;;  %v2916_v58 = vor.u32 %v2915_v14, %v2914_v41 }
 0x2dc   : > { %v3072_v26 = vld [vmem:[#allocation2 + $0x1b] ss:$32 sm:$0x1]  ;;  %v2809_v24 = vld [vmem:[#allocation2 + $0x4] ss:$32 sm:$0x80]  ;;  %v2584_v32 = vadd.f32 %v5531_v0, %v2545_v10  ;;  %v3060_v9 = vor.u32 %v3059_v13, %v3058_v38  ;;  %v2932_v34 = vor.u32 %v2931_v63, %v2930_v46 }
 0x2dd   : > { %v3073_v16 = vld [vmem:[#allocation2 + $0x1b] ss:$32 sm:$0x2]  ;;  %v2825_v22 = vld [vmem:[#allocation2 + $0x5] ss:$32 sm:$0x80]  ;;  %v2582_v33 = vadd.f32 %v5531_v0, %v2543_v3  ;;  %v2810_v31 = vor.u32 %v2809_v24, %v5924_v4 }
 0x2de   : > { %v3061_v12 = vld [vmem:[#allocation2 + $0x1a] ss:$32 sm:$0x8]  ;;  %v3075_v60 = vld [vmem:[#allocation2 + $0x1b] ss:$32 sm:$0x4]  ;;  %v2826_v17 = vor.u32 %v2825_v22, %v2824_v55  ;;  %v3074_v28 = vor.u32 %v3073_v16, %v3072_v26 }
 0x2df   : > { %2645 = vst.msk [vmem:[#allocation2 + $0xd8] sm:$0xff] %vm2617_vm0, %v2612_v44  ;;  %2643 = vst.msk [vmem:[#allocation2 + $0xc8] sm:$0xff] %vm2617_vm0, %v2610_v6  ;;  %v2841_v45 = vld [vmem:[#allocation2 + $0x14] ss:$32 sm:$0x80]  ;;  %v2616_v62 = vmax.f32 %v2584_v32, 0.0  ;;  %v3062_v5 = vor.u32 %v3061_v12, %v3060_v9 }
 0x2e0   : > { %v2857_v21 = vld [vmem:[#allocation2 + $0x15] ss:$32 sm:$0x80]  ;;  %v2842_v39 = vor.u32 %v2841_v45, %v2840_v2  ;;  %v2733_v1 = vld [vmem:[#allocation2 + $0x2] ss:$32 sm:$0x80]  ;;  %v2859_v15 = vmax.f32 %v2810_v31, %v2826_v17 }
 0x2e1   : > { %v2858_v47 = vor.u32 %v2857_v21, %v2856_v52  ;;  %v2749_v11 = vld [vmem:[#allocation2 + $0x3] ss:$32 sm:$0x80]  ;;  %v3031_v41 = vld [vmem:[#allocation2 + $0xa] ss:$32 sm:$0x10]  ;;  %v2734_v23 = vor.u32 %v2733_v1, %v5935_v19 }
 0x2e2   : > { %v3047_v49 = vld [vmem:[#allocation2 + $0xb] ss:$32 sm:$0x10]  ;;  %v2614_v59 = vmax.f32 %v2582_v33, 0.0  ;;  %v2750_v4 = vor.u32 %v2749_v11, %v5939_v7  ;;  %2649 = vst.msk [vmem:[#allocation2 + $0xf8] sm:$0xff] %vm2617_vm0, %v2616_v62  ;;  %v3076_v7 = vor.u32 %v3075_v60, %v3074_v28  ;;  %v3032_v6 = vor.u32 %v3031_v41, %v3030_v8 }
 0x2e3   : > { %v2765_v29 = vld [vmem:[#allocation2 + $0x12] ss:$32 sm:$0x80]  ;;  %v3063_v0 = vld [vmem:[#allocation2 + $0x1a] ss:$32 sm:$0x10]  ;;  %v2860_v48 = vmax.f32 %v2842_v39, %v2858_v47 }
 0x2e4   : > { %v2766_v55 = vor.u32 %v2765_v29, %v2764_v36  ;;  %v2781_v18 = vld [vmem:[#allocation2 + $0x13] ss:$32 sm:$0x80]  ;;  %v2885_v43 = vld [vmem:[#allocation2 + $0x6] ss:$32 sm:$0x80]  ;;  %v2783_v2 = vmax.f32 %v2734_v23, %v2750_v4 }
 0x2e5   : > { %v3033_v54 = vld [vmem:[#allocation2 + $0xa] ss:$32 sm:$0x20]  ;;  %v3049_v20 = vld [vmem:[#allocation2 + $0xb] ss:$32 sm:$0x20]  ;;  %v2782_v40 = vor.u32 %v2781_v18, %v2780_v50  ;;  %v2886_v19 = vor.u32 %v2885_v43, %v5941_v51  ;;  %v2861_v14 = vmax.f32 %v2859_v15, %v2860_v48  ;;  %v3048_v51 = vor.u32 %v3047_v49, %v3046_v35 }
 0x2e6   : > { %2647 = vst.msk [vmem:[#allocation2 + $0xe8] sm:$0xff] %vm2617_vm0, %v2614_v59  ;;  %v2901_v57 = vld [vmem:[#allocation2 + $0x7] ss:$32 sm:$0x80]  ;;  %v3034_v50 = vor.u32 %v3033_v54, %v3032_v6 }
 0x2e7   : > { %v2917_v61 = vld [vmem:[#allocation2 + $0x16] ss:$32 sm:$0x80]  ;;  %v2902_v38 = vor.u32 %v2901_v57, %v5947_v37  ;;  %v2933_v42 = vld [vmem:[#allocation2 + $0x17] ss:$32 sm:$0x80]  ;;  %v2784_v46 = vmax.f32 %v2766_v55, %v2782_v40  ;;  %v3531_v63 = vpack.c.bf16 %v2861_v14, %v2861_v14  ;;  %v3064_v37 = vor.u32 %v3063_v0, %v3062_v5 }
 0x2e8   : > { %v2918_v13 = vor.u32 %v2917_v61, %v2916_v58  ;;  %v3077_v30 = vld [vmem:[#allocation2 + $0x1b] ss:$32 sm:$0x8]  ;;  %v2934_v44 = vor.u32 %v2933_v42, %v2932_v34  ;;  %v3065_v10 = vld [vmem:[#allocation2 + $0x1a] ss:$32 sm:$0x20]  ;;  %v3050_v58 = vor.u32 %v3049_v20, %v3048_v51 }
 0x2e9   : > { %v3079_v3 = vld [vmem:[#allocation2 + $0x1b] ss:$32 sm:$0x10]  ;;  %v2935_v26 = vmax.f32 %v2886_v19, %v2902_v38  ;;  %v3035_v16 = vld [vmem:[#allocation2 + $0xa] ss:$32 sm:$0x40]  ;;  %v3078_v22 = vor.u32 %v3077_v30, %v3076_v7  ;;  %v2785_v52 = vmax.f32 %v2783_v2, %v2784_v46  ;;  %2866 = vrot.lane.b32.xlu1 %v3531_v63, %s3568_s19  ;;  %v3066_v56 = vor.u32 %v3065_v10, %v3064_v37 }
 0x2ea   : > { %v3051_v24 = vld [vmem:[#allocation2 + $0xb] ss:$32 sm:$0x40]  ;;  %v2936_v36 = vmax.f32 %v2918_v13, %v2934_v44  ;;  %v3067_v12 = vld [vmem:[#allocation2 + $0x1a] ss:$32 sm:$0x40]  ;;  %v3036_v53 = vor.u32 %v3035_v16, %v3034_v50 }
 0x2eb   : > { %v3081_v60 = vld [vmem:[#allocation2 + $0x1b] ss:$32 sm:$0x20]  ;;  %v3080_v25 = vor.u32 %v3079_v3, %v3078_v22  ;;  %v3530_v8 = vpack.c.bf16 %v2785_v52, %v2785_v52  ;;  %v3052_v35 = vor.u32 %v3051_v24, %v3050_v58  ;;  %v3068_v17 = vor.u32 %v3067_v12, %v3066_v56  ;;  %v3069_v47 = vld [vmem:[#allocation2 + $0x1a] ss:$32 sm:$0x80] }
 0x2ec   : > { %v2937_v27 = vmax.f32 %v2935_v26, %v2936_v36  ;;  %v3083_v32 = vld [vmem:[#allocation2 + $0x1b] ss:$32 sm:$0x40]  ;;  %v2948_v59 = vld [vmem:[#allocation2 + $0x8] ss:$32 sm:$0x1] }
 0x2ed   : > { %v3037_v33 = vld [vmem:[#allocation2 + $0xa] ss:$32 sm:$0x80]  ;;  %v3053_v31 = vld [vmem:[#allocation2 + $0xb] ss:$32 sm:$0x80]  ;;  %v3082_v45 = vor.u32 %v3081_v60, %v3080_v25  ;;  %2790 = vrot.lane.b32.xlu0 %v3530_v8, %s3569_s20  ;;  %v3070_v11 = vor.u32 %v3069_v47, %v3068_v17 }
 0x2ee   : > { %v3038_v21 = vor.u32 %v3037_v33, %v3036_v53  ;;  %v3054_v39 = vor.u32 %v3053_v31, %v3052_v35  ;;  %v3085_v1 = vld [vmem:[#allocation2 + $0x1b] ss:$32 sm:$0x80]  ;;  %v3532_v49 = vpack.c.bf16 %v2937_v27, %v2937_v27  ;;  %v2949_v15 = vld [vmem:[#allocation2 + $0x8] ss:$32 sm:$0x2] }
 0x2ef   : > { %v3084_v41 = vor.u32 %v3083_v32, %v3082_v45  ;;  %v2965_v23 = vld [vmem:[#allocation2 + $0x9] ss:$32 sm:$0x2]  ;;  %v2951_v29 = vld [vmem:[#allocation2 + $0x8] ss:$32 sm:$0x4]  ;;  %v2950_v18 = vor.u32 %v2949_v15, %v2948_v59 }
 0x2f0   : > { %v3087_v28 = vmax.f32 %v3038_v21, %v3054_v39  ;;  %v2964_v0 = vld [vmem:[#allocation2 + $0x9] ss:$32 sm:$0x1]  ;;  %v2981_v55 = vld [vmem:[#allocation2 + $0x18] ss:$32 sm:$0x2] }
 0x2f1   : > { %v3086_v9 = vor.u32 %v3085_v1, %v3084_v41  ;;  %2942 = vrot.lane.b32.xlu0 %v3532_v49, %s3570_s21  ;;  %v2967_v4 = vld [vmem:[#allocation2 + $0x9] ss:$32 sm:$0x4]  ;;  %v2953_v43 = vld [vmem:[#allocation2 + $0x8] ss:$32 sm:$0x8]  ;;  %v2966_v34 = vor.u32 %v2965_v23, %v2964_v0  ;;  %v2952_v61 = vor.u32 %v2951_v29, %v2950_v18 }
 0x2f2   : > { %v2969_v54 = vld [vmem:[#allocation2 + $0x9] ss:$32 sm:$0x8]  ;;  %v2955_v40 = vld [vmem:[#allocation2 + $0x8] ss:$32 sm:$0x10] }
 0x2f3   : > { %v3088_v62 = vmax.f32 %v3070_v11, %v3086_v9  ;;  %v2980_v19 = vld [vmem:[#allocation2 + $0x18] ss:$32 sm:$0x1]  ;;  %v2968_v5 = vor.u32 %v2967_v4, %v2966_v34  ;;  %v2971_v7 = vld [vmem:[#allocation2 + $0x9] ss:$32 sm:$0x10]  ;;  %v2954_v30 = vor.u32 %v2953_v43, %v2952_v61 }
 0x2f4   : > { %v2983_v57 = vld [vmem:[#allocation2 + $0x18] ss:$32 sm:$0x4]  ;;  %v2982_v14 = vor.u32 %v2981_v55, %v2980_v19  ;;  %v2957_v38 = vld [vmem:[#allocation2 + $0x8] ss:$32 sm:$0x20] }
 0x2f5   : > { %v3089_v48 = vmax.f32 %v3087_v28, %v3088_v62  ;;  %v2985_v2 = vld [vmem:[#allocation2 + $0x18] ss:$32 sm:$0x8]  ;;  %v2996_v13 = vld [vmem:[#allocation2 + $0x19] ss:$32 sm:$0x1]  ;;  %v2970_v46 = vor.u32 %v2969_v54, %v2968_v5  ;;  %v2956_v26 = vor.u32 %v2955_v40, %v2954_v30 }
 0x2f6   : > { %v2997_v42 = vld [vmem:[#allocation2 + $0x19] ss:$32 sm:$0x2]  ;;  %v2973_v44 = vld [vmem:[#allocation2 + $0x9] ss:$32 sm:$0x20]  ;;  %v2984_v6 = vor.u32 %v2983_v57, %v2982_v14 }
 0x2f7   : > { %v3534_v20 = vpack.c.bf16 %v3089_v48, %v3089_v48  ;;  %v2998_v51 = vor.u32 %v2997_v42, %v2996_v13  ;;  %v2999_v10 = vld [vmem:[#allocation2 + $0x19] ss:$32 sm:$0x4]  ;;  %v2987_v3 = vld [vmem:[#allocation2 + $0x18] ss:$32 sm:$0x10]  ;;  %v2972_v24 = vor.u32 %v2971_v7, %v2970_v46  ;;  %v2958_v58 = vor.u32 %v2957_v38, %v2956_v26 }
 0x2f8   : > { %v3001_v63 = vld [vmem:[#allocation2 + $0x19] ss:$32 sm:$0x8]  ;;  %v2959_v16 = vld [vmem:[#allocation2 + $0x8] ss:$32 sm:$0x40]  ;;  %v2986_v22 = vor.u32 %v2985_v2, %v2984_v6 }
 0x2f9   : > { %3094 = vrot.lane.b32.xlu0 %v3534_v20, %s3571_s22  ;;  %v2975_v37 = vld [vmem:[#allocation2 + $0x9] ss:$32 sm:$0x40]  ;;  %v3000_v52 = vor.u32 %v2999_v10, %v2998_v51  ;;  %v2989_v36 = vld [vmem:[#allocation2 + $0x18] ss:$32 sm:$0x20]  ;;  %v2974_v60 = vor.u32 %v2973_v44, %v2972_v24  ;;  %v2960_v35 = vor.u32 %v2959_v16, %v2958_v58 }
 0x2fa   : > { %v3003_v50 = vld [vmem:[#allocation2 + $0x19] ss:$32 sm:$0x10]  ;;  %v2961_v12 = vld [vmem:[#allocation2 + $0x8] ss:$32 sm:$0x80]  ;;  %v2988_v25 = vor.u32 %v2987_v3, %v2986_v22 }
 0x2fb   : > { %v2977_v56 = vld [vmem:[#allocation2 + $0x9] ss:$32 sm:$0x80]  ;;  %v3002_v8 = vor.u32 %v3001_v63, %v3000_v52  ;;  %v2991_v27 = vld [vmem:[#allocation2 + $0x18] ss:$32 sm:$0x40]  ;;  %v2976_v32 = vor.u32 %v2975_v37, %v2974_v60  ;;  %v2962_v21 = vor.u32 %v2961_v12, %v2960_v35 }
 0x2fc   : > { %v3005_v53 = vld [vmem:[#allocation2 + $0x19] ss:$32 sm:$0x20]  ;;  %v2990_v33 = vor.u32 %v2989_v36, %v2988_v25  ;;  %v2993_v17 = vld [vmem:[#allocation2 + $0x18] ss:$32 sm:$0x80] }
 0x2fd   : > { %v3004_v31 = vor.u32 %v3003_v50, %v3002_v8  ;;  %v3007_v45 = vld [vmem:[#allocation2 + $0x19] ss:$32 sm:$0x40]  ;;  %v2978_v39 = vor.u32 %v2977_v56, %v2976_v32  ;;  %v3176_v9 = vld [vmem:[#allocation2 + $0xe] ss:$32 sm:$0x1] }
 0x2fe   : > { %v2992_v47 = vor.u32 %v2991_v27, %v2990_v33  ;;  %v3009_v11 = vld [vmem:[#allocation2 + $0x19] ss:$32 sm:$0x80]  ;;  %v3177_v28 = vld [vmem:[#allocation2 + $0xe] ss:$32 sm:$0x2] }
 0x2ff   : > { %v3006_v1 = vor.u32 %v3005_v53, %v3004_v31  ;;  %v3193_v62 = vld [vmem:[#allocation2 + $0xf] ss:$32 sm:$0x2]  ;;  %v3179_v59 = vld [vmem:[#allocation2 + $0xe] ss:$32 sm:$0x4]  ;;  %v3011_v29 = vmax.f32 %v2962_v21, %v2978_v39  ;;  %v3178_v4 = vor.u32 %v3177_v28, %v3176_v9 }
 0x300   : > { %v2994_v41 = vor.u32 %v2993_v17, %v2992_v47  ;;  %v3192_v15 = vld [vmem:[#allocation2 + $0xf] ss:$32 sm:$0x1]  ;;  %v3209_v48 = vld [vmem:[#allocation2 + $0x1e] ss:$32 sm:$0x2] }
 0x301   : > { %v3008_v49 = vor.u32 %v3007_v45, %v3006_v1  ;;  %v3195_v0 = vld [vmem:[#allocation2 + $0xf] ss:$32 sm:$0x4]  ;;  %v3181_v55 = vld [vmem:[#allocation2 + $0xe] ss:$32 sm:$0x8]  ;;  %v3194_v18 = vor.u32 %v3193_v62, %v3192_v15  ;;  %v3180_v57 = vor.u32 %v3179_v59, %v3178_v4 }
 0x302   : > { %v3197_v43 = vld [vmem:[#allocation2 + $0xf] ss:$32 sm:$0x8]  ;;  %v3183_v54 = vld [vmem:[#allocation2 + $0xe] ss:$32 sm:$0x10] }
 0x303   : > { %v3010_v23 = vor.u32 %v3009_v11, %v3008_v49  ;;  %v3199_v20 = vld [vmem:[#allocation2 + $0xf] ss:$32 sm:$0x10]  ;;  %v3208_v40 = vld [vmem:[#allocation2 + $0x1e] ss:$32 sm:$0x1]  ;;  %v3196_v61 = vor.u32 %v3195_v0, %v3194_v18  ;;  %v3182_v42 = vor.u32 %v3181_v55, %v3180_v57 }
 0x304   : > { %v3211_v19 = vld [vmem:[#allocation2 + $0x1e] ss:$32 sm:$0x4]  ;;  %v3210_v5 = vor.u32 %v3209_v48, %v3208_v40  ;;  %v3225_v14 = vld [vmem:[#allocation2 + $0x1f] ss:$32 sm:$0x2] }
 0x305   : > { %v3012_v34 = vmax.f32 %v2994_v41, %v3010_v23  ;;  %v3213_v7 = vld [vmem:[#allocation2 + $0x1e] ss:$32 sm:$0x8]  ;;  %v3224_v38 = vld [vmem:[#allocation2 + $0x1f] ss:$32 sm:$0x1]  ;;  %v3198_v46 = vor.u32 %v3197_v43, %v3196_v61  ;;  %v3184_v26 = vor.u32 %v3183_v54, %v3182_v42 }
 0x306   : > { %v3227_v13 = vld [vmem:[#allocation2 + $0x1f] ss:$32 sm:$0x4]  ;;  %v3185_v30 = vld [vmem:[#allocation2 + $0xe] ss:$32 sm:$0x20]  ;;  %v3212_v6 = vor.u32 %v3211_v19, %v3210_v5  ;;  %v3226_v51 = vor.u32 %v3225_v14, %v3224_v38 }
 0x307   : > { %v3013_v2 = vmax.f32 %v3011_v29, %v3012_v34  ;;  %v3201_v44 = vld [vmem:[#allocation2 + $0xf] ss:$32 sm:$0x20]  ;;  %v3215_v3 = vld [vmem:[#allocation2 + $0x1e] ss:$32 sm:$0x10]  ;;  %v3200_v24 = vor.u32 %v3199_v20, %v3198_v46  ;;  %v3186_v58 = vor.u32 %v3185_v30, %v3184_v26 }
 0x308   : > { %v3229_v63 = vld [vmem:[#allocation2 + $0x1f] ss:$32 sm:$0x8]  ;;  %v3187_v16 = vld [vmem:[#allocation2 + $0xe] ss:$32 sm:$0x40]  ;;  %v3214_v22 = vor.u32 %v3213_v7, %v3212_v6  ;;  %v3228_v52 = vor.u32 %v3227_v13, %v3226_v51 }
 0x309   : > { %v3533_v10 = vpack.c.bf16 %v3013_v2, %v3013_v2  ;;  %v3203_v37 = vld [vmem:[#allocation2 + $0xf] ss:$32 sm:$0x40]  ;;  %v3217_v36 = vld [vmem:[#allocation2 + $0x1e] ss:$32 sm:$0x20]  ;;  %v3202_v60 = vor.u32 %v3201_v44, %v3200_v24  ;;  %v3188_v35 = vor.u32 %v3187_v16, %v3186_v58 }
 0x30a   : > { %v3231_v50 = vld [vmem:[#allocation2 + $0x1f] ss:$32 sm:$0x10]  ;;  %v3189_v12 = vld [vmem:[#allocation2 + $0xe] ss:$32 sm:$0x80]  ;;  %v3216_v25 = vor.u32 %v3215_v3, %v3214_v22  ;;  %v3230_v8 = vor.u32 %v3229_v63, %v3228_v52 }
 0x30b   : > { %3018 = vrot.lane.b32.xlu1 %v3533_v10, %s3572_s23  ;;  %v3205_v56 = vld [vmem:[#allocation2 + $0xf] ss:$32 sm:$0x80]  ;;  %v3219_v27 = vld [vmem:[#allocation2 + $0x1e] ss:$32 sm:$0x40]  ;;  %v3204_v32 = vor.u32 %v3203_v37, %v3202_v60  ;;  %v3190_v39 = vor.u32 %v3189_v12, %v3188_v35 }
 0x30c   : > { %v3233_v53 = vld [vmem:[#allocation2 + $0x1f] ss:$32 sm:$0x20]  ;;  %v3218_v33 = vor.u32 %v3217_v36, %v3216_v25  ;;  %v3221_v31 = vld [vmem:[#allocation2 + $0x1e] ss:$32 sm:$0x80]  ;;  %v3232_v17 = vor.u32 %v3231_v50, %v3230_v8 }
 0x30d   : > { %v3235_v45 = vld [vmem:[#allocation2 + $0x1f] ss:$32 sm:$0x40]  ;;  %v3206_v47 = vor.u32 %v3205_v56, %v3204_v32  ;;  %v3100_v41 = vld [vmem:[#allocation2 + $0xc] ss:$32 sm:$0x1] }
 0x30e   : > { %v3237_v21 = vld [vmem:[#allocation2 + $0x1f] ss:$32 sm:$0x80]  ;;  %v3220_v1 = vor.u32 %v3219_v27, %v3218_v33  ;;  %v3234_v11 = vor.u32 %v3233_v53, %v3232_v17  ;;  %v3101_v49 = vld [vmem:[#allocation2 + $0xc] ss:$32 sm:$0x2] }
 0x30f   : > { %v3117_v9 = vld [vmem:[#allocation2 + $0xd] ss:$32 sm:$0x2]  ;;  %v3103_v28 = vld [vmem:[#allocation2 + $0xc] ss:$32 sm:$0x4]  ;;  %v3102_v0 = vor.u32 %v3101_v49, %v3100_v41  ;;  %v3239_v43 = vmax.f32 %v3190_v39, %v3206_v47 }
 0x310   : > { %v3116_v62 = vld [vmem:[#allocation2 + $0xd] ss:$32 sm:$0x1]  ;;  %v3222_v59 = vor.u32 %v3221_v31, %v3220_v1  ;;  %v3236_v15 = vor.u32 %v3235_v45, %v3234_v11  ;;  %v3133_v29 = vld [vmem:[#allocation2 + $0x1c] ss:$32 sm:$0x2] }
 0x311   : > { %v3119_v23 = vld [vmem:[#allocation2 + $0xd] ss:$32 sm:$0x4]  ;;  %v3105_v48 = vld [vmem:[#allocation2 + $0xc] ss:$32 sm:$0x8]  ;;  %v3118_v4 = vor.u32 %v3117_v9, %v3116_v62  ;;  %v3104_v40 = vor.u32 %v3103_v28, %v3102_v0 }
 0x312   : > { %v3121_v55 = vld [vmem:[#allocation2 + $0xd] ss:$32 sm:$0x8]  ;;  %v3238_v18 = vor.u32 %v3237_v21, %v3236_v15  ;;  %v3107_v34 = vld [vmem:[#allocation2 + $0xc] ss:$32 sm:$0x10] }
 0x313   : > { %v3132_v54 = vld [vmem:[#allocation2 + $0x1c] ss:$32 sm:$0x1]  ;;  %v3120_v19 = vor.u32 %v3119_v23, %v3118_v4  ;;  %v3123_v57 = vld [vmem:[#allocation2 + $0xd] ss:$32 sm:$0x10]  ;;  %v3106_v13 = vor.u32 %v3105_v48, %v3104_v40 }
 0x314   : > { %v3135_v20 = vld [vmem:[#allocation2 + $0x1c] ss:$32 sm:$0x4]  ;;  %v3134_v61 = vor.u32 %v3133_v29, %v3132_v54  ;;  %v3240_v7 = vmax.f32 %v3222_v59, %v3238_v18  ;;  %v3109_v14 = vld [vmem:[#allocation2 + $0xc] ss:$32 sm:$0x20] }
 0x315   : > { %v3137_v5 = vld [vmem:[#allocation2 + $0x1c] ss:$32 sm:$0x8]  ;;  %v3148_v2 = vld [vmem:[#allocation2 + $0x1d] ss:$32 sm:$0x1]  ;;  %v3122_v42 = vor.u32 %v3121_v55, %v3120_v19  ;;  %v3108_v63 = vor.u32 %v3107_v34, %v3106_v13 }
 0x316   : > { %v3149_v38 = vld [vmem:[#allocation2 + $0x1d] ss:$32 sm:$0x2]  ;;  %v3125_v30 = vld [vmem:[#allocation2 + $0xd] ss:$32 sm:$0x20]  ;;  %v3136_v46 = vor.u32 %v3135_v20, %v3134_v61  ;;  %v3241_v51 = vmax.f32 %v3239_v43, %v3240_v7 }
 0x317   : > { %v3150_v44 = vor.u32 %v3149_v38, %v3148_v2  ;;  %v3151_v6 = vld [vmem:[#allocation2 + $0x1d] ss:$32 sm:$0x4]  ;;  %v3139_v10 = vld [vmem:[#allocation2 + $0x1c] ss:$32 sm:$0x10]  ;;  %v3124_v16 = vor.u32 %v3123_v57, %v3122_v42  ;;  %v3110_v58 = vor.u32 %v3109_v14, %v3108_v63 }
 0x318   : > { %v3153_v3 = vld [vmem:[#allocation2 + $0x1d] ss:$32 sm:$0x8]  ;;  %v3111_v26 = vld [vmem:[#allocation2 + $0xc] ss:$32 sm:$0x40]  ;;  %v3138_v37 = vor.u32 %v3137_v5, %v3136_v46  ;;  %v3536_v52 = vpack.c.bf16 %v3241_v51, %v3241_v51 }
 0x319   : > { %v3127_v24 = vld [vmem:[#allocation2 + $0xd] ss:$32 sm:$0x40]  ;;  %v3152_v22 = vor.u32 %v3151_v6, %v3150_v44  ;;  %v3141_v36 = vld [vmem:[#allocation2 + $0x1c] ss:$32 sm:$0x20]  ;;  %v3126_v60 = vor.u32 %v3125_v30, %v3124_v16  ;;  %v3112_v35 = vor.u32 %v3111_v26, %v3110_v58 }
 0x31a   : > { %v3155_v50 = vld [vmem:[#allocation2 + $0x1d] ss:$32 sm:$0x10]  ;;  %v3113_v12 = vld [vmem:[#allocation2 + $0xc] ss:$32 sm:$0x80]  ;;  %v3140_v25 = vor.u32 %v3139_v10, %v3138_v37  ;;  %3246 = vrot.lane.b32.xlu0 %v3536_v52, %s3573_s24 }
 0x31b   : > { %v3129_v56 = vld [vmem:[#allocation2 + $0xd] ss:$32 sm:$0x80]  ;;  %v3154_v8 = vor.u32 %v3153_v3, %v3152_v22  ;;  %v3143_v27 = vld [vmem:[#allocation2 + $0x1c] ss:$32 sm:$0x40]  ;;  %v3128_v32 = vor.u32 %v3127_v24, %v3126_v60  ;;  %v3114_v21 = vor.u32 %v3113_v12, %v3112_v35 }
 0x31c   : > { %v3157_v53 = vld [vmem:[#allocation2 + $0x1d] ss:$32 sm:$0x20]  ;;  %v3142_v33 = vor.u32 %v3141_v36, %v3140_v25  ;;  %v3145_v17 = vld [vmem:[#allocation2 + $0x1c] ss:$32 sm:$0x80] }
 0x31d   : > { %v3156_v31 = vor.u32 %v3155_v50, %v3154_v8  ;;  %v3159_v45 = vld [vmem:[#allocation2 + $0x1d] ss:$32 sm:$0x40]  ;;  %v3130_v39 = vor.u32 %v3129_v56, %v3128_v32  ;;  %v2650_v9 = vld [vmem:[#allocation2] ss:$32 sm:$0x1] }
 0x31e   : > { %v3144_v47 = vor.u32 %v3143_v27, %v3142_v33  ;;  %v3161_v11 = vld [vmem:[#allocation2 + $0x1d] ss:$32 sm:$0x80]  ;;  %v2651_v28 = vld [vmem:[#allocation2] ss:$32 sm:$0x2] }
 0x31f   : > { %v3158_v1 = vor.u32 %v3157_v53, %v3156_v31  ;;  %v2667_v62 = vld [vmem:[#allocation2 + $0x1] ss:$32 sm:$0x2]  ;;  %v2653_v59 = vld [vmem:[#allocation2] ss:$32 sm:$0x4]  ;;  %v3163_v29 = vmax.f32 %v3114_v21, %v3130_v39  ;;  %v2652_v4 = vor.u32 %v2651_v28, %v2650_v9 }
 0x320   : > { %v3146_v41 = vor.u32 %v3145_v17, %v3144_v47  ;;  %v2666_v15 = vld [vmem:[#allocation2 + $0x1] ss:$32 sm:$0x1]  ;;  %v2683_v48 = vld [vmem:[#allocation2 + $0x10] ss:$32 sm:$0x2] }
 0x321   : > { %v3160_v49 = vor.u32 %v3159_v45, %v3158_v1  ;;  %v2669_v0 = vld [vmem:[#allocation2 + $0x1] ss:$32 sm:$0x4]  ;;  %v2655_v55 = vld [vmem:[#allocation2] ss:$32 sm:$0x8]  ;;  %v2668_v18 = vor.u32 %v2667_v62, %v2666_v15  ;;  %v2654_v57 = vor.u32 %v2653_v59, %v2652_v4 }
 0x322   : > { %v2671_v43 = vld [vmem:[#allocation2 + $0x1] ss:$32 sm:$0x8]  ;;  %v2657_v54 = vld [vmem:[#allocation2] ss:$32 sm:$0x10] }
 0x323   : > { %v3162_v23 = vor.u32 %v3161_v11, %v3160_v49  ;;  %v2673_v20 = vld [vmem:[#allocation2 + $0x1] ss:$32 sm:$0x10]  ;;  %v2682_v40 = vld [vmem:[#allocation2 + $0x10] ss:$32 sm:$0x1]  ;;  %v2670_v61 = vor.u32 %v2669_v0, %v2668_v18  ;;  %v2656_v42 = vor.u32 %v2655_v55, %v2654_v57 }
 0x324   : > { %v2685_v19 = vld [vmem:[#allocation2 + $0x10] ss:$32 sm:$0x4]  ;;  %v2684_v5 = vor.u32 %v2683_v48, %v2682_v40  ;;  %v2699_v14 = vld [vmem:[#allocation2 + $0x11] ss:$32 sm:$0x2] }
 0x325   : > { %v3164_v34 = vmax.f32 %v3146_v41, %v3162_v23  ;;  %v2687_v7 = vld [vmem:[#allocation2 + $0x10] ss:$32 sm:$0x8]  ;;  %v2698_v38 = vld [vmem:[#allocation2 + $0x11] ss:$32 sm:$0x1]  ;;  %v2672_v46 = vor.u32 %v2671_v43, %v2670_v61  ;;  %v2658_v26 = vor.u32 %v2657_v54, %v2656_v42 }
 0x326   : > { %v2701_v13 = vld [vmem:[#allocation2 + $0x11] ss:$32 sm:$0x4]  ;;  %v2659_v30 = vld [vmem:[#allocation2] ss:$32 sm:$0x20]  ;;  %v2686_v6 = vor.u32 %v2685_v19, %v2684_v5  ;;  %v2700_v51 = vor.u32 %v2699_v14, %v2698_v38 }
 0x327   : > { %v3165_v2 = vmax.f32 %v3163_v29, %v3164_v34  ;;  %v2675_v44 = vld [vmem:[#allocation2 + $0x1] ss:$32 sm:$0x20]  ;;  %v2689_v3 = vld [vmem:[#allocation2 + $0x10] ss:$32 sm:$0x10]  ;;  %v2674_v24 = vor.u32 %v2673_v20, %v2672_v46  ;;  %v2660_v58 = vor.u32 %v2659_v30, %v2658_v26 }
 0x328   : > { %v2703_v63 = vld [vmem:[#allocation2 + $0x11] ss:$32 sm:$0x8]  ;;  %v2661_v16 = vld [vmem:[#allocation2] ss:$32 sm:$0x40]  ;;  %v2688_v22 = vor.u32 %v2687_v7, %v2686_v6  ;;  %v2702_v52 = vor.u32 %v2701_v13, %v2700_v51 }
 0x329   : > { %v3535_v10 = vpack.c.bf16 %v3165_v2, %v3165_v2  ;;  %v2677_v37 = vld [vmem:[#allocation2 + $0x1] ss:$32 sm:$0x40]  ;;  %v2691_v36 = vld [vmem:[#allocation2 + $0x10] ss:$32 sm:$0x20]  ;;  %v2676_v60 = vor.u32 %v2675_v44, %v2674_v24  ;;  %v2662_v35 = vor.u32 %v2661_v16, %v2660_v58 }
 0x32a   : > { %v2705_v50 = vld [vmem:[#allocation2 + $0x11] ss:$32 sm:$0x10]  ;;  %v2663_v12 = vld [vmem:[#allocation2] ss:$32 sm:$0x80]  ;;  %v2690_v25 = vor.u32 %v2689_v3, %v2688_v22  ;;  %v2704_v8 = vor.u32 %v2703_v63, %v2702_v52 }
 0x32b   : > { %3170 = vrot.lane.b32.xlu1 %v3535_v10, %s3574_s25  ;;  %v2679_v56 = vld [vmem:[#allocation2 + $0x1] ss:$32 sm:$0x80]  ;;  %v2693_v27 = vld [vmem:[#allocation2 + $0x10] ss:$32 sm:$0x40]  ;;  %v2678_v32 = vor.u32 %v2677_v37, %v2676_v60  ;;  %v2664_v21 = vor.u32 %v2663_v12, %v2662_v35 }
 0x32c   : > { %v2707_v53 = vld [vmem:[#allocation2 + $0x11] ss:$32 sm:$0x20]  ;;  %v2692_v33 = vor.u32 %v2691_v36, %v2690_v25  ;;  %v2706_v31 = vor.u32 %v2705_v50, %v2704_v8  ;;  %v2695_v17 = vld [vmem:[#allocation2 + $0x10] ss:$32 sm:$0x80] }
 0x32d   : > { %v2709_v45 = vld [vmem:[#allocation2 + $0x11] ss:$32 sm:$0x40]  ;;  %v2680_v39 = vor.u32 %v2679_v56, %v2678_v32 }
 0x32e   : > { %v2694_v47 = vor.u32 %v2693_v27, %v2692_v33  ;;  %v2708_v1 = vor.u32 %v2707_v53, %v2706_v31  ;;  %v2711_v11 = vld [vmem:[#allocation2 + $0x11] ss:$32 sm:$0x80] }
 0x32f   : > { %v2713_v28 = vmax.f32 %v2664_v21, %v2680_v39 }
 0x330   : > { %v2696_v41 = vor.u32 %v2695_v17, %v2694_v47  ;;  %v2710_v49 = vor.u32 %v2709_v45, %v2708_v1 }
 0x332   : > { %v2712_v9 = vor.u32 %v2711_v11, %v2710_v49 }
 0x334   : > { %v2714_v62 = vmax.f32 %v2696_v41, %v2712_v9 }
 0x336   : > { %v2715_v59 = vmax.f32 %v2713_v28, %v2714_v62 }
 0x338   : > { %v2716_v15 = vpack.c.bf16 %v2715_v59, %v2715_v59 }
 0x33a   : > { %2718 = vst.msk [vmem:[%s168_s29] sm:$0xf] %vm2717_vm1, %v2716_v15 }
 0x35b   : > { %v2867_v23 = vpop.permute.xlu1 %2866 }
 0x35f   : > { %v2791_v29 = vpop.permute.xlu0 %2790 }
 0x360   : > { %2794 = vst.msk [vmem:[%s168_s29] sm:$0xf] %vm2793_vm2, %v2791_v29 }
 0x361   : > { %2870 = vst.msk [vmem:[%s168_s29] sm:$0xf] %vm2869_vm3, %v2867_v23 }
 0x363   : > { %v2943_v0 = vpop.permute.xlu0 %2942 }
 0x364   : > { %2946 = vst.msk [vmem:[%s168_s29] sm:$0xf] %vm2945_vm4, %v2943_v0 }
 0x36b   : > { %v3095_v48 = vpop.permute.xlu0 %3094 }
 0x37d   : > { %v3019_v4 = vpop.permute.xlu1 %3018 }
 0x37e   : > { %3022 = vst.msk [vmem:[%s168_s29] sm:$0xf] %vm3021_vm5, %v3019_v4 }
 0x37f   : > { %3098 = vst.msk [vmem:[%s168_s29] sm:$0xf] %vm3097_vm6, %v3095_v48 }
 0x38c   : > { %v3247_v55 = vpop.permute.xlu0 %3246 }
 0x39d   : > { %v3171_v18 = vpop.permute.xlu1 %3170 }
 0x39e   : > { %3174 = vst.msk [vmem:[%s168_s29] sm:$0xf] %vm3173_vm7, %v3171_v18 }
 0x39f   : > { %3250 = vst.msk [vmem:[%s168_s29] sm:$0xf] %vm3249_vm8, %v3247_v55 }
 0x3a0 PF: > { %s13_s12 = sadd.s32 1, %s3565_s12  }
 0x3a1   : > { %p10_p4 = scmp.ge.s32.totalorder %s13_s12, 4  }
 0x3a3   :  { %12 = sbr.rel (!%p10_p4) target bundleno = 1 (0x1), region = 103 }

</bundles_post_ra>
